<compile_context>
chip_gen: v7x
topology: tpu7x:2x2x1
jax: 0.10.0
libtpu: 0.0.40
codegen_flags: <defaults>
</compile_context>

<pallas_src>
import jax
import jax.numpy as jnp
from jax.experimental import pallas as pl
from jax.experimental.pallas import tpu as pltpu

IN_FEATURES = 1536
OUT_FEATURES = 1000


def linear_kernel(x_ref, w_ref, b_ref, o_ref):
    # x_ref: [B, K]  w_ref: [K, N]  b_ref: [1, N]  o_ref: [B, N]
    acc = jnp.dot(x_ref[...], w_ref[...], preferred_element_type=jnp.float32)
    o_ref[...] = (acc + b_ref[...]).astype(o_ref.dtype)


def prepare_params(weight, bias):
    """One-time parameter layout: PyTorch [OUT, IN] weight -> [K, N], bias -> [1, N].

    Do this at init / parameter-load time so the kernel reads the weight exactly
    once from HBM per call with no per-call transpose or padding copies.
    """
    w_kn = jnp.asarray(weight).T                 # [K, N] = [1536, 1000]
    b_2d = jnp.asarray(bias).reshape(1, -1)      # [1, N]
    return w_kn, b_2d


def flatten_linear(x_nchw, w_kn, b_2d):
    """x_nchw: [B, C, 1, 1] float32; w_kn: [K, N]; b_2d: [1, N]."""
    B = x_nchw.shape[0]
    # Flatten(start_dim=1, end_dim=-1): [B, C, 1, 1] -> [B, C]
    x2d = x_nchw.reshape(B, -1)
    K = x2d.shape[1]
    N = w_kn.shape[1]
    assert w_kn.shape[0] == K

    return pl.pallas_call(
        linear_kernel,
        out_shape=jax.ShapeDtypeStruct((B, N), jnp.float32),
        grid=(1,),
        in_specs=[
            # Block == full array dims -> no (8,128) padding needed, no glue copies.
            pl.BlockSpec((B, K), lambda i: (0, 0)),
            pl.BlockSpec((K, N), lambda i: (0, 0)),
            pl.BlockSpec((1, N), lambda i: (0, 0)),
        ],
        out_specs=pl.BlockSpec((B, N), lambda i: (0, 0)),
        compiler_params=pltpu.CompilerParams(
            dimension_semantics=("arbitrary",),
            # ~6.1 MB weight block, double-buffered by default -> ~12.3 MB.
            # Keep headroom but stay within v7x's smaller physical VMEM.
            vmem_limit_bytes=32 * 1024 * 1024,
        ),
    )(x2d, w_kn, b_2d)


def reference(x_nchw, weight, bias):
    x2d = x_nchw.reshape(x_nchw.shape[0], -1)
    return x2d @ weight.T + bias


if __name__ == "__main__":
    key = jax.random.PRNGKey(0)
    kx, kw, kb = jax.random.split(key, 3)

    # Input matches the module: [1, 1536, 1, 1]
    x = jax.random.normal(kx, (1, IN_FEATURES, 1, 1), dtype=jnp.float32)

    # Deterministic parameter init (same shapes as nn.Linear(1536, 1000)).
    bound = 1.0 / (IN_FEATURES ** 0.5)
    weight = jax.random.uniform(
        kw, (OUT_FEATURES, IN_FEATURES), dtype=jnp.float32,
        minval=-bound, maxval=bound)
    bias = jax.random.uniform(
        kb, (OUT_FEATURES,), dtype=jnp.float32, minval=-bound, maxval=bound)

    # One-time weight layout (paid at init, not per call).
    w_kn, b_2d = prepare_params(weight, bias)
    w_kn = jax.block_until_ready(w_kn)
    b_2d = jax.block_until_ready(b_2d)

    out = flatten_linear(x, w_kn, b_2d)
    jax.block_until_ready(out)

    ref = reference(x, weight, bias)
    assert out.shape == (1, OUT_FEATURES), out.shape
    assert jnp.allclose(out, ref, atol=1e-4, rtol=1e-4), (
        float(jnp.max(jnp.abs(out - ref))))

    print("KERNEL_OK")
</pallas_src>

<mosaic_0001>
module attributes {stable_mosaic.version = 11 : i64} {
  func.func @linear_kernel(%arg0: i32, %arg1: memref<1x1536xf32, #tpu.memory_space<vmem>>, %arg2: memref<1536x1000xf32, #tpu.memory_space<vmem>>, %arg3: memref<1x1000xf32, #tpu.memory_space<vmem>>, %arg4: memref<1x1000xf32, #tpu.memory_space<vmem>>) attributes {dimension_semantics = [#tpu.dimension_semantics<arbitrary>], iteration_bounds = array<i64: 1>, scalar_prefetch = 0 : i64, scratch_operands = 0 : i64, tpu.core_type = #tpu.core_type<tc>, window_params = [{pipeline_mode = #tpu.pipeline_mode<synchronous>, transform_indices = @transform_0, window_bounds = array<i64: 1, 1536>}, {pipeline_mode = #tpu.pipeline_mode<synchronous>, transform_indices = @transform_1, window_bounds = array<i64: 1536, 1000>}, {pipeline_mode = #tpu.pipeline_mode<synchronous>, transform_indices = @transform_2, window_bounds = array<i64: 1, 1000>}, {pipeline_mode = #tpu.pipeline_mode<synchronous>, transform_indices = @transform_3, window_bounds = array<i64: 1, 1000>}]} {
    %c0 = arith.constant 0 : index
    %c0_0 = arith.constant 0 : index
    %0 = vector.load %arg1[%c0, %c0_0] : memref<1x1536xf32, #tpu.memory_space<vmem>>, vector<1x1536xf32>
    %c0_1 = arith.constant 0 : index
    %c0_2 = arith.constant 0 : index
    %1 = vector.load %arg2[%c0_1, %c0_2] : memref<1536x1000xf32, #tpu.memory_space<vmem>>, vector<1536x1000xf32>
    %cst = arith.constant dense<0.000000e+00> : vector<1x1000xf32>
    %2 = tpu.matmul %0, %1, %cst {dimension_numbers = #tpu.dot_dimension_numbers<[1], [0], [0], [1], [0, 0, 1, 1], [], []>} : vector<1x1536xf32>, vector<1536x1000xf32>, vector<1x1000xf32> -> vector<1x1000xf32>
    %c0_3 = arith.constant 0 : index
    %c0_4 = arith.constant 0 : index
    %3 = vector.load %arg3[%c0_3, %c0_4] : memref<1x1000xf32, #tpu.memory_space<vmem>>, vector<1x1000xf32>
    %4 = arith.addf %2, %3 : vector<1x1000xf32>
    %c0_5 = arith.constant 0 : index
    %c0_6 = arith.constant 0 : index
    %5 = vector.load %arg4[%c0_5, %c0_6] : memref<1x1000xf32, #tpu.memory_space<vmem>>, vector<1x1000xf32>
    tpu.vector_store %arg4[%c0_5, %c0_6], %4 {strides = array<i32>} : memref<1x1000xf32, #tpu.memory_space<vmem>>, vector<1x1000xf32>,
    return
  }
  func.func @transform_0(%arg0: i32) -> (i32, i32) {
    %c0_i32 = arith.constant 0 : i32
    %c0_i32_0 = arith.constant 0 : i32
    %c0_i32_1 = arith.constant 0 : i32
    return %c0_i32, %c0_i32_0 : i32, i32
  }
  func.func @transform_1(%arg0: i32) -> (i32, i32) {
    %c0_i32 = arith.constant 0 : i32
    %c0_i32_0 = arith.constant 0 : i32
    %c0_i32_1 = arith.constant 0 : i32
    return %c0_i32, %c0_i32_0 : i32, i32
  }
  func.func @transform_2(%arg0: i32) -> (i32, i32) {
    %c0_i32 = arith.constant 0 : i32
    %c0_i32_0 = arith.constant 0 : i32
    %c0_i32_1 = arith.constant 0 : i32
    return %c0_i32, %c0_i32_0 : i32, i32
  }
  func.func @transform_3(%arg0: i32) -> (i32, i32) {
    %c0_i32 = arith.constant 0 : i32
    %c0_i32_0 = arith.constant 0 : i32
    %c0_i32_1 = arith.constant 0 : i32
    return %c0_i32, %c0_i32_0 : i32, i32
  }
}

</mosaic_0001>

<bundles_post_ra>
// kernel: tpu_custom_call.1
= control target key start
LH: loop header
LB: loop body
LE: loop exit
PB: predicated region body
PF: predicated region fallthrough
CT: control target
= control target key end

     0   :  { %s9866_s0 = inlined_call_operand.vmem [shape: f32[1,1536], index: 0, kind: input, shape index: {}]   ;;  %s9867_s1 = inlined_call_operand.vmem [shape: f32[1536,1000], index: 1, kind: input, shape index: {}]   ;;  %s9868_s2 = inlined_call_operand.vmem [shape: f32[1,1000], index: 2, kind: input, shape index: {}]   ;;  %s9869_s3 = inlined_call_operand.hbm [shape: f32[1,1000], index: 3, kind: output, shape index: {}]  }
   0x1   :  { %v18_v0 = vld [vmem:[%s9867_s1 + $0x8] sm:$0xff]  ;;  %v20_v2 = vld [vmem:[%s9867_s1 + $0x18] sm:$0xff]  ;;  %v17_v5 = vld [vmem:[%s9867_s1] sm:$0xff] }
   0x2   :  { %v26_v1 = vld [vmem:[%s9867_s1 + $0x48] sm:$0xff]  ;;  %v28_v4 = vld [vmem:[%s9867_s1 + $0x58] sm:$0xff]  ;;  %v25_v6 = vld [vmem:[%s9867_s1 + $0x40] sm:$0xff] }
   0x3   :  { %v3438_v3 = vpack.c.bf16 %v26_v1, %v18_v0  ;;  %v3822_v7 = vpack.c.bf16 %v28_v4, %v20_v2  ;;  %v3440_v8 = vpack.c.bf16 %v25_v6, %v17_v5  ;;  %v19_v9 = vld [vmem:[%s9867_s1 + $0x10] sm:$0xff]  ;;  %v34_v11 = vld [vmem:[%s9867_s1 + $0x88] sm:$0xff]  ;;  %v36_v14 = vld [vmem:[%s9867_s1 + $0x98] sm:$0xff] }
   0x4   :  { %v27_v10 = vld [vmem:[%s9867_s1 + $0x50] sm:$0xff]  ;;  %v42_v13 = vld [vmem:[%s9867_s1 + $0xc8] sm:$0xff]  ;;  %v44_v15 = vld [vmem:[%s9867_s1 + $0xd8] sm:$0xff] }
   0x5   :  { %3439 = vmatprep.subr.bf16.mxu0 %v3438_v3  ;;  %v3824_v12 = vpack.c.bf16 %v27_v10, %v19_v9  ;;  %3823 = vmatprep.subr.bf16.mxu1 %v3822_v7  ;;  %v3442_v16 = vpack.c.bf16 %v42_v13, %v34_v11  ;;  %v3826_v17 = vpack.c.bf16 %v44_v15, %v36_v14  ;;  %v33_v18 = vld [vmem:[%s9867_s1 + $0x80] sm:$0xff]  ;;  %v35_v20 = vld [vmem:[%s9867_s1 + $0x90] sm:$0xff]  ;;  %v50_v23 = vld [vmem:[%s9867_s1 + $0x108] sm:$0xff] }
   0x6   :  { %3441 = vmatpush1.bf16.msra.mxu0 %v3440_v8  ;;  %v41_v19 = vld [vmem:[%s9867_s1 + $0xc0] sm:$0xff]  ;;  %v43_v22 = vld [vmem:[%s9867_s1 + $0xd0] sm:$0xff]  ;;  %v58_v24 = vld [vmem:[%s9867_s1 + $0x148] sm:$0xff] }
   0x7   :  { %3825 = vmatpush1.bf16.msra.mxu1 %v3824_v12  ;;  %v3444_v21 = vpack.c.bf16 %v41_v19, %v33_v18  ;;  %3443 = vmatprep.subr.bf16.mxu0 %v3442_v16  ;;  %v3828_v25 = vpack.c.bf16 %v43_v22, %v35_v20  ;;  %v3446_v26 = vpack.c.bf16 %v58_v24, %v50_v23  ;;  %v52_v27 = vld [vmem:[%s9867_s1 + $0x118] sm:$0xff]  ;;  %v49_v29 = vld [vmem:[%s9867_s1 + $0x100] sm:$0xff]  ;;  %v51_v32 = vld [vmem:[%s9867_s1 + $0x110] sm:$0xff] }
   0x8   :  { %3827 = vmatprep.subr.bf16.mxu1 %v3826_v17  ;;  %v60_v28 = vld [vmem:[%s9867_s1 + $0x158] sm:$0xff]  ;;  %v57_v31 = vld [vmem:[%s9867_s1 + $0x140] sm:$0xff]  ;;  %v59_v33 = vld [vmem:[%s9867_s1 + $0x150] sm:$0xff] }
   0x9   :  { %v3830_v30 = vpack.c.bf16 %v60_v28, %v52_v27  ;;  %v3448_v34 = vpack.c.bf16 %v57_v31, %v49_v29  ;;  %v66_v35 = vld [vmem:[%s9867_s1 + $0x188] sm:$0xff]  ;;  %v68_v37 = vld [vmem:[%s9867_s1 + $0x198] sm:$0xff]  ;;  %v3832_v38 = vpack.c.bf16 %v59_v33, %v51_v32  ;;  %v65_v41 = vld [vmem:[%s9867_s1 + $0x180] sm:$0xff] }
   0xa   :  { %3445 = vmatpush1.bf16.msra.mxu0 %v3444_v21  ;;  %v74_v36 = vld [vmem:[%s9867_s1 + $0x1c8] sm:$0xff]  ;;  %v76_v40 = vld [vmem:[%s9867_s1 + $0x1d8] sm:$0xff]  ;;  %v73_v42 = vld [vmem:[%s9867_s1 + $0x1c0] sm:$0xff] }
   0xb   :  { %3829 = vmatpush1.bf16.msra.mxu1 %v3828_v25  ;;  %3447 = vmatprep.subr.bf16.mxu0 %v3446_v26  ;;  %v3450_v39 = vpack.c.bf16 %v74_v36, %v66_v35  ;;  %v3834_v43 = vpack.c.bf16 %v76_v40, %v68_v37  ;;  %v67_v44 = vld [vmem:[%s9867_s1 + $0x190] sm:$0xff]  ;;  %v82_v46 = vld [vmem:[%s9867_s1 + $0x208] sm:$0xff]  ;;  %v84_v48 = vld [vmem:[%s9867_s1 + $0x218] sm:$0xff]  ;;  %v3452_v50 = vpack.c.bf16 %v73_v42, %v65_v41 }
   0xc   :  { %3831 = vmatprep.subr.bf16.mxu1 %v3830_v30  ;;  %v75_v45 = vld [vmem:[%s9867_s1 + $0x1d0] sm:$0xff]  ;;  %v90_v47 = vld [vmem:[%s9867_s1 + $0x248] sm:$0xff]  ;;  %v92_v49 = vld [vmem:[%s9867_s1 + $0x258] sm:$0xff] }
   0xd   :  { %v3836_v51 = vpack.c.bf16 %v75_v45, %v67_v44  ;;  %v3454_v52 = vpack.c.bf16 %v90_v47, %v82_v46  ;;  %v81_v53 = vld [vmem:[%s9867_s1 + $0x200] sm:$0xff]  ;;  %v83_v55 = vld [vmem:[%s9867_s1 + $0x210] sm:$0xff]  ;;  %v3838_v56 = vpack.c.bf16 %v92_v49, %v84_v48  ;;  %v98_v58 = vld [vmem:[%s9867_s1 + $0x288] sm:$0xff]  ;;  %v1556_v46 = vlaneseq }
   0xe   :  { %3449 = vmatpush1.bf16.msra.mxu0 %v3448_v34  ;;  %v89_v54 = vld [vmem:[%s9867_s1 + $0x240] sm:$0xff]  ;;  %v91_v57 = vld [vmem:[%s9867_s1 + $0x250] sm:$0xff]  ;;  %v106_v59 = vld [vmem:[%s9867_s1 + $0x2c8] sm:$0xff] }
   0xf   :  { %3833 = vmatpush1.bf16.msra.mxu1 %v3832_v38  ;;  %3451 = vmatprep.subr.bf16.mxu0 %v3450_v39  ;;  %v100_v60 = vld [vmem:[%s9867_s1 + $0x298] sm:$0xff]  ;;  %v3456_v62 = vpack.c.bf16 %v89_v54, %v81_v53  ;;  %v3840_v63 = vpack.c.bf16 %v91_v57, %v83_v55  ;;  %v3458_v0 = vpack.c.bf16 %v106_v59, %v98_v58  ;;  %v97_v1 = vld [vmem:[%s9867_s1 + $0x280] sm:$0xff]  ;;  %v99_v3 = vld [vmem:[%s9867_s1 + $0x290] sm:$0xff]  ;;  %v5326_v59 = vshrl.u32 %v1556_v46, 7 }
  0x10   :  { %3835 = vmatprep.subr.bf16.mxu1 %v3834_v43  ;;  %v108_v61 = vld [vmem:[%s9867_s1 + $0x2d8] sm:$0xff]  ;;  %v105_v2 = vld [vmem:[%s9867_s1 + $0x2c0] sm:$0xff]  ;;  %v107_v5 = vld [vmem:[%s9867_s1 + $0x2d0] sm:$0xff] }
  0x11   :  { %v3842_v4 = vpack.c.bf16 %v108_v61, %v100_v60  ;;  %v114_v6 = vld [vmem:[%s9867_s1 + $0x308] sm:$0xff]  ;;  %v116_v8 = vld [vmem:[%s9867_s1 + $0x318] sm:$0xff]  ;;  %v3460_v10 = vpack.c.bf16 %v105_v2, %v97_v1  ;;  %v3844_v11 = vpack.c.bf16 %v107_v5, %v99_v3  ;;  %v113_v13 = vld [vmem:[%s9867_s1 + $0x300] sm:$0xff] }
  0x12   :  { %3453 = vmatpush1.bf16.msra.mxu0 %v3452_v50  ;;  %v122_v7 = vld [vmem:[%s9867_s1 + $0x348] sm:$0xff]  ;;  %v124_v9 = vld [vmem:[%s9867_s1 + $0x358] sm:$0xff]  ;;  %v121_v14 = vld [vmem:[%s9867_s1 + $0x340] sm:$0xff] }
  0x13   :  { %3837 = vmatpush1.bf16.msra.mxu1 %v3836_v51  ;;  %3455 = vmatprep.subr.bf16.mxu0 %v3454_v52  ;;  %v3462_v12 = vpack.c.bf16 %v122_v7, %v114_v6  ;;  %v115_v15 = vld [vmem:[%s9867_s1 + $0x310] sm:$0xff]  ;;  %v3846_v16 = vpack.c.bf16 %v124_v9, %v116_v8  ;;  %v130_v18 = vld [vmem:[%s9867_s1 + $0x388] sm:$0xff]  ;;  %v132_v20 = vld [vmem:[%s9867_s1 + $0x398] sm:$0xff]  ;;  %v3464_v22 = vpack.c.bf16 %v121_v14, %v113_v13  ;;  %v5353_v8 = vsub.s32 1, %v5326_v59 }
  0x14   :  { %3839 = vmatprep.subr.bf16.mxu1 %v3838_v56  ;;  %v123_v17 = vld [vmem:[%s9867_s1 + $0x350] sm:$0xff]  ;;  %v138_v19 = vld [vmem:[%s9867_s1 + $0x3c8] sm:$0xff]  ;;  %v140_v21 = vld [vmem:[%s9867_s1 + $0x3d8] sm:$0xff] }
  0x15   :  { %v3848_v23 = vpack.c.bf16 %v123_v17, %v115_v15  ;;  %v3466_v24 = vpack.c.bf16 %v138_v19, %v130_v18  ;;  %v129_v25 = vld [vmem:[%s9867_s1 + $0x380] sm:$0xff]  ;;  %v131_v27 = vld [vmem:[%s9867_s1 + $0x390] sm:$0xff]  ;;  %v3850_v28 = vpack.c.bf16 %v140_v21, %v132_v20  ;;  %v146_v30 = vld [vmem:[%s9867_s1 + $0x408] sm:$0xff] }
  0x16   :  { %3457 = vmatpush1.bf16.msra.mxu0 %v3456_v62  ;;  %v137_v26 = vld [vmem:[%s9867_s1 + $0x3c0] sm:$0xff]  ;;  %v139_v29 = vld [vmem:[%s9867_s1 + $0x3d0] sm:$0xff]  ;;  %v154_v31 = vld [vmem:[%s9867_s1 + $0x448] sm:$0xff] }
  0x17   :  { %3841 = vmatpush1.bf16.msra.mxu1 %v3840_v63  ;;  %3459 = vmatprep.subr.bf16.mxu0 %v3458_v0  ;;  %v148_v32 = vld [vmem:[%s9867_s1 + $0x418] sm:$0xff]  ;;  %v3468_v34 = vpack.c.bf16 %v137_v26, %v129_v25  ;;  %v3852_v35 = vpack.c.bf16 %v139_v29, %v131_v27  ;;  %v3470_v36 = vpack.c.bf16 %v154_v31, %v146_v30  ;;  %v145_v37 = vld [vmem:[%s9867_s1 + $0x400] sm:$0xff]  ;;  %v147_v39 = vld [vmem:[%s9867_s1 + $0x410] sm:$0xff] }
  0x18   :  { %3843 = vmatprep.subr.bf16.mxu1 %v3842_v4  ;;  %v156_v33 = vld [vmem:[%s9867_s1 + $0x458] sm:$0xff]  ;;  %v153_v38 = vld [vmem:[%s9867_s1 + $0x440] sm:$0xff]  ;;  %v155_v41 = vld [vmem:[%s9867_s1 + $0x450] sm:$0xff] }
  0x19   :  { %v3854_v40 = vpack.c.bf16 %v156_v33, %v148_v32  ;;  %v162_v42 = vld [vmem:[%s9867_s1 + $0x488] sm:$0xff]  ;;  %v164_v44 = vld [vmem:[%s9867_s1 + $0x498] sm:$0xff]  ;;  %v3472_v47 = vpack.c.bf16 %v153_v38, %v145_v37  ;;  %v3856_v48 = vpack.c.bf16 %v155_v41, %v147_v39  ;;  %v161_v50 = vld [vmem:[%s9867_s1 + $0x480] sm:$0xff] }
  0x1a   :  { %3461 = vmatpush1.bf16.msra.mxu0 %v3460_v10  ;;  %v170_v43 = vld [vmem:[%s9867_s1 + $0x4c8] sm:$0xff]  ;;  %v172_v45 = vld [vmem:[%s9867_s1 + $0x4d8] sm:$0xff]  ;;  %v169_v51 = vld [vmem:[%s9867_s1 + $0x4c0] sm:$0xff] }
  0x1b   :  { %3845 = vmatpush1.bf16.msra.mxu1 %v3844_v11  ;;  %3463 = vmatprep.subr.bf16.mxu0 %v3462_v12  ;;  %v3474_v49 = vpack.c.bf16 %v170_v43, %v162_v42  ;;  %v163_v52 = vld [vmem:[%s9867_s1 + $0x490] sm:$0xff]  ;;  %v3858_v53 = vpack.c.bf16 %v172_v45, %v164_v44  ;;  %v178_v55 = vld [vmem:[%s9867_s1 + $0x508] sm:$0xff]  ;;  %v180_v57 = vld [vmem:[%s9867_s1 + $0x518] sm:$0xff]  ;;  %v3476_v60 = vpack.c.bf16 %v169_v51, %v161_v50 }
  0x1c   :  { %3847 = vmatprep.subr.bf16.mxu1 %v3846_v16  ;;  %v171_v54 = vld [vmem:[%s9867_s1 + $0x4d0] sm:$0xff]  ;;  %v186_v56 = vld [vmem:[%s9867_s1 + $0x548] sm:$0xff]  ;;  %v188_v58 = vld [vmem:[%s9867_s1 + $0x558] sm:$0xff] }
  0x1d   :  { %v3860_v61 = vpack.c.bf16 %v171_v54, %v163_v52  ;;  %v3478_v62 = vpack.c.bf16 %v186_v56, %v178_v55  ;;  %v177_v63 = vld [vmem:[%s9867_s1 + $0x500] sm:$0xff]  ;;  %v179_v1 = vld [vmem:[%s9867_s1 + $0x510] sm:$0xff]  ;;  %v3862_v2 = vpack.c.bf16 %v188_v58, %v180_v57  ;;  %v194_v4 = vld [vmem:[%s9867_s1 + $0x588] sm:$0xff] }
  0x1e   :  { %3465 = vmatpush1.bf16.msra.mxu0 %v3464_v22  ;;  %v185_v0 = vld [vmem:[%s9867_s1 + $0x540] sm:$0xff]  ;;  %v187_v3 = vld [vmem:[%s9867_s1 + $0x550] sm:$0xff]  ;;  %v202_v5 = vld [vmem:[%s9867_s1 + $0x5c8] sm:$0xff] }
  0x1f   :  { %3849 = vmatpush1.bf16.msra.mxu1 %v3848_v23  ;;  %3467 = vmatprep.subr.bf16.mxu0 %v3466_v24  ;;  %v196_v6 = vld [vmem:[%s9867_s1 + $0x598] sm:$0xff]  ;;  %v3480_v9 = vpack.c.bf16 %v185_v0, %v177_v63  ;;  %v193_v10 = vld [vmem:[%s9867_s1 + $0x580] sm:$0xff]  ;;  %v3864_v11 = vpack.c.bf16 %v187_v3, %v179_v1  ;;  %v3482_v12 = vpack.c.bf16 %v202_v5, %v194_v4  ;;  %v195_v14 = vld [vmem:[%s9867_s1 + $0x590] sm:$0xff] }
  0x20   :  { %3851 = vmatprep.subr.bf16.mxu1 %v3850_v28  ;;  %v204_v7 = vld [vmem:[%s9867_s1 + $0x5d8] sm:$0xff]  ;;  %v201_v13 = vld [vmem:[%s9867_s1 + $0x5c0] sm:$0xff]  ;;  %v203_v15 = vld [vmem:[%s9867_s1 + $0x5d0] sm:$0xff] }
  0x21   :  { %v3866_v16 = vpack.c.bf16 %v204_v7, %v196_v6  ;;  %v210_v17 = vld [vmem:[%s9867_s1 + $0x608] sm:$0xff]  ;;  %v5376_v19 = vld [vmem:[%s9866_s0] sm:$0xff]  ;;  %v212_v20 = vld [vmem:[%s9867_s1 + $0x618] sm:$0xff]  ;;  %v3484_v23 = vpack.c.bf16 %v201_v13, %v193_v10  ;;  %v3868_v24 = vpack.c.bf16 %v203_v15, %v195_v14  ;;  %v5487_v10 = vsub.s32 0, %v5326_v59 }
  0x22   :  { %3469 = vmatpush1.bf16.msra.mxu0 %v3468_v34  ;;  %v218_v18 = vld [vmem:[%s9867_s1 + $0x648] sm:$0xff]  ;;  %v220_v21 = vld [vmem:[%s9867_s1 + $0x658] sm:$0xff]  ;;  %v5386_v22 = vrot.slane %v5376_v19, %v5353_v8  ;;  %v209_v26 = vld [vmem:[%s9867_s1 + $0x600] sm:$0xff] }
  0x23   :  { %3853 = vmatpush1.bf16.msra.mxu1 %v3852_v35  ;;  %3471 = vmatprep.subr.bf16.mxu0 %v3470_v36  ;;  %v3486_v25 = vpack.c.bf16 %v218_v18, %v210_v17  ;;  %v217_v27 = vld [vmem:[%s9867_s1 + $0x640] sm:$0xff]  ;;  %v211_v28 = vld [vmem:[%s9867_s1 + $0x610] sm:$0xff]  ;;  %v3870_v29 = vpack.c.bf16 %v220_v21, %v212_v20  ;;  %v226_v31 = vld [vmem:[%s9867_s1 + $0x688] sm:$0xff] }
  0x24   :  { %3855 = vmatprep.subr.bf16.mxu1 %v3854_v40  ;;  %v219_v30 = vld [vmem:[%s9867_s1 + $0x650] sm:$0xff]  ;;  %v234_v32 = vld [vmem:[%s9867_s1 + $0x6c8] sm:$0xff]  ;;  %1721 = vmatprep.mubr.f32.mxu0 %v5386_v22  ;;  %v228_v33 = vld [vmem:[%s9867_s1 + $0x698] sm:$0xff]  ;;  %v3488_v35 = vpack.c.bf16 %v217_v27, %v209_v26 }
  0x25   :  { %v236_v34 = vld [vmem:[%s9867_s1 + $0x6d8] sm:$0xff]  ;;  %2147 = vmatprep.mubr.f32.mxu1 %v5386_v22  ;;  %v3872_v36 = vpack.c.bf16 %v219_v30, %v211_v28  ;;  %v3490_v37 = vpack.c.bf16 %v234_v32, %v226_v31  ;;  %v225_v38 = vld [vmem:[%s9867_s1 + $0x680] sm:$0xff]  ;;  %v227_v40 = vld [vmem:[%s9867_s1 + $0x690] sm:$0xff] }
  0x26   :  { %3473 = vmatpush1.bf16.msra.mxu0 %v3472_v47  ;;  %v233_v39 = vld [vmem:[%s9867_s1 + $0x6c0] sm:$0xff]  ;;  %v3874_v41 = vpack.c.bf16 %v236_v34, %v228_v33  ;;  %v235_v42 = vld [vmem:[%s9867_s1 + $0x6d0] sm:$0xff]  ;;  %v242_v43 = vld [vmem:[%s9867_s1 + $0x708] sm:$0xff] }
  0x27   :  { %3857 = vmatpush1.bf16.msra.mxu1 %v3856_v48  ;;  %3475 = vmatprep.subr.bf16.mxu0 %v3474_v49  ;;  %v250_v44 = vld [vmem:[%s9867_s1 + $0x748] sm:$0xff]  ;;  %v244_v45 = vld [vmem:[%s9867_s1 + $0x718] sm:$0xff]  ;;  %v3492_v48 = vpack.c.bf16 %v233_v39, %v225_v38  ;;  %v3876_v49 = vpack.c.bf16 %v235_v42, %v227_v40  ;;  %v241_v51 = vld [vmem:[%s9867_s1 + $0x700] sm:$0xff] }
  0x28   :  { %3859 = vmatprep.subr.bf16.mxu1 %v3858_v53  ;;  %v252_v47 = vld [vmem:[%s9867_s1 + $0x758] sm:$0xff]  ;;  %v3494_v50 = vpack.c.bf16 %v250_v44, %v242_v43  ;;  %v249_v52 = vld [vmem:[%s9867_s1 + $0x740] sm:$0xff]  ;;  %v243_v53 = vld [vmem:[%s9867_s1 + $0x710] sm:$0xff] }
  0x29   :  { %v3878_v54 = vpack.c.bf16 %v252_v47, %v244_v45  ;;  %v251_v55 = vld [vmem:[%s9867_s1 + $0x750] sm:$0xff]  ;;  %v258_v56 = vld [vmem:[%s9867_s1 + $0x788] sm:$0xff]  ;;  %v260_v58 = vld [vmem:[%s9867_s1 + $0x798] sm:$0xff] }
  0x2a   :  { %3477 = vmatpush1.bf16.msra.mxu0 %v3476_v60  ;;  %v266_v57 = vld [vmem:[%s9867_s1 + $0x7c8] sm:$0xff]  ;;  %v268_v60 = vld [vmem:[%s9867_s1 + $0x7d8] sm:$0xff]  ;;  %v257_v0 = vld [vmem:[%s9867_s1 + $0x780] sm:$0xff] }
  0x2b   :  { %3861 = vmatpush1.bf16.msra.mxu1 %v3860_v61  ;;  %3479 = vmatprep.subr.bf16.mxu0 %v3478_v62  ;;  %v3496_v61 = vpack.c.bf16 %v249_v52, %v241_v51  ;;  %v3880_v62 = vpack.c.bf16 %v251_v55, %v243_v53  ;;  %v3498_v63 = vpack.c.bf16 %v266_v57, %v258_v56  ;;  %v265_v1 = vld [vmem:[%s9867_s1 + $0x7c0] sm:$0xff]  ;;  %v267_v4 = vld [vmem:[%s9867_s1 + $0x7d0] sm:$0xff]  ;;  %v274_v5 = vld [vmem:[%s9867_s1 + $0x808] sm:$0xff] }
  0x2c   :  { %3863 = vmatprep.subr.bf16.mxu1 %v3862_v2  ;;  %v259_v2 = vld [vmem:[%s9867_s1 + $0x790] sm:$0xff]  ;;  %v3882_v3 = vpack.c.bf16 %v268_v60, %v260_v58  ;;  %v282_v6 = vld [vmem:[%s9867_s1 + $0x848] sm:$0xff]  ;;  %v276_v7 = vld [vmem:[%s9867_s1 + $0x818] sm:$0xff] }
  0x2d   :  { %v3502_v13 = vpack.c.bf16 %v282_v6, %v274_v5  ;;  %v273_v14 = vld [vmem:[%s9867_s1 + $0x800] sm:$0xff]  ;;  %v283_v18 = vld [vmem:[%s9867_s1 + $0x850] sm:$0xff]  ;;  %v290_v20 = vld [vmem:[%s9867_s1 + $0x888] sm:$0xff] }
  0x2e   :  { %3481 = vmatpush1.bf16.msra.mxu0 %v3480_v9  ;;  %v284_v9 = vld [vmem:[%s9867_s1 + $0x858] sm:$0xff]  ;;  %v281_v15 = vld [vmem:[%s9867_s1 + $0x840] sm:$0xff]  ;;  %v298_v21 = vld [vmem:[%s9867_s1 + $0x8c8] sm:$0xff] }
  0x2f   :  { %3865 = vmatpush1.bf16.msra.mxu1 %v3864_v11  ;;  %3483 = vmatprep.subr.bf16.mxu0 %v3482_v12  ;;  %v3500_v11 = vpack.c.bf16 %v265_v1, %v257_v0  ;;  %v3884_v12 = vpack.c.bf16 %v267_v4, %v259_v2  ;;  %v3886_v17 = vpack.c.bf16 %v284_v9, %v276_v7  ;;  %v300_v26 = vld [vmem:[%s9867_s1 + $0x8d8] sm:$0xff]  ;;  %v289_v30 = vld [vmem:[%s9867_s1 + $0x880] sm:$0xff]  ;;  %v291_v32 = vld [vmem:[%s9867_s1 + $0x890] sm:$0xff] }
  0x30   :  { %3867 = vmatprep.subr.bf16.mxu1 %v3866_v16  ;;  %v275_v16 = vld [vmem:[%s9867_s1 + $0x810] sm:$0xff]  ;;  %v3504_v27 = vpack.c.bf16 %v281_v15, %v273_v14  ;;  %v297_v31 = vld [vmem:[%s9867_s1 + $0x8c0] sm:$0xff]  ;;  %v308_v38 = vld [vmem:[%s9867_s1 + $0x918] sm:$0xff] }
  0x31   :  { %v3888_v28 = vpack.c.bf16 %v283_v18, %v275_v16  ;;  %v299_v34 = vld [vmem:[%s9867_s1 + $0x8d0] sm:$0xff]  ;;  %v316_v39 = vld [vmem:[%s9867_s1 + $0x958] sm:$0xff]  ;;  %v3508_v40 = vpack.c.bf16 %v297_v31, %v289_v30  ;;  %v305_v43 = vld [vmem:[%s9867_s1 + $0x900] sm:$0xff] }
  0x32   :  { %3485 = vmatpush1.bf16.msra.mxu0 %v3484_v23  ;;  %v5508_v23 = vsub.s32 3, %v5326_v59  ;;  %v313_v44 = vld [vmem:[%s9867_s1 + $0x940] sm:$0xff]  ;;  %v307_v45 = vld [vmem:[%s9867_s1 + $0x910] sm:$0xff]  ;;  %v3894_v47 = vpack.c.bf16 %v316_v39, %v308_v38  ;;  %v324_v51 = vld [vmem:[%s9867_s1 + $0x998] sm:$0xff] }
  0x33   :  { %3869 = vmatpush1.bf16.msra.mxu1 %v3868_v24  ;;  %3487 = vmatprep.subr.bf16.mxu0 %v3486_v25  ;;  %v5512_v24 = vrot.slane %v5376_v19, %v5487_v10  ;;  %v292_v25 = vld [vmem:[%s9867_s1 + $0x898] sm:$0xff]  ;;  %v3512_v53 = vpack.c.bf16 %v313_v44, %v305_v43  ;;  %v321_v56 = vld [vmem:[%s9867_s1 + $0x980] sm:$0xff]  ;;  %v323_v58 = vld [vmem:[%s9867_s1 + $0x990] sm:$0xff] }
  0x34   :  { %3871 = vmatprep.subr.bf16.mxu1 %v3870_v29  ;;  %v3506_v29 = vpack.c.bf16 %v298_v21, %v290_v20  ;;  %v3890_v33 = vpack.c.bf16 %v300_v26, %v292_v25  ;;  %v332_v52 = vld [vmem:[%s9867_s1 + $0x9d8] sm:$0xff]  ;;  %v329_v57 = vld [vmem:[%s9867_s1 + $0x9c0] sm:$0xff]  ;;  %v339_v7 = vld [vmem:[%s9867_s1 + $0xa10] sm:$0xff] }
  0x35   :  { %v3898_v60 = vpack.c.bf16 %v332_v52, %v324_v51  ;;  %v340_v0 = vld [vmem:[%s9867_s1 + $0xa18] sm:$0xff]  ;;  %v3516_v2 = vpack.c.bf16 %v329_v57, %v321_v56  ;;  %v337_v5 = vld [vmem:[%s9867_s1 + $0xa00] sm:$0xff]  ;;  %v355_v25 = vld [vmem:[%s9867_s1 + $0xa90] sm:$0xff] }
  0x36   :  { %3489 = vmatpush1.bf16.msra.mxu0 %v3488_v35  ;;  %v306_v35 = vld [vmem:[%s9867_s1 + $0x908] sm:$0xff]  ;;  %v348_v1 = vld [vmem:[%s9867_s1 + $0xa58] sm:$0xff]  ;;  %v345_v6 = vld [vmem:[%s9867_s1 + $0xa40] sm:$0xff] }
  0x37   :  { %3873 = vmatpush1.bf16.msra.mxu1 %v3872_v36  ;;  %3491 = vmatprep.subr.bf16.mxu0 %v3490_v37  ;;  %v314_v36 = vld [vmem:[%s9867_s1 + $0x948] sm:$0xff]  ;;  %v5540_v37 = vrot.slane %v5376_v19, %v5508_v23  ;;  %v3902_v9 = vpack.c.bf16 %v348_v1, %v340_v0  ;;  %v356_v14 = vld [vmem:[%s9867_s1 + $0xa98] sm:$0xff]  ;;  %v3520_v16 = vpack.c.bf16 %v345_v6, %v337_v5  ;;  %v353_v20 = vld [vmem:[%s9867_s1 + $0xa80] sm:$0xff] }
  0x38   :  { %3875 = vmatprep.subr.bf16.mxu1 %v3874_v41  ;;  %v3892_v41 = vpack.c.bf16 %v299_v34, %v291_v32  ;;  %v3510_v42 = vpack.c.bf16 %v314_v36, %v306_v35  ;;  %v364_v15 = vld [vmem:[%s9867_s1 + $0xad8] sm:$0xff]  ;;  %v361_v21 = vld [vmem:[%s9867_s1 + $0xac0] sm:$0xff]  ;;  %v371_v38 = vld [vmem:[%s9867_s1 + $0xb10] sm:$0xff] }
  0x39   :  { %v3906_v26 = vpack.c.bf16 %v364_v15, %v356_v14  ;;  %v372_v30 = vld [vmem:[%s9867_s1 + $0xb18] sm:$0xff]  ;;  %v3524_v32 = vpack.c.bf16 %v361_v21, %v353_v20  ;;  %v369_v35 = vld [vmem:[%s9867_s1 + $0xb00] sm:$0xff]  ;;  %v387_v51 = vld [vmem:[%s9867_s1 + $0xb90] sm:$0xff] }
  0x3a   :  { %3493 = vmatpush1.bf16.msra.mxu0 %v3492_v48  ;;  %v315_v48 = vld [vmem:[%s9867_s1 + $0x950] sm:$0xff]  ;;  %v380_v31 = vld [vmem:[%s9867_s1 + $0xb58] sm:$0xff]  ;;  %v377_v36 = vld [vmem:[%s9867_s1 + $0xb40] sm:$0xff] }
  0x3b   :  { %3877 = vmatpush1.bf16.msra.mxu1 %v3876_v49  ;;  %3495 = vmatprep.subr.bf16.mxu0 %v3494_v50  ;;  %v322_v49 = vld [vmem:[%s9867_s1 + $0x988] sm:$0xff]  ;;  %v3910_v39 = vpack.c.bf16 %v380_v31, %v372_v30  ;;  %v388_v43 = vld [vmem:[%s9867_s1 + $0xb98] sm:$0xff]  ;;  %v403_v0 = vld [vmem:[%s9867_s1 + $0xc10] sm:$0xff] }
  0x3c   :  { %3879 = vmatprep.subr.bf16.mxu1 %v3878_v54  ;;  %v330_v50 = vld [vmem:[%s9867_s1 + $0x9c8] sm:$0xff]  ;;  %v3896_v54 = vpack.c.bf16 %v315_v48, %v307_v45  ;;  %v396_v44 = vld [vmem:[%s9867_s1 + $0xbd8] sm:$0xff]  ;;  %v3528_v45 = vpack.c.bf16 %v377_v36, %v369_v35  ;;  %v419_v14 = vld [vmem:[%s9867_s1 + $0xc90] sm:$0xff] }
  0x3d   :  { %v3514_v55 = vpack.c.bf16 %v330_v50, %v322_v49  ;;  %v385_v49 = vld [vmem:[%s9867_s1 + $0xb80] sm:$0xff]  ;;  %v3914_v52 = vpack.c.bf16 %v396_v44, %v388_v43  ;;  %v404_v56 = vld [vmem:[%s9867_s1 + $0xc18] sm:$0xff]  ;;  %v435_v30 = vld [vmem:[%s9867_s1 + $0xd10] sm:$0xff] }
  0x3e   :  { %3497 = vmatpush1.bf16.msra.mxu0 %v3496_v61  ;;  %v331_v61 = vld [vmem:[%s9867_s1 + $0x9d0] sm:$0xff]  ;;  %v393_v50 = vld [vmem:[%s9867_s1 + $0xbc0] sm:$0xff]  ;;  %v412_v57 = vld [vmem:[%s9867_s1 + $0xc58] sm:$0xff] }
  0x3f   :  { %3881 = vmatpush1.bf16.msra.mxu1 %v3880_v62  ;;  %3499 = vmatprep.subr.bf16.mxu0 %v3498_v63  ;;  %v338_v62 = vld [vmem:[%s9867_s1 + $0xa08] sm:$0xff]  ;;  %v3918_v1 = vpack.c.bf16 %v412_v57, %v404_v56  ;;  %v420_v5 = vld [vmem:[%s9867_s1 + $0xc98] sm:$0xff]  ;;  %v451_v43 = vld [vmem:[%s9867_s1 + $0xd90] sm:$0xff] }
  0x40   :  { %3883 = vmatprep.subr.bf16.mxu1 %v3882_v3  ;;  %v346_v63 = vld [vmem:[%s9867_s1 + $0xa48] sm:$0xff]  ;;  %v3900_v3 = vpack.c.bf16 %v331_v61, %v323_v58  ;;  %v3532_v58 = vpack.c.bf16 %v393_v50, %v385_v49  ;;  %v428_v6 = vld [vmem:[%s9867_s1 + $0xcd8] sm:$0xff]  ;;  %v467_v56 = vld [vmem:[%s9867_s1 + $0xe10] sm:$0xff] }
  0x41   :  { %v3518_v4 = vpack.c.bf16 %v346_v63, %v338_v62  ;;  %v401_v62 = vld [vmem:[%s9867_s1 + $0xc00] sm:$0xff]  ;;  %v3922_v15 = vpack.c.bf16 %v428_v6, %v420_v5  ;;  %v436_v20 = vld [vmem:[%s9867_s1 + $0xd18] sm:$0xff]  ;;  %v483_v5 = vld [vmem:[%s9867_s1 + $0xe90] sm:$0xff] }
  0x42   :  { %3501 = vmatpush1.bf16.msra.mxu0 %v3500_v11  ;;  %v347_v11 = vld [vmem:[%s9867_s1 + $0xa50] sm:$0xff]  ;;  %v409_v63 = vld [vmem:[%s9867_s1 + $0xc40] sm:$0xff]  ;;  %v444_v21 = vld [vmem:[%s9867_s1 + $0xd58] sm:$0xff] }
  0x43   :  { %3885 = vmatpush1.bf16.msra.mxu1 %v3884_v12  ;;  %3503 = vmatprep.subr.bf16.mxu0 %v3502_v13  ;;  %v354_v12 = vld [vmem:[%s9867_s1 + $0xa88] sm:$0xff]  ;;  %v3926_v31 = vpack.c.bf16 %v444_v21, %v436_v20  ;;  %v452_v35 = vld [vmem:[%s9867_s1 + $0xd98] sm:$0xff]  ;;  %v499_v20 = vld [vmem:[%s9867_s1 + $0xf10] sm:$0xff] }
  0x44   :  { %3887 = vmatprep.subr.bf16.mxu1 %v3886_v17  ;;  %v362_v13 = vld [vmem:[%s9867_s1 + $0xac8] sm:$0xff]  ;;  %v3904_v17 = vpack.c.bf16 %v347_v11, %v339_v7  ;;  %v3536_v7 = vpack.c.bf16 %v409_v63, %v401_v62  ;;  %v460_v36 = vld [vmem:[%s9867_s1 + $0xdd8] sm:$0xff] }
  0x45   :  { %1722 = vmatmul.mubr.f32.vlgmr.msra.gmra.mrb[0].mxu0 %v5512_v24  ;;  %v3522_v18 = vpack.c.bf16 %v362_v13, %v354_v12  ;;  %v417_v12 = vld [vmem:[%s9867_s1 + $0xc80] sm:$0xff]  ;;  %v3930_v44 = vpack.c.bf16 %v460_v36, %v452_v35  ;;  %v468_v49 = vld [vmem:[%s9867_s1 + $0xe18] sm:$0xff]  ;;  %v515_v35 = vld [vmem:[%s9867_s1 + $0xf90] sm:$0xff] }
  0x46   :  { %3505 = vmatpush1.bf16.msra.mxu0 %v3504_v27  ;;  %2148 = vmatmul.mubr.f32.vlgmr.msra.gmra.mrb[0].mxu1 %v5512_v24  ;;  %v363_v27 = vld [vmem:[%s9867_s1 + $0xad0] sm:$0xff]  ;;  %v425_v13 = vld [vmem:[%s9867_s1 + $0xcc0] sm:$0xff]  ;;  %v476_v50 = vld [vmem:[%s9867_s1 + $0xe58] sm:$0xff] }
  0x47   :  { %3889 = vmatpush1.bf16.msra.mxu1 %v3888_v28  ;;  %3507 = vmatprep.subr.bf16.mxu0 %v3506_v29  ;;  %v370_v28 = vld [vmem:[%s9867_s1 + $0xb08] sm:$0xff]  ;;  %v3934_v57 = vpack.c.bf16 %v476_v50, %v468_v49  ;;  %v484_v62 = vld [vmem:[%s9867_s1 + $0xe98] sm:$0xff]  ;;  %v537_v49 = vld [vmem:[%s9867_s1 + $0x1040] sm:$0xff] }
  0x48   :  { %3891 = vmatprep.subr.bf16.mxu1 %v3890_v33  ;;  %1792 = vmatprep.mubr.f32.mxu0 %v5540_v37  ;;  %v378_v29 = vld [vmem:[%s9867_s1 + $0xb48] sm:$0xff]  ;;  %v3908_v33 = vpack.c.bf16 %v363_v27, %v355_v25  ;;  %v3540_v25 = vpack.c.bf16 %v425_v13, %v417_v12  ;;  %v492_v63 = vld [vmem:[%s9867_s1 + $0xed8] sm:$0xff]  ;;  %v531_v50 = vld [vmem:[%s9867_s1 + $0x1010] sm:$0xff] }
  0x49   :  { %2218 = vmatprep.mubr.f32.mxu1 %v5540_v37  ;;  %v3526_v34 = vpack.c.bf16 %v378_v29, %v370_v28  ;;  %v433_v28 = vld [vmem:[%s9867_s1 + $0xd00] sm:$0xff]  ;;  %v3938_v6 = vpack.c.bf16 %v492_v63, %v484_v62  ;;  %v500_v12 = vld [vmem:[%s9867_s1 + $0xf18] sm:$0xff] }
  0x4a   :  { %3509 = vmatpush1.bf16.msra.mxu0 %v3508_v40  ;;  %v379_v40 = vld [vmem:[%s9867_s1 + $0xb50] sm:$0xff]  ;;  %v441_v29 = vld [vmem:[%s9867_s1 + $0xd40] sm:$0xff]  ;;  %v508_v13 = vld [vmem:[%s9867_s1 + $0xf58] sm:$0xff] }
  0x4b   :  { %3893 = vmatpush1.bf16.msra.mxu1 %v3892_v41  ;;  %3511 = vmatprep.subr.bf16.mxu0 %v3510_v42  ;;  %v386_v41 = vld [vmem:[%s9867_s1 + $0xb88] sm:$0xff]  ;;  %v3942_v21 = vpack.c.bf16 %v508_v13, %v500_v12  ;;  %v545_v63 = vld [vmem:[%s9867_s1 + $0x1080] sm:$0xff] }
  0x4c   :  { %3895 = vmatprep.subr.bf16.mxu1 %v3894_v47  ;;  %v394_v42 = vld [vmem:[%s9867_s1 + $0xbc8] sm:$0xff]  ;;  %v3912_v47 = vpack.c.bf16 %v379_v40, %v371_v38  ;;  %v3544_v38 = vpack.c.bf16 %v441_v29, %v433_v28  ;;  %v516_v28 = vld [vmem:[%s9867_s1 + $0xf98] sm:$0xff] }
  0x4d   :  { %v3530_v48 = vpack.c.bf16 %v394_v42, %v386_v41  ;;  %v449_v41 = vld [vmem:[%s9867_s1 + $0xd80] sm:$0xff]  ;;  %v524_v29 = vld [vmem:[%s9867_s1 + $0xfd8] sm:$0xff] }
  0x4e   :  { %3513 = vmatpush1.bf16.msra.mxu0 %v3512_v53  ;;  %v395_v53 = vld [vmem:[%s9867_s1 + $0xbd0] sm:$0xff]  ;;  %v457_v42 = vld [vmem:[%s9867_s1 + $0xdc0] sm:$0xff]  ;;  %v3946_v36 = vpack.c.bf16 %v524_v29, %v516_v28 }
  0x4f   :  { %3897 = vmatpush1.bf16.msra.mxu1 %v3896_v54  ;;  %3515 = vmatprep.subr.bf16.mxu0 %v3514_v55  ;;  %v402_v54 = vld [vmem:[%s9867_s1 + $0xc08] sm:$0xff]  ;;  %v577_v29 = vld [vmem:[%s9867_s1 + $0x1180] sm:$0xff] }
  0x50   :  { %3899 = vmatprep.subr.bf16.mxu1 %v3898_v60  ;;  %v410_v55 = vld [vmem:[%s9867_s1 + $0xc48] sm:$0xff]  ;;  %v3916_v60 = vpack.c.bf16 %v395_v53, %v387_v51  ;;  %v3548_v51 = vpack.c.bf16 %v457_v42, %v449_v41  ;;  %v532_v41 = vld [vmem:[%s9867_s1 + $0x1018] sm:$0xff] }
  0x51   :  { %v3534_v61 = vpack.c.bf16 %v410_v55, %v402_v54  ;;  %v465_v54 = vld [vmem:[%s9867_s1 + $0xe00] sm:$0xff]  ;;  %v540_v42 = vld [vmem:[%s9867_s1 + $0x1058] sm:$0xff] }
  0x52   :  { %3517 = vmatpush1.bf16.msra.mxu0 %v3516_v2  ;;  %v411_v2 = vld [vmem:[%s9867_s1 + $0xc50] sm:$0xff]  ;;  %v473_v55 = vld [vmem:[%s9867_s1 + $0xe40] sm:$0xff] }
  0x53   :  { %3901 = vmatpush1.bf16.msra.mxu1 %v3900_v3  ;;  %3519 = vmatprep.subr.bf16.mxu0 %v3518_v4  ;;  %v418_v3 = vld [vmem:[%s9867_s1 + $0xc88] sm:$0xff] }
  0x54   :  { %3903 = vmatprep.subr.bf16.mxu1 %v3902_v9  ;;  %v426_v4 = vld [vmem:[%s9867_s1 + $0xcc8] sm:$0xff]  ;;  %v3920_v9 = vpack.c.bf16 %v411_v2, %v403_v0  ;;  %v3552_v0 = vpack.c.bf16 %v473_v55, %v465_v54  ;;  %v1578_v55 = vsub.s32 5, %v5326_v59 }
  0x55   :  { %v3538_v11 = vpack.c.bf16 %v426_v4, %v418_v3  ;;  %v481_v3 = vld [vmem:[%s9867_s1 + $0xe80] sm:$0xff]  ;;  %v554_v54 = vld [vmem:[%s9867_s1 + $0x10c8] sm:$0xff] }
  0x56   :  { %3521 = vmatpush1.bf16.msra.mxu0 %v3520_v16  ;;  %v427_v16 = vld [vmem:[%s9867_s1 + $0xcd0] sm:$0xff]  ;;  %v489_v4 = vld [vmem:[%s9867_s1 + $0xec0] sm:$0xff] }
  0x57   :  { %3905 = vmatpush1.bf16.msra.mxu1 %v3904_v17  ;;  %3523 = vmatprep.subr.bf16.mxu0 %v3522_v18  ;;  %v434_v17 = vld [vmem:[%s9867_s1 + $0xd08] sm:$0xff] }
  0x58   :  { %3907 = vmatprep.subr.bf16.mxu1 %v3906_v26  ;;  %v442_v18 = vld [vmem:[%s9867_s1 + $0xd48] sm:$0xff]  ;;  %v3924_v26 = vpack.c.bf16 %v427_v16, %v419_v14  ;;  %v3556_v14 = vpack.c.bf16 %v489_v4, %v481_v3  ;;  %v555_v3 = vld [vmem:[%s9867_s1 + $0x10d0] sm:$0xff] }
  0x59   :  { %v3542_v27 = vpack.c.bf16 %v442_v18, %v434_v17  ;;  %v497_v17 = vld [vmem:[%s9867_s1 + $0xf00] sm:$0xff]  ;;  %v562_v4 = vld [vmem:[%s9867_s1 + $0x1108] sm:$0xff] }
  0x5a   :  { %3525 = vmatpush1.bf16.msra.mxu0 %v3524_v32  ;;  %v443_v32 = vld [vmem:[%s9867_s1 + $0xd50] sm:$0xff]  ;;  %v505_v18 = vld [vmem:[%s9867_s1 + $0xf40] sm:$0xff] }
  0x5b   :  { %3909 = vmatpush1.bf16.msra.mxu1 %v3908_v33  ;;  %3527 = vmatprep.subr.bf16.mxu0 %v3526_v34  ;;  %v450_v33 = vld [vmem:[%s9867_s1 + $0xd88] sm:$0xff] }
  0x5c   :  { %3911 = vmatprep.subr.bf16.mxu1 %v3910_v39  ;;  %v458_v34 = vld [vmem:[%s9867_s1 + $0xdc8] sm:$0xff]  ;;  %v3928_v39 = vpack.c.bf16 %v443_v32, %v435_v30  ;;  %v3560_v30 = vpack.c.bf16 %v505_v18, %v497_v17  ;;  %v571_v17 = vld [vmem:[%s9867_s1 + $0x1150] sm:$0xff] }
  0x5d   :  { %v3546_v40 = vpack.c.bf16 %v458_v34, %v450_v33  ;;  %v513_v33 = vld [vmem:[%s9867_s1 + $0xf80] sm:$0xff]  ;;  %v578_v18 = vld [vmem:[%s9867_s1 + $0x1188] sm:$0xff] }
  0x5e   :  { %3529 = vmatpush1.bf16.msra.mxu0 %v3528_v45  ;;  %v459_v45 = vld [vmem:[%s9867_s1 + $0xdd0] sm:$0xff]  ;;  %v521_v34 = vld [vmem:[%s9867_s1 + $0xfc0] sm:$0xff] }
  0x5f   :  { %3913 = vmatpush1.bf16.msra.mxu1 %v3912_v47  ;;  %3531 = vmatprep.subr.bf16.mxu0 %v3530_v48  ;;  %v466_v47 = vld [vmem:[%s9867_s1 + $0xe08] sm:$0xff] }
  0x60   :  { %3915 = vmatprep.subr.bf16.mxu1 %v3914_v52  ;;  %v474_v48 = vld [vmem:[%s9867_s1 + $0xe48] sm:$0xff]  ;;  %v3932_v52 = vpack.c.bf16 %v459_v45, %v451_v43  ;;  %v5889_v43 = vsub.s32 2, %v5326_v59 }
  0x61   :  { %v3550_v53 = vpack.c.bf16 %v474_v48, %v466_v47  ;;  %v529_v48 = vld [vmem:[%s9867_s1 + $0x1000] sm:$0xff] }
  0x62   :  { %3533 = vmatpush1.bf16.msra.mxu0 %v3532_v58  ;;  %v475_v58 = vld [vmem:[%s9867_s1 + $0xe50] sm:$0xff] }
  0x63   :  { %3917 = vmatpush1.bf16.msra.mxu1 %v3916_v60  ;;  %3535 = vmatprep.subr.bf16.mxu0 %v3534_v61  ;;  %v482_v60 = vld [vmem:[%s9867_s1 + $0xe88] sm:$0xff] }
  0x64   :  { %3919 = vmatprep.subr.bf16.mxu1 %v3918_v1  ;;  %v490_v61 = vld [vmem:[%s9867_s1 + $0xec8] sm:$0xff]  ;;  %v3936_v1 = vpack.c.bf16 %v475_v58, %v467_v56  ;;  %v5912_v56 = vrot.slane %v5376_v19, %v5889_v43  ;;  %v556_v58 = vld [vmem:[%s9867_s1 + $0x10d8] sm:$0xff] }
  0x65   :  { %v3554_v2 = vpack.c.bf16 %v490_v61, %v482_v60  ;;  %v3568_v60 = vpack.c.bf16 %v537_v49, %v529_v48  ;;  %v603_v48 = vld [vmem:[%s9867_s1 + $0x1250] sm:$0xff]  ;;  %v610_v49 = vld [vmem:[%s9867_s1 + $0x1288] sm:$0xff] }
  0x66   :  { %3537 = vmatpush1.bf16.msra.mxu0 %v3536_v7  ;;  %v491_v7 = vld [vmem:[%s9867_s1 + $0xed0] sm:$0xff] }
  0x67   :  { %3921 = vmatpush1.bf16.msra.mxu1 %v3920_v9  ;;  %3539 = vmatprep.subr.bf16.mxu0 %v3538_v11  ;;  %v498_v9 = vld [vmem:[%s9867_s1 + $0xf08] sm:$0xff] }
  0x68   :  { %3923 = vmatprep.subr.bf16.mxu1 %v3922_v15  ;;  %v506_v11 = vld [vmem:[%s9867_s1 + $0xf48] sm:$0xff]  ;;  %v3940_v15 = vpack.c.bf16 %v491_v7, %v483_v5  ;;  %v564_v7 = vld [vmem:[%s9867_s1 + $0x1118] sm:$0xff] }
  0x69   :  { %v3558_v16 = vpack.c.bf16 %v506_v11, %v498_v9  ;;  %v570_v5 = vld [vmem:[%s9867_s1 + $0x1148] sm:$0xff]  ;;  %v572_v9 = vld [vmem:[%s9867_s1 + $0x1158] sm:$0xff] }
  0x6a   :  { %3541 = vmatpush1.bf16.msra.mxu0 %v3540_v25  ;;  %v507_v25 = vld [vmem:[%s9867_s1 + $0xf50] sm:$0xff]  ;;  %v3574_v13 = vpack.c.bf16 %v570_v5, %v562_v4 }
  0x6b   :  { %3925 = vmatpush1.bf16.msra.mxu1 %v3924_v26  ;;  %3543 = vmatprep.subr.bf16.mxu0 %v3542_v27  ;;  %v514_v26 = vld [vmem:[%s9867_s1 + $0xf88] sm:$0xff] }
  0x6c   :  { %3927 = vmatprep.subr.bf16.mxu1 %v3926_v31  ;;  %v522_v27 = vld [vmem:[%s9867_s1 + $0xfc8] sm:$0xff]  ;;  %v3944_v31 = vpack.c.bf16 %v507_v25, %v499_v20  ;;  %v588_v25 = vld [vmem:[%s9867_s1 + $0x11d8] sm:$0xff] }
  0x6d   :  { %v3562_v32 = vpack.c.bf16 %v522_v27, %v514_v26  ;;  %v586_v20 = vld [vmem:[%s9867_s1 + $0x11c8] sm:$0xff] }
  0x6e   :  { %3545 = vmatpush1.bf16.msra.mxu0 %v3544_v38  ;;  %v523_v38 = vld [vmem:[%s9867_s1 + $0xfd0] sm:$0xff]  ;;  %v3578_v28 = vpack.c.bf16 %v586_v20, %v578_v18 }
  0x6f   :  { %3929 = vmatpush1.bf16.msra.mxu1 %v3928_v39  ;;  %3547 = vmatprep.subr.bf16.mxu0 %v3546_v40  ;;  %v530_v39 = vld [vmem:[%s9867_s1 + $0x1008] sm:$0xff]  ;;  %v3948_v45 = vpack.c.bf16 %v523_v38, %v515_v35  ;;  %v604_v38 = vld [vmem:[%s9867_s1 + $0x1258] sm:$0xff] }
  0x70   :  { %3931 = vmatprep.subr.bf16.mxu1 %v3930_v44  ;;  %v538_v40 = vld [vmem:[%s9867_s1 + $0x1048] sm:$0xff]  ;;  %v3564_v44 = vpack.c.bf16 %v521_v34, %v513_v33  ;;  %v587_v33 = vld [vmem:[%s9867_s1 + $0x11d0] sm:$0xff] }
  0x71   :  { %v3566_v47 = vpack.c.bf16 %v538_v40, %v530_v39  ;;  %v594_v34 = vld [vmem:[%s9867_s1 + $0x1208] sm:$0xff] }
  0x72   :  { %3549 = vmatpush1.bf16.msra.mxu0 %v3548_v51  ;;  %v3950_v51 = vpack.c.bf16 %v540_v42, %v532_v41  ;;  %v602_v35 = vld [vmem:[%s9867_s1 + $0x1248] sm:$0xff]  ;;  %v593_v42 = vld [vmem:[%s9867_s1 + $0x1200] sm:$0xff] }
  0x73   :  { %3933 = vmatpush1.bf16.msra.mxu1 %v3932_v52  ;;  %3551 = vmatprep.subr.bf16.mxu0 %v3550_v53  ;;  %v539_v52 = vld [vmem:[%s9867_s1 + $0x1050] sm:$0xff]  ;;  %v546_v53 = vld [vmem:[%s9867_s1 + $0x1088] sm:$0xff]  ;;  %v3582_v41 = vpack.c.bf16 %v602_v35, %v594_v34 }
  0x74   :  { %3935 = vmatprep.subr.bf16.mxu1 %v3934_v57  ;;  %v548_v57 = vld [vmem:[%s9867_s1 + $0x1098] sm:$0xff]  ;;  %v3952_v61 = vpack.c.bf16 %v539_v52, %v531_v50  ;;  %v3570_v62 = vpack.c.bf16 %v554_v54, %v546_v53  ;;  %v618_v50 = vld [vmem:[%s9867_s1 + $0x12c8] sm:$0xff] }
  0x75   :  { %v620_v52 = vld [vmem:[%s9867_s1 + $0x12d8] sm:$0xff] }
  0x76   :  { %3553 = vmatpush1.bf16.msra.mxu0 %v3552_v0  ;;  %v553_v0 = vld [vmem:[%s9867_s1 + $0x10c0] sm:$0xff] }
  0x77   :  { %3937 = vmatpush1.bf16.msra.mxu1 %v3936_v1  ;;  %3555 = vmatprep.subr.bf16.mxu0 %v3554_v2  ;;  %v547_v1 = vld [vmem:[%s9867_s1 + $0x1090] sm:$0xff]  ;;  %v3954_v2 = vpack.c.bf16 %v556_v58, %v548_v57  ;;  %v3572_v11 = vpack.c.bf16 %v553_v0, %v545_v63  ;;  %v3586_v57 = vpack.c.bf16 %v618_v50, %v610_v49  ;;  %v609_v58 = vld [vmem:[%s9867_s1 + $0x1280] sm:$0xff]  ;;  %v626_v0 = vld [vmem:[%s9867_s1 + $0x1308] sm:$0xff] }
  0x78   :  { %3939 = vmatprep.subr.bf16.mxu1 %v3938_v6  ;;  %v5941_v6 = vrot.slane %v5376_v19, %v1578_v55  ;;  %v3956_v12 = vpack.c.bf16 %v555_v3, %v547_v1  ;;  %v561_v19 = vld [vmem:[%s9867_s1 + $0x1100] sm:$0xff]  ;;  %v619_v63 = vld [vmem:[%s9867_s1 + $0x12d0] sm:$0xff]  ;;  %v634_v1 = vld [vmem:[%s9867_s1 + $0x1348] sm:$0xff] }
  0x79   :  { %v636_v3 = vld [vmem:[%s9867_s1 + $0x1358] sm:$0xff] }
  0x7a   :  { %3557 = vmatpush1.bf16.msra.mxu0 %v3556_v14  ;;  %v569_v14 = vld [vmem:[%s9867_s1 + $0x1140] sm:$0xff] }
  0x7b   :  { %3941 = vmatpush1.bf16.msra.mxu1 %v3940_v15  ;;  %3559 = vmatprep.subr.bf16.mxu0 %v3558_v16  ;;  %v563_v15 = vld [vmem:[%s9867_s1 + $0x1110] sm:$0xff]  ;;  %v3958_v16 = vpack.c.bf16 %v572_v9, %v564_v7  ;;  %v3576_v26 = vpack.c.bf16 %v569_v14, %v561_v19  ;;  %v3590_v7 = vpack.c.bf16 %v634_v1, %v626_v0  ;;  %v625_v9 = vld [vmem:[%s9867_s1 + $0x1300] sm:$0xff]  ;;  %v642_v14 = vld [vmem:[%s9867_s1 + $0x1388] sm:$0xff] }
  0x7c   :  { %3943 = vmatprep.subr.bf16.mxu1 %v3942_v21  ;;  %v580_v21 = vld [vmem:[%s9867_s1 + $0x1198] sm:$0xff]  ;;  %v3960_v27 = vpack.c.bf16 %v571_v17, %v563_v15  ;;  %v635_v19 = vld [vmem:[%s9867_s1 + $0x1350] sm:$0xff]  ;;  %v650_v15 = vld [vmem:[%s9867_s1 + $0x13c8] sm:$0xff] }
  0x7d   :  { %v652_v17 = vld [vmem:[%s9867_s1 + $0x13d8] sm:$0xff] }
  0x7e   :  { %3561 = vmatpush1.bf16.msra.mxu0 %v3560_v30  ;;  %v585_v30 = vld [vmem:[%s9867_s1 + $0x11c0] sm:$0xff] }
  0x7f   :  { %3945 = vmatpush1.bf16.msra.mxu1 %v3944_v31  ;;  %3563 = vmatprep.subr.bf16.mxu0 %v3562_v32  ;;  %v579_v31 = vld [vmem:[%s9867_s1 + $0x1190] sm:$0xff]  ;;  %v3962_v32 = vpack.c.bf16 %v588_v25, %v580_v21  ;;  %v3580_v39 = vpack.c.bf16 %v585_v30, %v577_v29  ;;  %v3594_v21 = vpack.c.bf16 %v650_v15, %v642_v14  ;;  %v641_v25 = vld [vmem:[%s9867_s1 + $0x1380] sm:$0xff]  ;;  %v658_v30 = vld [vmem:[%s9867_s1 + $0x1408] sm:$0xff] }
  0x80   :  { %3947 = vmatprep.subr.bf16.mxu1 %v3946_v36  ;;  %v596_v36 = vld [vmem:[%s9867_s1 + $0x1218] sm:$0xff]  ;;  %v3964_v40 = vpack.c.bf16 %v587_v33, %v579_v31  ;;  %v651_v29 = vld [vmem:[%s9867_s1 + $0x13d0] sm:$0xff]  ;;  %v666_v31 = vld [vmem:[%s9867_s1 + $0x1448] sm:$0xff] }
  0x81   :  { %v668_v33 = vld [vmem:[%s9867_s1 + $0x1458] sm:$0xff] }
  0x82   :  { %3565 = vmatpush1.bf16.msra.mxu0 %v3564_v44  ;;  %v601_v44 = vld [vmem:[%s9867_s1 + $0x1240] sm:$0xff] }
  0x83   :  { %3949 = vmatpush1.bf16.msra.mxu1 %v3948_v45  ;;  %3567 = vmatprep.subr.bf16.mxu0 %v3566_v47  ;;  %v595_v45 = vld [vmem:[%s9867_s1 + $0x1210] sm:$0xff]  ;;  %v3966_v47 = vpack.c.bf16 %v604_v38, %v596_v36  ;;  %v3584_v53 = vpack.c.bf16 %v601_v44, %v593_v42  ;;  %v3598_v36 = vpack.c.bf16 %v666_v31, %v658_v30  ;;  %v657_v38 = vld [vmem:[%s9867_s1 + $0x1400] sm:$0xff]  ;;  %v674_v44 = vld [vmem:[%s9867_s1 + $0x1488] sm:$0xff] }
  0x84   :  { %3951 = vmatprep.subr.bf16.mxu1 %v3950_v51  ;;  %v612_v51 = vld [vmem:[%s9867_s1 + $0x1298] sm:$0xff]  ;;  %v3968_v54 = vpack.c.bf16 %v603_v48, %v595_v45  ;;  %v667_v42 = vld [vmem:[%s9867_s1 + $0x1450] sm:$0xff]  ;;  %v682_v45 = vld [vmem:[%s9867_s1 + $0x14c8] sm:$0xff] }
  0x85   :  { %1793 = vmatmul.mubr.f32.vlgmr.msra.gmra.mrb[0].mxu0 %v5912_v56  ;;  %v684_v48 = vld [vmem:[%s9867_s1 + $0x14d8] sm:$0xff] }
  0x86   :  { %3569 = vmatpush1.bf16.msra.mxu0 %v3568_v60  ;;  %2219 = vmatmul.mubr.f32.vlgmr.msra.gmra.mrb[0].mxu1 %v5912_v56  ;;  %v617_v60 = vld [vmem:[%s9867_s1 + $0x12c0] sm:$0xff] }
  0x87   :  { %3953 = vmatpush1.bf16.msra.mxu1 %v3952_v61  ;;  %3571 = vmatprep.subr.bf16.mxu0 %v3570_v62  ;;  %v611_v61 = vld [vmem:[%s9867_s1 + $0x1290] sm:$0xff]  ;;  %v3970_v62 = vpack.c.bf16 %v620_v52, %v612_v51  ;;  %v3588_v4 = vpack.c.bf16 %v617_v60, %v609_v58  ;;  %v3602_v51 = vpack.c.bf16 %v682_v45, %v674_v44  ;;  %v673_v52 = vld [vmem:[%s9867_s1 + $0x1480] sm:$0xff]  ;;  %v690_v60 = vld [vmem:[%s9867_s1 + $0x1508] sm:$0xff] }
  0x88   :  { %3955 = vmatprep.subr.bf16.mxu1 %v3954_v2  ;;  %1863 = vmatprep.mubr.f32.mxu0 %v5941_v6  ;;  %v628_v2 = vld [vmem:[%s9867_s1 + $0x1318] sm:$0xff]  ;;  %v3972_v5 = vpack.c.bf16 %v619_v63, %v611_v61  ;;  %v683_v58 = vld [vmem:[%s9867_s1 + $0x14d0] sm:$0xff]  ;;  %v698_v61 = vld [vmem:[%s9867_s1 + $0x1548] sm:$0xff] }
  0x89   :  { %2289 = vmatprep.mubr.f32.mxu1 %v5941_v6  ;;  %v700_v63 = vld [vmem:[%s9867_s1 + $0x1558] sm:$0xff] }
  0x8a   :  { %3573 = vmatpush1.bf16.msra.mxu0 %v3572_v11  ;;  %v633_v11 = vld [vmem:[%s9867_s1 + $0x1340] sm:$0xff] }
  0x8b   :  { %3957 = vmatpush1.bf16.msra.mxu1 %v3956_v12  ;;  %3575 = vmatprep.subr.bf16.mxu0 %v3574_v13  ;;  %v627_v12 = vld [vmem:[%s9867_s1 + $0x1310] sm:$0xff]  ;;  %v3974_v13 = vpack.c.bf16 %v636_v3, %v628_v2  ;;  %v3592_v18 = vpack.c.bf16 %v633_v11, %v625_v9  ;;  %v3606_v2 = vpack.c.bf16 %v698_v61, %v690_v60  ;;  %v689_v3 = vld [vmem:[%s9867_s1 + $0x1500] sm:$0xff]  ;;  %v706_v11 = vld [vmem:[%s9867_s1 + $0x1588] sm:$0xff] }
  0x8c   :  { %3959 = vmatprep.subr.bf16.mxu1 %v3958_v16  ;;  %v644_v16 = vld [vmem:[%s9867_s1 + $0x1398] sm:$0xff]  ;;  %v3976_v20 = vpack.c.bf16 %v635_v19, %v627_v12  ;;  %v699_v9 = vld [vmem:[%s9867_s1 + $0x1550] sm:$0xff]  ;;  %v714_v12 = vld [vmem:[%s9867_s1 + $0x15c8] sm:$0xff] }
  0x8d   :  { %v716_v19 = vld [vmem:[%s9867_s1 + $0x15d8] sm:$0xff] }
  0x8e   :  { %3577 = vmatpush1.bf16.msra.mxu0 %v3576_v26  ;;  %v649_v26 = vld [vmem:[%s9867_s1 + $0x13c0] sm:$0xff] }
  0x8f   :  { %3961 = vmatpush1.bf16.msra.mxu1 %v3960_v27  ;;  %3579 = vmatprep.subr.bf16.mxu0 %v3578_v28  ;;  %v643_v27 = vld [vmem:[%s9867_s1 + $0x1390] sm:$0xff]  ;;  %v3978_v28 = vpack.c.bf16 %v652_v17, %v644_v16  ;;  %v3596_v34 = vpack.c.bf16 %v649_v26, %v641_v25  ;;  %v3610_v16 = vpack.c.bf16 %v714_v12, %v706_v11  ;;  %v705_v17 = vld [vmem:[%s9867_s1 + $0x1580] sm:$0xff]  ;;  %v722_v26 = vld [vmem:[%s9867_s1 + $0x1608] sm:$0xff] }
  0x90   :  { %3963 = vmatprep.subr.bf16.mxu1 %v3962_v32  ;;  %v660_v32 = vld [vmem:[%s9867_s1 + $0x1418] sm:$0xff]  ;;  %v3980_v35 = vpack.c.bf16 %v651_v29, %v643_v27  ;;  %v715_v25 = vld [vmem:[%s9867_s1 + $0x15d0] sm:$0xff]  ;;  %v730_v27 = vld [vmem:[%s9867_s1 + $0x1648] sm:$0xff] }
  0x91   :  { %v732_v29 = vld [vmem:[%s9867_s1 + $0x1658] sm:$0xff] }
  0x92   :  { %3581 = vmatpush1.bf16.msra.mxu0 %v3580_v39  ;;  %v665_v39 = vld [vmem:[%s9867_s1 + $0x1440] sm:$0xff] }
  0x93   :  { %3965 = vmatpush1.bf16.msra.mxu1 %v3964_v40  ;;  %3583 = vmatprep.subr.bf16.mxu0 %v3582_v41  ;;  %v659_v40 = vld [vmem:[%s9867_s1 + $0x1410] sm:$0xff]  ;;  %v3982_v41 = vpack.c.bf16 %v668_v33, %v660_v32  ;;  %v3600_v49 = vpack.c.bf16 %v665_v39, %v657_v38  ;;  %v3614_v32 = vpack.c.bf16 %v730_v27, %v722_v26  ;;  %v721_v33 = vld [vmem:[%s9867_s1 + $0x1600] sm:$0xff]  ;;  %v738_v39 = vld [vmem:[%s9867_s1 + $0x1688] sm:$0xff]  ;;  %v1574_v26 = vsub.s32 4, %v5326_v59 }
  0x94   :  { %3967 = vmatprep.subr.bf16.mxu1 %v3966_v47  ;;  %v676_v47 = vld [vmem:[%s9867_s1 + $0x1498] sm:$0xff]  ;;  %v3984_v50 = vpack.c.bf16 %v667_v42, %v659_v40  ;;  %v731_v38 = vld [vmem:[%s9867_s1 + $0x1650] sm:$0xff]  ;;  %v746_v40 = vld [vmem:[%s9867_s1 + $0x16c8] sm:$0xff] }
  0x95   :  { %v748_v42 = vld [vmem:[%s9867_s1 + $0x16d8] sm:$0xff] }
  0x96   :  { %3585 = vmatpush1.bf16.msra.mxu0 %v3584_v53  ;;  %v681_v53 = vld [vmem:[%s9867_s1 + $0x14c0] sm:$0xff] }
  0x97   :  { %3969 = vmatpush1.bf16.msra.mxu1 %v3968_v54  ;;  %3587 = vmatprep.subr.bf16.mxu0 %v3586_v57  ;;  %v675_v54 = vld [vmem:[%s9867_s1 + $0x1490] sm:$0xff]  ;;  %v3986_v57 = vpack.c.bf16 %v684_v48, %v676_v47  ;;  %v3604_v0 = vpack.c.bf16 %v681_v53, %v673_v52  ;;  %v3618_v47 = vpack.c.bf16 %v746_v40, %v738_v39  ;;  %v737_v48 = vld [vmem:[%s9867_s1 + $0x1680] sm:$0xff]  ;;  %v754_v53 = vld [vmem:[%s9867_s1 + $0x1708] sm:$0xff] }
  0x98   :  { %3971 = vmatprep.subr.bf16.mxu1 %v3970_v62  ;;  %v692_v62 = vld [vmem:[%s9867_s1 + $0x1518] sm:$0xff]  ;;  %v3988_v1 = vpack.c.bf16 %v683_v58, %v675_v54  ;;  %v747_v52 = vld [vmem:[%s9867_s1 + $0x16d0] sm:$0xff]  ;;  %v762_v54 = vld [vmem:[%s9867_s1 + $0x1748] sm:$0xff] }
  0x99   :  { %v764_v58 = vld [vmem:[%s9867_s1 + $0x1758] sm:$0xff]  ;;  %v6312_v39 = vld [vmem:[%s9866_s0] sm:$0xff] }
  0x9a   :  { %3589 = vmatpush1.bf16.msra.mxu0 %v3588_v4  ;;  %v697_v4 = vld [vmem:[%s9867_s1 + $0x1540] sm:$0xff]  ;;  %v6317_v40 = vrot.slane %v6312_v39, %v1574_v26 }
  0x9b   :  { %3973 = vmatpush1.bf16.msra.mxu1 %v3972_v5  ;;  %3591 = vmatprep.subr.bf16.mxu0 %v3590_v7  ;;  %v691_v5 = vld [vmem:[%s9867_s1 + $0x1510] sm:$0xff]  ;;  %v3990_v7 = vpack.c.bf16 %v700_v63, %v692_v62  ;;  %v3608_v14 = vpack.c.bf16 %v697_v4, %v689_v3  ;;  %v3622_v62 = vpack.c.bf16 %v762_v54, %v754_v53  ;;  %v753_v63 = vld [vmem:[%s9867_s1 + $0x1700] sm:$0xff]  ;;  %v770_v4 = vld [vmem:[%s9867_s1 + $0x1788] sm:$0xff] }
  0x9c   :  { %3975 = vmatprep.subr.bf16.mxu1 %v3974_v13  ;;  %v708_v13 = vld [vmem:[%s9867_s1 + $0x1598] sm:$0xff]  ;;  %v3992_v15 = vpack.c.bf16 %v699_v9, %v691_v5  ;;  %v763_v3 = vld [vmem:[%s9867_s1 + $0x1750] sm:$0xff]  ;;  %v778_v5 = vld [vmem:[%s9867_s1 + $0x17c8] sm:$0xff] }
  0x9d   :  { %v780_v9 = vld [vmem:[%s9867_s1 + $0x17d8] sm:$0xff]  ;;  %v818_v53 = vld [vmem:[%s9867_s1 + $0x1908] sm:$0xff] }
  0x9e   :  { %3593 = vmatpush1.bf16.msra.mxu0 %v3592_v18  ;;  %v713_v18 = vld [vmem:[%s9867_s1 + $0x15c0] sm:$0xff]  ;;  %v826_v54 = vld [vmem:[%s9867_s1 + $0x1948] sm:$0xff] }
  0x9f   :  { %3977 = vmatpush1.bf16.msra.mxu1 %v3976_v20  ;;  %3595 = vmatprep.subr.bf16.mxu0 %v3594_v21  ;;  %v707_v20 = vld [vmem:[%s9867_s1 + $0x1590] sm:$0xff]  ;;  %v3994_v21 = vpack.c.bf16 %v716_v19, %v708_v13  ;;  %v3612_v30 = vpack.c.bf16 %v713_v18, %v705_v17  ;;  %v3626_v13 = vpack.c.bf16 %v778_v5, %v770_v4  ;;  %v769_v19 = vld [vmem:[%s9867_s1 + $0x1780] sm:$0xff]  ;;  %v786_v18 = vld [vmem:[%s9867_s1 + $0x1808] sm:$0xff] }
  0xa0   :  { %3979 = vmatprep.subr.bf16.mxu1 %v3978_v28  ;;  %v724_v28 = vld [vmem:[%s9867_s1 + $0x1618] sm:$0xff]  ;;  %v3996_v31 = vpack.c.bf16 %v715_v25, %v707_v20  ;;  %v779_v17 = vld [vmem:[%s9867_s1 + $0x17d0] sm:$0xff]  ;;  %v794_v20 = vld [vmem:[%s9867_s1 + $0x1848] sm:$0xff] }
  0xa1   :  { %v796_v25 = vld [vmem:[%s9867_s1 + $0x1858] sm:$0xff]  ;;  %v827_v4 = vld [vmem:[%s9867_s1 + $0x1950] sm:$0xff]  ;;  %v834_v5 = vld [vmem:[%s9867_s1 + $0x1988] sm:$0xff] }
  0xa2   :  { %3597 = vmatpush1.bf16.msra.mxu0 %v3596_v34  ;;  %v729_v34 = vld [vmem:[%s9867_s1 + $0x1640] sm:$0xff] }
  0xa3   :  { %3981 = vmatpush1.bf16.msra.mxu1 %v3980_v35  ;;  %3599 = vmatprep.subr.bf16.mxu0 %v3598_v36  ;;  %v723_v35 = vld [vmem:[%s9867_s1 + $0x1610] sm:$0xff]  ;;  %v3998_v36 = vpack.c.bf16 %v732_v29, %v724_v28  ;;  %v3616_v44 = vpack.c.bf16 %v729_v34, %v721_v33  ;;  %v3630_v29 = vpack.c.bf16 %v794_v20, %v786_v18  ;;  %v850_v20 = vld [vmem:[%s9867_s1 + $0x1a08] sm:$0xff] }
  0xa4   :  { %3983 = vmatprep.subr.bf16.mxu1 %v3982_v41  ;;  %v740_v41 = vld [vmem:[%s9867_s1 + $0x1698] sm:$0xff]  ;;  %v4000_v45 = vpack.c.bf16 %v731_v38, %v723_v35  ;;  %v795_v34 = vld [vmem:[%s9867_s1 + $0x1850] sm:$0xff]  ;;  %v802_v35 = vld [vmem:[%s9867_s1 + $0x1888] sm:$0xff]  ;;  %v1586_v38 = vsub.s32 7, %v5326_v59 }
  0xa5   :  { %v843_v18 = vld [vmem:[%s9867_s1 + $0x19d0] sm:$0xff] }
  0xa6   :  { %3601 = vmatpush1.bf16.msra.mxu0 %v3600_v49  ;;  %v745_v49 = vld [vmem:[%s9867_s1 + $0x16c0] sm:$0xff] }
  0xa7   :  { %3985 = vmatpush1.bf16.msra.mxu1 %v3984_v50  ;;  %3603 = vmatprep.subr.bf16.mxu0 %v3602_v51  ;;  %v739_v50 = vld [vmem:[%s9867_s1 + $0x1690] sm:$0xff]  ;;  %v4002_v51 = vpack.c.bf16 %v748_v42, %v740_v41  ;;  %v3620_v60 = vpack.c.bf16 %v745_v49, %v737_v48  ;;  %v804_v41 = vld [vmem:[%s9867_s1 + $0x1898] sm:$0xff]  ;;  %v801_v48 = vld [vmem:[%s9867_s1 + $0x1880] sm:$0xff] }
  0xa8   :  { %3987 = vmatprep.subr.bf16.mxu1 %v3986_v57  ;;  %v756_v57 = vld [vmem:[%s9867_s1 + $0x1718] sm:$0xff]  ;;  %v4004_v61 = vpack.c.bf16 %v747_v52, %v739_v50  ;;  %v809_v49 = vld [vmem:[%s9867_s1 + $0x18c0] sm:$0xff]  ;;  %v803_v50 = vld [vmem:[%s9867_s1 + $0x1890] sm:$0xff] }
  0xa9   :  { %v812_v42 = vld [vmem:[%s9867_s1 + $0x18d8] sm:$0xff]  ;;  %v811_v52 = vld [vmem:[%s9867_s1 + $0x18d0] sm:$0xff] }
  0xaa   :  { %3605 = vmatpush1.bf16.msra.mxu0 %v3604_v0  ;;  %v761_v0 = vld [vmem:[%s9867_s1 + $0x1740] sm:$0xff] }
  0xab   :  { %3989 = vmatpush1.bf16.msra.mxu1 %v3988_v1  ;;  %3607 = vmatprep.subr.bf16.mxu0 %v3606_v2  ;;  %v755_v1 = vld [vmem:[%s9867_s1 + $0x1710] sm:$0xff]  ;;  %v4006_v2 = vpack.c.bf16 %v764_v58, %v756_v57  ;;  %v3624_v11 = vpack.c.bf16 %v761_v0, %v753_v63  ;;  %v6346_v57 = vrot.slane %v6312_v39, %v1586_v38  ;;  %v820_v58 = vld [vmem:[%s9867_s1 + $0x1918] sm:$0xff]  ;;  %v817_v0 = vld [vmem:[%s9867_s1 + $0x1900] sm:$0xff] }
  0xac   :  { %3991 = vmatprep.subr.bf16.mxu1 %v3990_v7  ;;  %v772_v7 = vld [vmem:[%s9867_s1 + $0x1798] sm:$0xff]  ;;  %v4008_v12 = vpack.c.bf16 %v763_v3, %v755_v1  ;;  %v3638_v63 = vpack.c.bf16 %v826_v54, %v818_v53  ;;  %v825_v1 = vld [vmem:[%s9867_s1 + $0x1940] sm:$0xff]  ;;  %v875_v53 = vld [vmem:[%s9867_s1 + $0x1ad0] sm:$0xff] }
  0xad   :  { %v882_v54 = vld [vmem:[%s9867_s1 + $0x1b08] sm:$0xff] }
  0xae   :  { %3609 = vmatpush1.bf16.msra.mxu0 %v3608_v14  ;;  %v777_v14 = vld [vmem:[%s9867_s1 + $0x17c0] sm:$0xff] }
  0xaf   :  { %3993 = vmatpush1.bf16.msra.mxu1 %v3992_v15  ;;  %3611 = vmatprep.subr.bf16.mxu0 %v3610_v16  ;;  %v771_v15 = vld [vmem:[%s9867_s1 + $0x1790] sm:$0xff]  ;;  %v4010_v16 = vpack.c.bf16 %v780_v9, %v772_v7  ;;  %v3628_v27 = vpack.c.bf16 %v777_v14, %v769_v19  ;;  %v842_v7 = vld [vmem:[%s9867_s1 + $0x19c8] sm:$0xff]  ;;  %v836_v9 = vld [vmem:[%s9867_s1 + $0x1998] sm:$0xff] }
  0xb0   :  { %3995 = vmatprep.subr.bf16.mxu1 %v3994_v21  ;;  %v788_v21 = vld [vmem:[%s9867_s1 + $0x1818] sm:$0xff]  ;;  %v4012_v28 = vpack.c.bf16 %v779_v17, %v771_v15  ;;  %v3642_v19 = vpack.c.bf16 %v842_v7, %v834_v5  ;;  %v833_v14 = vld [vmem:[%s9867_s1 + $0x1980] sm:$0xff]  ;;  %v891_v5 = vld [vmem:[%s9867_s1 + $0x1b50] sm:$0xff] }
  0xb1   :  { %v4014_v33 = vpack.c.bf16 %v796_v25, %v788_v21  ;;  %v841_v15 = vld [vmem:[%s9867_s1 + $0x19c0] sm:$0xff]  ;;  %v858_v21 = vld [vmem:[%s9867_s1 + $0x1a48] sm:$0xff]  ;;  %v852_v25 = vld [vmem:[%s9867_s1 + $0x1a18] sm:$0xff] }
  0xb2   :  { %3613 = vmatpush1.bf16.msra.mxu0 %v3612_v30  ;;  %v785_v30 = vld [vmem:[%s9867_s1 + $0x1800] sm:$0xff]  ;;  %v898_v7 = vld [vmem:[%s9867_s1 + $0x1b88] sm:$0xff] }
  0xb3   :  { %3997 = vmatpush1.bf16.msra.mxu1 %v3996_v31  ;;  %3615 = vmatprep.subr.bf16.mxu0 %v3614_v32  ;;  %v793_v31 = vld [vmem:[%s9867_s1 + $0x1840] sm:$0xff]  ;;  %v787_v32 = vld [vmem:[%s9867_s1 + $0x1810] sm:$0xff] }
  0xb4   :  { %3999 = vmatprep.subr.bf16.mxu1 %v3998_v36  ;;  %v810_v36 = vld [vmem:[%s9867_s1 + $0x18c8] sm:$0xff] }
  0xb6   :  { %3617 = vmatpush1.bf16.msra.mxu0 %v3616_v44  ;;  %v3632_v44 = vpack.c.bf16 %v793_v31, %v785_v30  ;;  %v3646_v30 = vpack.c.bf16 %v858_v21, %v850_v20  ;;  %v849_v31 = vld [vmem:[%s9867_s1 + $0x1a00] sm:$0xff]  ;;  %v907_v20 = vld [vmem:[%s9867_s1 + $0x1bd0] sm:$0xff]  ;;  %v914_v21 = vld [vmem:[%s9867_s1 + $0x1c08] sm:$0xff] }
  0xb7   :  { %4001 = vmatpush1.bf16.msra.mxu1 %v4000_v45  ;;  %3619 = vmatprep.subr.bf16.mxu0 %v3618_v47  ;;  %v4016_v45 = vpack.c.bf16 %v795_v34, %v787_v32  ;;  %v3634_v47 = vpack.c.bf16 %v810_v36, %v802_v35  ;;  %v857_v32 = vld [vmem:[%s9867_s1 + $0x1a40] sm:$0xff]  ;;  %v859_v35 = vld [vmem:[%s9867_s1 + $0x1a50] sm:$0xff]  ;;  %v866_v36 = vld [vmem:[%s9867_s1 + $0x1a88] sm:$0xff] }
  0xb8   :  { %4003 = vmatprep.subr.bf16.mxu1 %v4002_v51  ;;  %v4018_v51 = vpack.c.bf16 %v812_v42, %v804_v41  ;;  %v874_v41 = vld [vmem:[%s9867_s1 + $0x1ac8] sm:$0xff]  ;;  %v868_v42 = vld [vmem:[%s9867_s1 + $0x1a98] sm:$0xff] }
  0xba   :  { %3621 = vmatpush1.bf16.msra.mxu0 %v3620_v60  ;;  %v828_v60 = vld [vmem:[%s9867_s1 + $0x1958] sm:$0xff] }
  0xbb   :  { %4005 = vmatpush1.bf16.msra.mxu1 %v4004_v61  ;;  %3623 = vmatprep.subr.bf16.mxu0 %v3622_v62  ;;  %v3636_v61 = vpack.c.bf16 %v809_v49, %v801_v48  ;;  %v4020_v62 = vpack.c.bf16 %v811_v52, %v803_v50  ;;  %v4022_v3 = vpack.c.bf16 %v828_v60, %v820_v58  ;;  %v865_v49 = vld [vmem:[%s9867_s1 + $0x1a80] sm:$0xff]  ;;  %v890_v58 = vld [vmem:[%s9867_s1 + $0x1b48] sm:$0xff]  ;;  %v884_v60 = vld [vmem:[%s9867_s1 + $0x1b18] sm:$0xff] }
  0xbc   :  { %4007 = vmatprep.subr.bf16.mxu1 %v4006_v2  ;;  %v819_v2 = vld [vmem:[%s9867_s1 + $0x1910] sm:$0xff]  ;;  %v3650_v48 = vpack.c.bf16 %v874_v41, %v866_v36  ;;  %v873_v50 = vld [vmem:[%s9867_s1 + $0x1ac0] sm:$0xff]  ;;  %v930_v41 = vld [vmem:[%s9867_s1 + $0x1c88] sm:$0xff] }
  0xbd   :  { %v923_v36 = vld [vmem:[%s9867_s1 + $0x1c50] sm:$0xff] }
  0xbe   :  { %3625 = vmatpush1.bf16.msra.mxu0 %v3624_v11  ;;  %v844_v11 = vld [vmem:[%s9867_s1 + $0x19d8] sm:$0xff] }
  0xbf   :  { %4009 = vmatpush1.bf16.msra.mxu1 %v4008_v12  ;;  %3627 = vmatprep.subr.bf16.mxu0 %v3626_v13  ;;  %v3640_v12 = vpack.c.bf16 %v825_v1, %v817_v0  ;;  %v4024_v13 = vpack.c.bf16 %v827_v4, %v819_v2  ;;  %v4026_v17 = vpack.c.bf16 %v844_v11, %v836_v9  ;;  %v881_v1 = vld [vmem:[%s9867_s1 + $0x1b00] sm:$0xff]  ;;  %v906_v9 = vld [vmem:[%s9867_s1 + $0x1bc8] sm:$0xff]  ;;  %v900_v11 = vld [vmem:[%s9867_s1 + $0x1b98] sm:$0xff] }
  0xc0   :  { %4011 = vmatprep.subr.bf16.mxu1 %v4010_v16  ;;  %v835_v16 = vld [vmem:[%s9867_s1 + $0x1990] sm:$0xff]  ;;  %v3654_v0 = vpack.c.bf16 %v890_v58, %v882_v54  ;;  %v889_v2 = vld [vmem:[%s9867_s1 + $0x1b40] sm:$0xff]  ;;  %v946_v58 = vld [vmem:[%s9867_s1 + $0x1d08] sm:$0xff] }
  0xc1   :  { %v939_v54 = vld [vmem:[%s9867_s1 + $0x1cd0] sm:$0xff] }
  0xc2   :  { %3629 = vmatpush1.bf16.msra.mxu0 %v3628_v27  ;;  %v860_v27 = vld [vmem:[%s9867_s1 + $0x1a58] sm:$0xff] }
  0xc3   :  { %4013 = vmatpush1.bf16.msra.mxu1 %v4012_v28  ;;  %3631 = vmatprep.subr.bf16.mxu0 %v3630_v29  ;;  %v3644_v28 = vpack.c.bf16 %v841_v15, %v833_v14  ;;  %v4028_v29 = vpack.c.bf16 %v843_v18, %v835_v16  ;;  %v4030_v34 = vpack.c.bf16 %v860_v27, %v852_v25  ;;  %v897_v15 = vld [vmem:[%s9867_s1 + $0x1b80] sm:$0xff]  ;;  %v922_v25 = vld [vmem:[%s9867_s1 + $0x1c48] sm:$0xff]  ;;  %v916_v27 = vld [vmem:[%s9867_s1 + $0x1c18] sm:$0xff] }
  0xc4   :  { %4015 = vmatprep.subr.bf16.mxu1 %v4014_v33  ;;  %v851_v33 = vld [vmem:[%s9867_s1 + $0x1a10] sm:$0xff]  ;;  %v3658_v14 = vpack.c.bf16 %v906_v9, %v898_v7  ;;  %v905_v16 = vld [vmem:[%s9867_s1 + $0x1bc0] sm:$0xff]  ;;  %v962_v9 = vld [vmem:[%s9867_s1 + $0x1d88] sm:$0xff] }
  0xc5   :  { %1864 = vmatmul.mubr.f32.vlgmr.msra.gmra.mrb[0].mxu0 %v6317_v40  ;;  %v955_v7 = vld [vmem:[%s9867_s1 + $0x1d50] sm:$0xff] }
  0xc6   :  { %3633 = vmatpush1.bf16.msra.mxu0 %v3632_v44  ;;  %2290 = vmatmul.mubr.f32.vlgmr.msra.gmra.mrb[0].mxu1 %v6317_v40  ;;  %v876_v44 = vld [vmem:[%s9867_s1 + $0x1ad8] sm:$0xff] }
  0xc7   :  { %4017 = vmatpush1.bf16.msra.mxu1 %v4016_v45  ;;  %3635 = vmatprep.subr.bf16.mxu0 %v3634_v47  ;;  %v3648_v45 = vpack.c.bf16 %v857_v32, %v849_v31  ;;  %v4032_v47 = vpack.c.bf16 %v859_v35, %v851_v33  ;;  %v4034_v52 = vpack.c.bf16 %v876_v44, %v868_v42  ;;  %v913_v32 = vld [vmem:[%s9867_s1 + $0x1c00] sm:$0xff]  ;;  %v938_v42 = vld [vmem:[%s9867_s1 + $0x1cc8] sm:$0xff]  ;;  %v932_v44 = vld [vmem:[%s9867_s1 + $0x1c98] sm:$0xff] }
  0xc8   :  { %4019 = vmatprep.subr.bf16.mxu1 %v4018_v51  ;;  %1934 = vmatprep.mubr.f32.mxu0 %v6346_v57  ;;  %v867_v51 = vld [vmem:[%s9867_s1 + $0x1a90] sm:$0xff]  ;;  %v3662_v31 = vpack.c.bf16 %v922_v25, %v914_v21  ;;  %v921_v33 = vld [vmem:[%s9867_s1 + $0x1c40] sm:$0xff]  ;;  %v978_v25 = vld [vmem:[%s9867_s1 + $0x1e08] sm:$0xff] }
  0xc9   :  { %2360 = vmatprep.mubr.f32.mxu1 %v6346_v57  ;;  %v971_v21 = vld [vmem:[%s9867_s1 + $0x1dd0] sm:$0xff] }
  0xca   :  { %3637 = vmatpush1.bf16.msra.mxu0 %v3636_v61  ;;  %v892_v61 = vld [vmem:[%s9867_s1 + $0x1b58] sm:$0xff] }
  0xcb   :  { %4021 = vmatpush1.bf16.msra.mxu1 %v4020_v62  ;;  %3639 = vmatprep.subr.bf16.mxu0 %v3638_v63  ;;  %v3652_v62 = vpack.c.bf16 %v873_v50, %v865_v49  ;;  %v4036_v63 = vpack.c.bf16 %v875_v53, %v867_v51  ;;  %v4038_v4 = vpack.c.bf16 %v892_v61, %v884_v60  ;;  %v929_v50 = vld [vmem:[%s9867_s1 + $0x1c80] sm:$0xff]  ;;  %v954_v60 = vld [vmem:[%s9867_s1 + $0x1d48] sm:$0xff]  ;;  %v948_v61 = vld [vmem:[%s9867_s1 + $0x1d18] sm:$0xff] }
  0xcc   :  { %4023 = vmatprep.subr.bf16.mxu1 %v4022_v3  ;;  %v883_v3 = vld [vmem:[%s9867_s1 + $0x1b10] sm:$0xff]  ;;  %v3666_v49 = vpack.c.bf16 %v938_v42, %v930_v41  ;;  %v937_v51 = vld [vmem:[%s9867_s1 + $0x1cc0] sm:$0xff]  ;;  %v994_v42 = vld [vmem:[%s9867_s1 + $0x1e88] sm:$0xff] }
  0xcd   :  { %v987_v41 = vld [vmem:[%s9867_s1 + $0x1e50] sm:$0xff] }
  0xce   :  { %3641 = vmatpush1.bf16.msra.mxu0 %v3640_v12  ;;  %v908_v12 = vld [vmem:[%s9867_s1 + $0x1bd8] sm:$0xff] }
  0xcf   :  { %4025 = vmatpush1.bf16.msra.mxu1 %v4024_v13  ;;  %3643 = vmatprep.subr.bf16.mxu0 %v3642_v19  ;;  %v3656_v13 = vpack.c.bf16 %v889_v2, %v881_v1  ;;  %v4040_v19 = vpack.c.bf16 %v891_v5, %v883_v3  ;;  %v4042_v18 = vpack.c.bf16 %v908_v12, %v900_v11  ;;  %v945_v2 = vld [vmem:[%s9867_s1 + $0x1d00] sm:$0xff]  ;;  %v970_v11 = vld [vmem:[%s9867_s1 + $0x1dc8] sm:$0xff]  ;;  %v964_v12 = vld [vmem:[%s9867_s1 + $0x1d98] sm:$0xff] }
  0xd0   :  { %4027 = vmatprep.subr.bf16.mxu1 %v4026_v17  ;;  %v899_v17 = vld [vmem:[%s9867_s1 + $0x1b90] sm:$0xff]  ;;  %v3670_v1 = vpack.c.bf16 %v954_v60, %v946_v58  ;;  %v953_v3 = vld [vmem:[%s9867_s1 + $0x1d40] sm:$0xff]  ;;  %v1010_v60 = vld [vmem:[%s9867_s1 + $0x1f08] sm:$0xff] }
  0xd1   :  { %v1003_v58 = vld [vmem:[%s9867_s1 + $0x1ed0] sm:$0xff] }
  0xd2   :  { %3645 = vmatpush1.bf16.msra.mxu0 %v3644_v28  ;;  %v924_v28 = vld [vmem:[%s9867_s1 + $0x1c58] sm:$0xff] }
  0xd3   :  { %4029 = vmatpush1.bf16.msra.mxu1 %v4028_v29  ;;  %3647 = vmatprep.subr.bf16.mxu0 %v3646_v30  ;;  %v3660_v29 = vpack.c.bf16 %v905_v16, %v897_v15  ;;  %v4044_v30 = vpack.c.bf16 %v907_v20, %v899_v17  ;;  %v4046_v35 = vpack.c.bf16 %v924_v28, %v916_v27  ;;  %v961_v16 = vld [vmem:[%s9867_s1 + $0x1d80] sm:$0xff]  ;;  %v986_v27 = vld [vmem:[%s9867_s1 + $0x1e48] sm:$0xff]  ;;  %v980_v28 = vld [vmem:[%s9867_s1 + $0x1e18] sm:$0xff] }
  0xd4   :  { %4031 = vmatprep.subr.bf16.mxu1 %v4030_v34  ;;  %v915_v34 = vld [vmem:[%s9867_s1 + $0x1c10] sm:$0xff]  ;;  %v3674_v15 = vpack.c.bf16 %v970_v11, %v962_v9  ;;  %v969_v17 = vld [vmem:[%s9867_s1 + $0x1dc0] sm:$0xff]  ;;  %v1026_v11 = vld [vmem:[%s9867_s1 + $0x1f88] sm:$0xff] }
  0xd5   :  { %v1019_v9 = vld [vmem:[%s9867_s1 + $0x1f50] sm:$0xff] }
  0xd6   :  { %3649 = vmatpush1.bf16.msra.mxu0 %v3648_v45  ;;  %v940_v45 = vld [vmem:[%s9867_s1 + $0x1cd8] sm:$0xff] }
  0xd7   :  { %4033 = vmatpush1.bf16.msra.mxu1 %v4032_v47  ;;  %3651 = vmatprep.subr.bf16.mxu0 %v3650_v48  ;;  %v3664_v47 = vpack.c.bf16 %v921_v33, %v913_v32  ;;  %v4048_v48 = vpack.c.bf16 %v923_v36, %v915_v34  ;;  %v4050_v53 = vpack.c.bf16 %v940_v45, %v932_v44  ;;  %v977_v33 = vld [vmem:[%s9867_s1 + $0x1e00] sm:$0xff]  ;;  %v1002_v44 = vld [vmem:[%s9867_s1 + $0x1ec8] sm:$0xff]  ;;  %v996_v45 = vld [vmem:[%s9867_s1 + $0x1e98] sm:$0xff] }
  0xd8   :  { %4035 = vmatprep.subr.bf16.mxu1 %v4034_v52  ;;  %v931_v52 = vld [vmem:[%s9867_s1 + $0x1c90] sm:$0xff]  ;;  %v3678_v32 = vpack.c.bf16 %v986_v27, %v978_v25  ;;  %v985_v34 = vld [vmem:[%s9867_s1 + $0x1e40] sm:$0xff]  ;;  %v1042_v27 = vld [vmem:[%s9867_s1 + $0x2008] sm:$0xff] }
  0xd9   :  { %v1035_v25 = vld [vmem:[%s9867_s1 + $0x1fd0] sm:$0xff] }
  0xda   :  { %3653 = vmatpush1.bf16.msra.mxu0 %v3652_v62  ;;  %v956_v62 = vld [vmem:[%s9867_s1 + $0x1d58] sm:$0xff] }
  0xdb   :  { %4037 = vmatpush1.bf16.msra.mxu1 %v4036_v63  ;;  %3655 = vmatprep.subr.bf16.mxu0 %v3654_v0  ;;  %v3668_v63 = vpack.c.bf16 %v937_v51, %v929_v50  ;;  %v4052_v0 = vpack.c.bf16 %v939_v54, %v931_v52  ;;  %v4054_v5 = vpack.c.bf16 %v956_v62, %v948_v61  ;;  %v993_v51 = vld [vmem:[%s9867_s1 + $0x1e80] sm:$0xff]  ;;  %v1018_v61 = vld [vmem:[%s9867_s1 + $0x1f48] sm:$0xff]  ;;  %v1012_v62 = vld [vmem:[%s9867_s1 + $0x1f18] sm:$0xff] }
  0xdc   :  { %4039 = vmatprep.subr.bf16.mxu1 %v4038_v4  ;;  %v947_v4 = vld [vmem:[%s9867_s1 + $0x1d10] sm:$0xff]  ;;  %v3682_v50 = vpack.c.bf16 %v1002_v44, %v994_v42  ;;  %v1001_v52 = vld [vmem:[%s9867_s1 + $0x1ec0] sm:$0xff] }
  0xdd   :  { %v1051_v44 = vld [vmem:[%s9867_s1 + $0x2050] sm:$0xff] }
  0xde   :  { %3657 = vmatpush1.bf16.msra.mxu0 %v3656_v13  ;;  %v972_v13 = vld [vmem:[%s9867_s1 + $0x1dd8] sm:$0xff] }
  0xdf   :  { %4041 = vmatpush1.bf16.msra.mxu1 %v4040_v19  ;;  %3659 = vmatprep.subr.bf16.mxu0 %v3658_v14  ;;  %v3672_v19 = vpack.c.bf16 %v953_v3, %v945_v2  ;;  %v4056_v14 = vpack.c.bf16 %v955_v7, %v947_v4  ;;  %v4058_v20 = vpack.c.bf16 %v972_v13, %v964_v12  ;;  %v1009_v3 = vld [vmem:[%s9867_s1 + $0x1f00] sm:$0xff]  ;;  %v1034_v12 = vld [vmem:[%s9867_s1 + $0x1fc8] sm:$0xff]  ;;  %v1028_v13 = vld [vmem:[%s9867_s1 + $0x1f98] sm:$0xff] }
  0xe0   :  { %4043 = vmatprep.subr.bf16.mxu1 %v4042_v18  ;;  %v963_v18 = vld [vmem:[%s9867_s1 + $0x1d90] sm:$0xff]  ;;  %v3686_v2 = vpack.c.bf16 %v1018_v61, %v1010_v60  ;;  %v1017_v4 = vld [vmem:[%s9867_s1 + $0x1f40] sm:$0xff] }
  0xe2   :  { %3661 = vmatpush1.bf16.msra.mxu0 %v3660_v29  ;;  %v988_v29 = vld [vmem:[%s9867_s1 + $0x1e58] sm:$0xff] }
  0xe3   :  { %4045 = vmatpush1.bf16.msra.mxu1 %v4044_v30  ;;  %3663 = vmatprep.subr.bf16.mxu0 %v3662_v31  ;;  %v3676_v30 = vpack.c.bf16 %v969_v17, %v961_v16  ;;  %v4060_v31 = vpack.c.bf16 %v971_v21, %v963_v18  ;;  %v4062_v36 = vpack.c.bf16 %v988_v29, %v980_v28  ;;  %v1025_v17 = vld [vmem:[%s9867_s1 + $0x1f80] sm:$0xff]  ;;  %v1050_v28 = vld [vmem:[%s9867_s1 + $0x2048] sm:$0xff]  ;;  %v1044_v29 = vld [vmem:[%s9867_s1 + $0x2018] sm:$0xff] }
  0xe4   :  { %4047 = vmatprep.subr.bf16.mxu1 %v4046_v35  ;;  %v979_v35 = vld [vmem:[%s9867_s1 + $0x1e10] sm:$0xff]  ;;  %v3690_v16 = vpack.c.bf16 %v1034_v12, %v1026_v11  ;;  %v1033_v18 = vld [vmem:[%s9867_s1 + $0x1fc0] sm:$0xff] }
  0xe6   :  { %3665 = vmatpush1.bf16.msra.mxu0 %v3664_v47  ;;  %v1004_v47 = vld [vmem:[%s9867_s1 + $0x1ed8] sm:$0xff] }
  0xe7   :  { %4049 = vmatpush1.bf16.msra.mxu1 %v4048_v48  ;;  %3667 = vmatprep.subr.bf16.mxu0 %v3666_v49  ;;  %v3680_v48 = vpack.c.bf16 %v985_v34, %v977_v33  ;;  %v4064_v49 = vpack.c.bf16 %v987_v41, %v979_v35  ;;  %v4066_v54 = vpack.c.bf16 %v1004_v47, %v996_v45  ;;  %v1041_v35 = vld [vmem:[%s9867_s1 + $0x2000] sm:$0xff]  ;;  %v1043_v41 = vld [vmem:[%s9867_s1 + $0x2010] sm:$0xff]  ;;  %v1058_v45 = vld [vmem:[%s9867_s1 + $0x2088] sm:$0xff] }
  0xe8   :  { %4051 = vmatprep.subr.bf16.mxu1 %v4050_v53  ;;  %v995_v53 = vld [vmem:[%s9867_s1 + $0x1e90] sm:$0xff]  ;;  %v3694_v34 = vpack.c.bf16 %v1050_v28, %v1042_v27  ;;  %v1066_v47 = vld [vmem:[%s9867_s1 + $0x20c8] sm:$0xff] }
  0xea   :  { %3669 = vmatpush1.bf16.msra.mxu0 %v3668_v63  ;;  %v1020_v63 = vld [vmem:[%s9867_s1 + $0x1f58] sm:$0xff] }
  0xeb   :  { %4053 = vmatpush1.bf16.msra.mxu1 %v4052_v0  ;;  %3671 = vmatprep.subr.bf16.mxu0 %v3670_v1  ;;  %v3684_v0 = vpack.c.bf16 %v1001_v52, %v993_v51  ;;  %v4068_v1 = vpack.c.bf16 %v1003_v58, %v995_v53  ;;  %v4070_v7 = vpack.c.bf16 %v1020_v63, %v1012_v62  ;;  %v6727_v51 = vld [vmem:[%s9866_s0 + $0x8] sm:$0xf] }
  0xec   :  { %4055 = vmatprep.subr.bf16.mxu1 %v4054_v5  ;;  %v1011_v5 = vld [vmem:[%s9867_s1 + $0x1f10] sm:$0xff] }
  0xee   :  { %3673 = vmatpush1.bf16.msra.mxu0 %v3672_v19  ;;  %v1036_v19 = vld [vmem:[%s9867_s1 + $0x1fd8] sm:$0xff] }
  0xef   :  { %4057 = vmatpush1.bf16.msra.mxu1 %v4056_v14  ;;  %3675 = vmatprep.subr.bf16.mxu0 %v3674_v15  ;;  %v3688_v14 = vpack.c.bf16 %v1017_v4, %v1009_v3  ;;  %v4072_v15 = vpack.c.bf16 %v1019_v9, %v1011_v5  ;;  %v4074_v21 = vpack.c.bf16 %v1036_v19, %v1028_v13 }
  0xf0   :  { %4059 = vmatprep.subr.bf16.mxu1 %v4058_v20  ;;  %v1027_v20 = vld [vmem:[%s9867_s1 + $0x1f90] sm:$0xff] }
  0xf1   :  { %v4076_v33 = vpack.c.bf16 %v1035_v25, %v1027_v20 }
  0xf2   :  { %3677 = vmatpush1.bf16.msra.mxu0 %v3676_v30  ;;  %v1052_v30 = vld [vmem:[%s9867_s1 + $0x2058] sm:$0xff] }
  0xf3   :  { %4061 = vmatpush1.bf16.msra.mxu1 %v4060_v31  ;;  %3679 = vmatprep.subr.bf16.mxu0 %v3678_v32  ;;  %v1582_v31 = vsub.s32 6, %v5326_v59  ;;  %v3692_v32 = vpack.c.bf16 %v1033_v18, %v1025_v17  ;;  %v4078_v42 = vpack.c.bf16 %v1052_v30, %v1044_v29 }
  0xf4   :  { %4063 = vmatprep.subr.bf16.mxu1 %v4062_v36  ;;  %v1049_v36 = vld [vmem:[%s9867_s1 + $0x2040] sm:$0xff] }
  0xf5   :  { %v3696_v52 = vpack.c.bf16 %v1049_v36, %v1041_v35 }
  0xf6   :  { %3681 = vmatpush1.bf16.msra.mxu0 %v3680_v48  ;;  %v6716_v48 = vrot.slane %v6312_v39, %v1582_v31 }
  0xf7   :  { %4065 = vmatpush1.bf16.msra.mxu1 %v4064_v49  ;;  %3683 = vmatprep.subr.bf16.mxu0 %v3682_v50  ;;  %v1060_v49 = vld [vmem:[%s9867_s1 + $0x2098] sm:$0xff] }
  0xf8   :  { %4067 = vmatprep.subr.bf16.mxu1 %v4066_v54  ;;  %v1068_v50 = vld [vmem:[%s9867_s1 + $0x20d8] sm:$0xff] }
  0xfa   :  { %3685 = vmatpush1.bf16.msra.mxu0 %v3684_v0 }
  0xfb   :  { %4069 = vmatpush1.bf16.msra.mxu1 %v4068_v1  ;;  %3687 = vmatprep.subr.bf16.mxu0 %v3686_v2 }
  0xfc   :  { %4071 = vmatprep.subr.bf16.mxu1 %v4070_v7 }
  0xfe   :  { %3689 = vmatpush1.bf16.msra.mxu0 %v3688_v14 }
  0xff   :  { %4073 = vmatpush1.bf16.msra.mxu1 %v4072_v15  ;;  %3691 = vmatprep.subr.bf16.mxu0 %v3690_v16 }
 0x100   :  { %4075 = vmatprep.subr.bf16.mxu1 %v4074_v21 }
 0x102   :  { %3693 = vmatpush1.bf16.msra.mxu0 %v3692_v32 }
 0x103   :  { %8 = vsyncpa [#allocation3], 0  ;;  %4077 = vmatpush1.bf16.msra.mxu1 %v4076_v33  ;;  %3695 = vmatprep.subr.bf16.mxu0 %v3694_v34  ;;  %v4080_v39 = vpack.c.bf16 %v1051_v44, %v1043_v41  ;;  %v3698_v53 = vpack.c.bf16 %v1066_v47, %v1058_v45  ;;  %v1057_v54 = vld [vmem:[%s9867_s1 + $0x2080] sm:$0xff]  ;;  %v1059_v60 = vld [vmem:[%s9867_s1 + $0x2090] sm:$0xff]  ;;  %v4082_v61 = vpack.c.bf16 %v1068_v50, %v1060_v49  ;;  %vm3421_vm0 = vcmp.lt.s32.totalorder %v1556_v46, 1000 }
 0x104   :  { %v1065_v58 = vld [vmem:[%s9867_s1 + $0x20c0] sm:$0xff]  ;;  %4079 = vmatprep.subr.bf16.mxu1 %v4078_v42  ;;  %v1067_v62 = vld [vmem:[%s9867_s1 + $0x20d0] sm:$0xff]  ;;  %v1074_v63 = vld [vmem:[%s9867_s1 + $0x2108] sm:$0xff]  ;;  %v6749_v1 = vrot.slane %v6727_v51, %v5353_v8 }
 0x105   :  { %v1082_v0 = vld [vmem:[%s9867_s1 + $0x2148] sm:$0xff]  ;;  %1935 = vmatmul.mubr.f32.vlgmr.msra.gmra.mrb[0].mxu0 %v6716_v48  ;;  %v1076_v2 = vld [vmem:[%s9867_s1 + $0x2118] sm:$0xff]  ;;  %v3700_v4 = vpack.c.bf16 %v1065_v58, %v1057_v54  ;;  %v4084_v5 = vpack.c.bf16 %v1067_v62, %v1059_v60  ;;  %v1073_v9 = vld [vmem:[%s9867_s1 + $0x2100] sm:$0xff] }
 0x106   :  { %v1084_v3 = vld [vmem:[%s9867_s1 + $0x2158] sm:$0xff]  ;;  %3697 = vmatpush1.bf16.msra.mxu0 %v3696_v52  ;;  %2361 = vmatmul.mubr.f32.vlgmr.msra.gmra.mrb[0].mxu1 %v6716_v48  ;;  %v3702_v7 = vpack.c.bf16 %v1082_v0, %v1074_v63  ;;  %v1081_v11 = vld [vmem:[%s9867_s1 + $0x2140] sm:$0xff]  ;;  %v1075_v12 = vld [vmem:[%s9867_s1 + $0x2110] sm:$0xff] }
 0x107   :  { %4081 = vmatpush1.bf16.msra.mxu1 %v4080_v39  ;;  %3699 = vmatprep.subr.bf16.mxu0 %v3698_v53  ;;  %v4086_v13 = vpack.c.bf16 %v1084_v3, %v1076_v2  ;;  %v1083_v19 = vld [vmem:[%s9867_s1 + $0x2150] sm:$0xff]  ;;  %v1090_v14 = vld [vmem:[%s9867_s1 + $0x2188] sm:$0xff]  ;;  %v1092_v16 = vld [vmem:[%s9867_s1 + $0x2198] sm:$0xff]  ;;  %v3704_v18 = vpack.c.bf16 %v1081_v11, %v1073_v9 }
 0x108   :  { %4083 = vmatprep.subr.bf16.mxu1 %v4082_v61  ;;  %v1098_v15 = vld [vmem:[%s9867_s1 + $0x21c8] sm:$0xff]  ;;  %2005 = vmatprep.mubr.f32.mxu0 %v6749_v1  ;;  %v1100_v17 = vld [vmem:[%s9867_s1 + $0x21d8] sm:$0xff]  ;;  %v4088_v20 = vpack.c.bf16 %v1083_v19, %v1075_v12  ;;  %v1089_v25 = vld [vmem:[%s9867_s1 + $0x2180] sm:$0xff] }
 0x109   :  { %2431 = vmatprep.mubr.f32.mxu1 %v6749_v1  ;;  %v3706_v21 = vpack.c.bf16 %v1098_v15, %v1090_v14  ;;  %v1097_v27 = vld [vmem:[%s9867_s1 + $0x21c0] sm:$0xff]  ;;  %v1091_v28 = vld [vmem:[%s9867_s1 + $0x2190] sm:$0xff]  ;;  %v4090_v29 = vpack.c.bf16 %v1100_v17, %v1092_v16  ;;  %v1106_v32 = vld [vmem:[%s9867_s1 + $0x2208] sm:$0xff] }
 0x10a   :  { %3701 = vmatpush1.bf16.msra.mxu0 %v3700_v4  ;;  %v1099_v30 = vld [vmem:[%s9867_s1 + $0x21d0] sm:$0xff]  ;;  %v1114_v33 = vld [vmem:[%s9867_s1 + $0x2248] sm:$0xff]  ;;  %v1108_v34 = vld [vmem:[%s9867_s1 + $0x2218] sm:$0xff]  ;;  %v3708_v36 = vpack.c.bf16 %v1097_v27, %v1089_v25 }
 0x10b   :  { %4085 = vmatpush1.bf16.msra.mxu1 %v4084_v5  ;;  %3703 = vmatprep.subr.bf16.mxu0 %v3702_v7  ;;  %v1116_v35 = vld [vmem:[%s9867_s1 + $0x2258] sm:$0xff]  ;;  %v4092_v41 = vpack.c.bf16 %v1099_v30, %v1091_v28  ;;  %v3710_v42 = vpack.c.bf16 %v1114_v33, %v1106_v32  ;;  %v1105_v44 = vld [vmem:[%s9867_s1 + $0x2200] sm:$0xff]  ;;  %v1107_v47 = vld [vmem:[%s9867_s1 + $0x2210] sm:$0xff] }
 0x10c   :  { %4087 = vmatprep.subr.bf16.mxu1 %v4086_v13  ;;  %v1113_v45 = vld [vmem:[%s9867_s1 + $0x2240] sm:$0xff]  ;;  %v4094_v49 = vpack.c.bf16 %v1116_v35, %v1108_v34  ;;  %v1115_v50 = vld [vmem:[%s9867_s1 + $0x2250] sm:$0xff]  ;;  %v1122_v52 = vld [vmem:[%s9867_s1 + $0x2288] sm:$0xff] }
 0x10d   :  { %v1130_v39 = vld [vmem:[%s9867_s1 + $0x22c8] sm:$0xff]  ;;  %v1124_v53 = vld [vmem:[%s9867_s1 + $0x2298] sm:$0xff]  ;;  %v3712_v58 = vpack.c.bf16 %v1113_v45, %v1105_v44  ;;  %v4096_v60 = vpack.c.bf16 %v1115_v50, %v1107_v47  ;;  %v1121_v62 = vld [vmem:[%s9867_s1 + $0x2280] sm:$0xff] }
 0x10e   :  { %3705 = vmatpush1.bf16.msra.mxu0 %v3704_v18  ;;  %v1132_v54 = vld [vmem:[%s9867_s1 + $0x22d8] sm:$0xff]  ;;  %v3714_v61 = vpack.c.bf16 %v1130_v39, %v1122_v52  ;;  %v1129_v63 = vld [vmem:[%s9867_s1 + $0x22c0] sm:$0xff]  ;;  %v1123_v0 = vld [vmem:[%s9867_s1 + $0x2290] sm:$0xff] }
 0x10f   :  { %4089 = vmatpush1.bf16.msra.mxu1 %v4088_v20  ;;  %3707 = vmatprep.subr.bf16.mxu0 %v3706_v21  ;;  %v4098_v2 = vpack.c.bf16 %v1132_v54, %v1124_v53  ;;  %v1131_v3 = vld [vmem:[%s9867_s1 + $0x22d0] sm:$0xff]  ;;  %v1138_v4 = vld [vmem:[%s9867_s1 + $0x2308] sm:$0xff]  ;;  %v1140_v7 = vld [vmem:[%s9867_s1 + $0x2318] sm:$0xff]  ;;  %v3716_v11 = vpack.c.bf16 %v1129_v63, %v1121_v62 }
 0x110   :  { %4091 = vmatprep.subr.bf16.mxu1 %v4090_v29  ;;  %v1146_v5 = vld [vmem:[%s9867_s1 + $0x2348] sm:$0xff]  ;;  %v1148_v9 = vld [vmem:[%s9867_s1 + $0x2358] sm:$0xff]  ;;  %v4100_v12 = vpack.c.bf16 %v1131_v3, %v1123_v0  ;;  %v1137_v19 = vld [vmem:[%s9867_s1 + $0x2300] sm:$0xff] }
 0x111   :  { %v3718_v13 = vpack.c.bf16 %v1146_v5, %v1138_v4  ;;  %v1145_v14 = vld [vmem:[%s9867_s1 + $0x2340] sm:$0xff]  ;;  %v1139_v15 = vld [vmem:[%s9867_s1 + $0x2310] sm:$0xff]  ;;  %v4102_v16 = vpack.c.bf16 %v1148_v9, %v1140_v7  ;;  %v1154_v18 = vld [vmem:[%s9867_s1 + $0x2388] sm:$0xff] }
 0x112   :  { %3709 = vmatpush1.bf16.msra.mxu0 %v3708_v36  ;;  %v1147_v17 = vld [vmem:[%s9867_s1 + $0x2350] sm:$0xff]  ;;  %v1162_v20 = vld [vmem:[%s9867_s1 + $0x23c8] sm:$0xff]  ;;  %v1156_v21 = vld [vmem:[%s9867_s1 + $0x2398] sm:$0xff]  ;;  %v3720_v27 = vpack.c.bf16 %v1145_v14, %v1137_v19 }
 0x113   :  { %4093 = vmatpush1.bf16.msra.mxu1 %v4092_v41  ;;  %3711 = vmatprep.subr.bf16.mxu0 %v3710_v42  ;;  %v1164_v25 = vld [vmem:[%s9867_s1 + $0x23d8] sm:$0xff]  ;;  %v4104_v28 = vpack.c.bf16 %v1147_v17, %v1139_v15  ;;  %v3722_v29 = vpack.c.bf16 %v1162_v20, %v1154_v18  ;;  %v1153_v30 = vld [vmem:[%s9867_s1 + $0x2380] sm:$0xff]  ;;  %v1155_v33 = vld [vmem:[%s9867_s1 + $0x2390] sm:$0xff] }
 0x114   :  { %4095 = vmatprep.subr.bf16.mxu1 %v4094_v49  ;;  %v1161_v32 = vld [vmem:[%s9867_s1 + $0x23c0] sm:$0xff]  ;;  %v4106_v34 = vpack.c.bf16 %v1164_v25, %v1156_v21  ;;  %v1163_v35 = vld [vmem:[%s9867_s1 + $0x23d0] sm:$0xff]  ;;  %v1170_v36 = vld [vmem:[%s9867_s1 + $0x2408] sm:$0xff] }
 0x115   :  { %v1178_v41 = vld [vmem:[%s9867_s1 + $0x2448] sm:$0xff]  ;;  %v1172_v42 = vld [vmem:[%s9867_s1 + $0x2418] sm:$0xff]  ;;  %v3724_v45 = vpack.c.bf16 %v1161_v32, %v1153_v30  ;;  %v4108_v47 = vpack.c.bf16 %v1163_v35, %v1155_v33  ;;  %v1169_v50 = vld [vmem:[%s9867_s1 + $0x2400] sm:$0xff] }
 0x116   :  { %3713 = vmatpush1.bf16.msra.mxu0 %v3712_v58  ;;  %v1180_v44 = vld [vmem:[%s9867_s1 + $0x2458] sm:$0xff]  ;;  %v3726_v49 = vpack.c.bf16 %v1178_v41, %v1170_v36  ;;  %v1177_v52 = vld [vmem:[%s9867_s1 + $0x2440] sm:$0xff]  ;;  %v1171_v39 = vld [vmem:[%s9867_s1 + $0x2410] sm:$0xff] }
 0x117   :  { %4097 = vmatpush1.bf16.msra.mxu1 %v4096_v60  ;;  %3715 = vmatprep.subr.bf16.mxu0 %v3714_v61  ;;  %v4110_v53 = vpack.c.bf16 %v1180_v44, %v1172_v42  ;;  %v1179_v54 = vld [vmem:[%s9867_s1 + $0x2450] sm:$0xff]  ;;  %v1186_v58 = vld [vmem:[%s9867_s1 + $0x2488] sm:$0xff]  ;;  %v1188_v61 = vld [vmem:[%s9867_s1 + $0x2498] sm:$0xff]  ;;  %v3728_v63 = vpack.c.bf16 %v1177_v52, %v1169_v50 }
 0x118   :  { %4099 = vmatprep.subr.bf16.mxu1 %v4098_v2  ;;  %v1194_v60 = vld [vmem:[%s9867_s1 + $0x24c8] sm:$0xff]  ;;  %v1196_v62 = vld [vmem:[%s9867_s1 + $0x24d8] sm:$0xff]  ;;  %v4112_v0 = vpack.c.bf16 %v1179_v54, %v1171_v39  ;;  %v1185_v3 = vld [vmem:[%s9867_s1 + $0x2480] sm:$0xff] }
 0x119   :  { %v3730_v2 = vpack.c.bf16 %v1194_v60, %v1186_v58  ;;  %v1193_v4 = vld [vmem:[%s9867_s1 + $0x24c0] sm:$0xff]  ;;  %v1187_v5 = vld [vmem:[%s9867_s1 + $0x2490] sm:$0xff]  ;;  %v4114_v7 = vpack.c.bf16 %v1196_v62, %v1188_v61  ;;  %v1212_v19 = vld [vmem:[%s9867_s1 + $0x2558] sm:$0xff] }
 0x11a   :  { %3717 = vmatpush1.bf16.msra.mxu0 %v3716_v11  ;;  %v1195_v9 = vld [vmem:[%s9867_s1 + $0x24d0] sm:$0xff]  ;;  %v1202_v11 = vld [vmem:[%s9867_s1 + $0x2508] sm:$0xff]  ;;  %v3732_v14 = vpack.c.bf16 %v1193_v4, %v1185_v3  ;;  %v1201_v17 = vld [vmem:[%s9867_s1 + $0x2500] sm:$0xff] }
 0x11b   :  { %4101 = vmatpush1.bf16.msra.mxu1 %v4100_v12  ;;  %3719 = vmatprep.subr.bf16.mxu0 %v3718_v13  ;;  %v1210_v12 = vld [vmem:[%s9867_s1 + $0x2548] sm:$0xff]  ;;  %v1204_v13 = vld [vmem:[%s9867_s1 + $0x2518] sm:$0xff]  ;;  %v4116_v15 = vpack.c.bf16 %v1195_v9, %v1187_v5  ;;  %v1209_v18 = vld [vmem:[%s9867_s1 + $0x2540] sm:$0xff] }
 0x11c   :  { %4103 = vmatprep.subr.bf16.mxu1 %v4102_v16  ;;  %v3734_v16 = vpack.c.bf16 %v1210_v12, %v1202_v11  ;;  %v1203_v20 = vld [vmem:[%s9867_s1 + $0x2510] sm:$0xff]  ;;  %v4118_v21 = vpack.c.bf16 %v1212_v19, %v1204_v13  ;;  %v1228_v30 = vld [vmem:[%s9867_s1 + $0x25d8] sm:$0xff]  ;;  %v3736_v32 = vpack.c.bf16 %v1209_v18, %v1201_v17  ;;  %v1217_v35 = vld [vmem:[%s9867_s1 + $0x2580] sm:$0xff] }
 0x11d   :  { %v1211_v25 = vld [vmem:[%s9867_s1 + $0x2550] sm:$0xff]  ;;  %v1225_v36 = vld [vmem:[%s9867_s1 + $0x25c0] sm:$0xff]  ;;  %v1244_v50 = vld [vmem:[%s9867_s1 + $0x2658] sm:$0xff] }
 0x11e   :  { %3721 = vmatpush1.bf16.msra.mxu0 %v3720_v27  ;;  %v1218_v27 = vld [vmem:[%s9867_s1 + $0x2588] sm:$0xff]  ;;  %v4120_v33 = vpack.c.bf16 %v1211_v25, %v1203_v20  ;;  %v1219_v41 = vld [vmem:[%s9867_s1 + $0x2590] sm:$0xff]  ;;  %v3740_v52 = vpack.c.bf16 %v1225_v36, %v1217_v35  ;;  %v1233_v54 = vld [vmem:[%s9867_s1 + $0x2600] sm:$0xff] }
 0x11f   :  { %4105 = vmatpush1.bf16.msra.mxu1 %v4104_v28  ;;  %3723 = vmatprep.subr.bf16.mxu0 %v3722_v29  ;;  %v1226_v28 = vld [vmem:[%s9867_s1 + $0x25c8] sm:$0xff]  ;;  %v1220_v29 = vld [vmem:[%s9867_s1 + $0x2598] sm:$0xff]  ;;  %v1227_v44 = vld [vmem:[%s9867_s1 + $0x25d0] sm:$0xff] }
 0x120   :  { %4107 = vmatprep.subr.bf16.mxu1 %v4106_v34  ;;  %v3738_v34 = vpack.c.bf16 %v1226_v28, %v1218_v27  ;;  %v4122_v42 = vpack.c.bf16 %v1228_v30, %v1220_v29  ;;  %v4124_v39 = vpack.c.bf16 %v1227_v44, %v1219_v41  ;;  %v1241_v58 = vld [vmem:[%s9867_s1 + $0x2640] sm:$0xff]  ;;  %v1235_v60 = vld [vmem:[%s9867_s1 + $0x2610] sm:$0xff]  ;;  %v1260_v3 = vld [vmem:[%s9867_s1 + $0x26d8] sm:$0xff] }
 0x121   :  { %v1243_v62 = vld [vmem:[%s9867_s1 + $0x2650] sm:$0xff]  ;;  %v3744_v4 = vpack.c.bf16 %v1241_v58, %v1233_v54  ;;  %v1249_v9 = vld [vmem:[%s9867_s1 + $0x2680] sm:$0xff]  ;;  %v1276_v17 = vld [vmem:[%s9867_s1 + $0x2758] sm:$0xff] }
 0x122   :  { %3725 = vmatpush1.bf16.msra.mxu0 %v3724_v45  ;;  %v1234_v45 = vld [vmem:[%s9867_s1 + $0x2608] sm:$0xff]  ;;  %v4128_v5 = vpack.c.bf16 %v1243_v62, %v1235_v60  ;;  %v1257_v11 = vld [vmem:[%s9867_s1 + $0x26c0] sm:$0xff]  ;;  %v1251_v12 = vld [vmem:[%s9867_s1 + $0x2690] sm:$0xff] }
 0x123   :  { %4109 = vmatpush1.bf16.msra.mxu1 %v4108_v47  ;;  %3727 = vmatprep.subr.bf16.mxu0 %v3726_v49  ;;  %v1242_v47 = vld [vmem:[%s9867_s1 + $0x2648] sm:$0xff]  ;;  %v1236_v49 = vld [vmem:[%s9867_s1 + $0x2618] sm:$0xff]  ;;  %v1259_v19 = vld [vmem:[%s9867_s1 + $0x26d0] sm:$0xff]  ;;  %v3748_v18 = vpack.c.bf16 %v1257_v11, %v1249_v9 }
 0x124   :  { %4111 = vmatprep.subr.bf16.mxu1 %v4110_v53  ;;  %v3742_v53 = vpack.c.bf16 %v1242_v47, %v1234_v45  ;;  %v4126_v61 = vpack.c.bf16 %v1244_v50, %v1236_v49  ;;  %v4132_v20 = vpack.c.bf16 %v1259_v19, %v1251_v12  ;;  %v1265_v25 = vld [vmem:[%s9867_s1 + $0x2700] sm:$0xff]  ;;  %v1267_v28 = vld [vmem:[%s9867_s1 + $0x2710] sm:$0xff]  ;;  %v1292_v35 = vld [vmem:[%s9867_s1 + $0x27d8] sm:$0xff] }
 0x125   :  { %v1273_v27 = vld [vmem:[%s9867_s1 + $0x2740] sm:$0xff]  ;;  %v1275_v30 = vld [vmem:[%s9867_s1 + $0x2750] sm:$0xff]  ;;  %v1308_v54 = vld [vmem:[%s9867_s1 + $0x2858] sm:$0xff] }
 0x126   :  { %3729 = vmatpush1.bf16.msra.mxu0 %v3728_v63  ;;  %v1250_v63 = vld [vmem:[%s9867_s1 + $0x2688] sm:$0xff]  ;;  %v3752_v36 = vpack.c.bf16 %v1273_v27, %v1265_v25  ;;  %v4136_v41 = vpack.c.bf16 %v1275_v30, %v1267_v28  ;;  %v1281_v44 = vld [vmem:[%s9867_s1 + $0x2780] sm:$0xff]  ;;  %v1283_v47 = vld [vmem:[%s9867_s1 + $0x2790] sm:$0xff]  ;;  %v7145_v25 = vrot.slane %v6727_v51, %v5508_v23 }
 0x127   :  { %4113 = vmatpush1.bf16.msra.mxu1 %v4112_v0  ;;  %3731 = vmatprep.subr.bf16.mxu0 %v3730_v2  ;;  %v1258_v0 = vld [vmem:[%s9867_s1 + $0x26c8] sm:$0xff]  ;;  %v1252_v2 = vld [vmem:[%s9867_s1 + $0x2698] sm:$0xff]  ;;  %v1289_v45 = vld [vmem:[%s9867_s1 + $0x27c0] sm:$0xff] }
 0x128   :  { %4115 = vmatprep.subr.bf16.mxu1 %v4114_v7  ;;  %v3746_v7 = vpack.c.bf16 %v1258_v0, %v1250_v63  ;;  %v4130_v13 = vpack.c.bf16 %v1260_v3, %v1252_v2  ;;  %v1291_v50 = vld [vmem:[%s9867_s1 + $0x27d0] sm:$0xff]  ;;  %v3756_v58 = vpack.c.bf16 %v1289_v45, %v1281_v44  ;;  %v1297_v62 = vld [vmem:[%s9867_s1 + $0x2800] sm:$0xff]  ;;  %v1316_v9 = vld [vmem:[%s9867_s1 + $0x2898] sm:$0xff] }
 0x129   :  { %v4140_v60 = vpack.c.bf16 %v1291_v50, %v1283_v47  ;;  %v1305_v63 = vld [vmem:[%s9867_s1 + $0x2840] sm:$0xff]  ;;  %v1299_v0 = vld [vmem:[%s9867_s1 + $0x2810] sm:$0xff]  ;;  %v1324_v11 = vld [vmem:[%s9867_s1 + $0x28d8] sm:$0xff] }
 0x12a   :  { %3733 = vmatpush1.bf16.msra.mxu0 %v3732_v14  ;;  %v1266_v14 = vld [vmem:[%s9867_s1 + $0x2708] sm:$0xff]  ;;  %v1307_v3 = vld [vmem:[%s9867_s1 + $0x2850] sm:$0xff]  ;;  %v3760_v12 = vpack.c.bf16 %v1305_v63, %v1297_v62  ;;  %v1332_v27 = vld [vmem:[%s9867_s1 + $0x2918] sm:$0xff] }
 0x12b   :  { %4117 = vmatpush1.bf16.msra.mxu1 %v4116_v15  ;;  %3735 = vmatprep.subr.bf16.mxu0 %v3734_v16  ;;  %v1274_v15 = vld [vmem:[%s9867_s1 + $0x2748] sm:$0xff]  ;;  %v1268_v16 = vld [vmem:[%s9867_s1 + $0x2718] sm:$0xff] }
 0x12c   :  { %4119 = vmatprep.subr.bf16.mxu1 %v4118_v21  ;;  %v3750_v21 = vpack.c.bf16 %v1274_v15, %v1266_v14  ;;  %v4134_v29 = vpack.c.bf16 %v1276_v17, %v1268_v16  ;;  %v1313_v14 = vld [vmem:[%s9867_s1 + $0x2880] sm:$0xff]  ;;  %v1315_v16 = vld [vmem:[%s9867_s1 + $0x2890] sm:$0xff]  ;;  %v4146_v17 = vpack.c.bf16 %v1324_v11, %v1316_v9  ;;  %v1340_v28 = vld [vmem:[%s9867_s1 + $0x2958] sm:$0xff] }
 0x12d   :  { %v1321_v15 = vld [vmem:[%s9867_s1 + $0x28c0] sm:$0xff]  ;;  %v1348_v44 = vld [vmem:[%s9867_s1 + $0x2998] sm:$0xff]  ;;  %v1363_v9 = vld [vmem:[%s9867_s1 + $0x2a10] sm:$0xff] }
 0x12e   :  { %3737 = vmatpush1.bf16.msra.mxu0 %v3736_v32  ;;  %v1282_v32 = vld [vmem:[%s9867_s1 + $0x2788] sm:$0xff]  ;;  %v1356_v45 = vld [vmem:[%s9867_s1 + $0x29d8] sm:$0xff] }
 0x12f   :  { %4121 = vmatpush1.bf16.msra.mxu1 %v4120_v33  ;;  %3739 = vmatprep.subr.bf16.mxu0 %v3738_v34  ;;  %v1290_v33 = vld [vmem:[%s9867_s1 + $0x27c8] sm:$0xff]  ;;  %v1284_v34 = vld [vmem:[%s9867_s1 + $0x2798] sm:$0xff] }
 0x130   :  { %4123 = vmatprep.subr.bf16.mxu1 %v4122_v42  ;;  %v3754_v42 = vpack.c.bf16 %v1290_v33, %v1282_v32  ;;  %v4138_v49 = vpack.c.bf16 %v1292_v35, %v1284_v34  ;;  %v1337_v33 = vld [vmem:[%s9867_s1 + $0x2940] sm:$0xff]  ;;  %v1331_v34 = vld [vmem:[%s9867_s1 + $0x2910] sm:$0xff]  ;;  %v4150_v35 = vpack.c.bf16 %v1340_v28, %v1332_v27  ;;  %v1364_v62 = vld [vmem:[%s9867_s1 + $0x2a18] sm:$0xff] }
 0x131   :  { %v1372_v63 = vld [vmem:[%s9867_s1 + $0x2a58] sm:$0xff]  ;;  %v1379_v27 = vld [vmem:[%s9867_s1 + $0x2a90] sm:$0xff] }
 0x132   :  { %3741 = vmatpush1.bf16.msra.mxu0 %v3740_v52  ;;  %v1298_v52 = vld [vmem:[%s9867_s1 + $0x2808] sm:$0xff]  ;;  %v4158_v11 = vpack.c.bf16 %v1372_v63, %v1364_v62  ;;  %v1411_v62 = vld [vmem:[%s9867_s1 + $0x2b90] sm:$0xff] }
 0x133   :  { %4125 = vmatpush1.bf16.msra.mxu1 %v4124_v39  ;;  %3743 = vmatprep.subr.bf16.mxu0 %v3742_v53  ;;  %v1306_v39 = vld [vmem:[%s9867_s1 + $0x2848] sm:$0xff]  ;;  %v1300_v53 = vld [vmem:[%s9867_s1 + $0x2818] sm:$0xff] }
 0x134   :  { %4127 = vmatprep.subr.bf16.mxu1 %v4126_v61  ;;  %v3758_v61 = vpack.c.bf16 %v1306_v39, %v1298_v52  ;;  %v4142_v2 = vpack.c.bf16 %v1308_v54, %v1300_v53  ;;  %v1345_v52 = vld [vmem:[%s9867_s1 + $0x2980] sm:$0xff]  ;;  %v1347_v53 = vld [vmem:[%s9867_s1 + $0x2990] sm:$0xff]  ;;  %v4154_v54 = vpack.c.bf16 %v1356_v45, %v1348_v44 }
 0x135   :  { %v1353_v39 = vld [vmem:[%s9867_s1 + $0x29c0] sm:$0xff]  ;;  %v1395_v44 = vld [vmem:[%s9867_s1 + $0x2b10] sm:$0xff] }
 0x136   :  { %3745 = vmatpush1.bf16.msra.mxu0 %v3744_v4  ;;  %v1314_v4 = vld [vmem:[%s9867_s1 + $0x2888] sm:$0xff] }
 0x137   :  { %4129 = vmatpush1.bf16.msra.mxu1 %v4128_v5  ;;  %3747 = vmatprep.subr.bf16.mxu0 %v3746_v7  ;;  %v1322_v5 = vld [vmem:[%s9867_s1 + $0x28c8] sm:$0xff]  ;;  %v7117_v7 = vrot.slane %v6727_v51, %v5487_v10  ;;  %v1329_v51 = vld [vmem:[%s9867_s1 + $0x2900] sm:$0xff] }
 0x138   :  { %4131 = vmatprep.subr.bf16.mxu1 %v4130_v13  ;;  %v4144_v13 = vpack.c.bf16 %v1307_v3, %v1299_v0  ;;  %v3762_v19 = vpack.c.bf16 %v1322_v5, %v1314_v4  ;;  %v3768_v47 = vpack.c.bf16 %v1337_v33, %v1329_v51  ;;  %v3772_v0 = vpack.c.bf16 %v1353_v39, %v1345_v52  ;;  %v1361_v4 = vld [vmem:[%s9867_s1 + $0x2a00] sm:$0xff]  ;;  %v1396_v51 = vld [vmem:[%s9867_s1 + $0x2b18] sm:$0xff] }
 0x139   :  { %v1369_v5 = vld [vmem:[%s9867_s1 + $0x2a40] sm:$0xff]  ;;  %v1404_v33 = vld [vmem:[%s9867_s1 + $0x2b58] sm:$0xff] }
 0x13a   :  { %3749 = vmatpush1.bf16.msra.mxu0 %v3748_v18  ;;  %v1323_v18 = vld [vmem:[%s9867_s1 + $0x28d0] sm:$0xff]  ;;  %v4166_v45 = vpack.c.bf16 %v1404_v33, %v1396_v51  ;;  %v1412_v52 = vld [vmem:[%s9867_s1 + $0x2b98] sm:$0xff] }
 0x13b   :  { %4133 = vmatpush1.bf16.msra.mxu1 %v4132_v20  ;;  %3751 = vmatprep.subr.bf16.mxu0 %v3750_v21  ;;  %v1330_v20 = vld [vmem:[%s9867_s1 + $0x2908] sm:$0xff]  ;;  %v4148_v30 = vpack.c.bf16 %v1323_v18, %v1315_v16  ;;  %v3776_v16 = vpack.c.bf16 %v1369_v5, %v1361_v4  ;;  %v1420_v39 = vld [vmem:[%s9867_s1 + $0x2bd8] sm:$0xff]  ;;  %v1443_v51 = vld [vmem:[%s9867_s1 + $0x2c90] sm:$0xff] }
 0x13c   :  { %4135 = vmatprep.subr.bf16.mxu1 %v4134_v29  ;;  %v1338_v21 = vld [vmem:[%s9867_s1 + $0x2948] sm:$0xff]  ;;  %v3764_v29 = vpack.c.bf16 %v1321_v15, %v1313_v14  ;;  %v1380_v14 = vld [vmem:[%s9867_s1 + $0x2a98] sm:$0xff]  ;;  %v4170_v63 = vpack.c.bf16 %v1420_v39, %v1412_v52  ;;  %v1459_v52 = vld [vmem:[%s9867_s1 + $0x2d10] sm:$0xff] }
 0x13d   :  { %v3766_v32 = vpack.c.bf16 %v1338_v21, %v1330_v20  ;;  %v1388_v15 = vld [vmem:[%s9867_s1 + $0x2ad8] sm:$0xff]  ;;  %v1377_v20 = vld [vmem:[%s9867_s1 + $0x2a80] sm:$0xff] }
 0x13e   :  { %3753 = vmatpush1.bf16.msra.mxu0 %v3752_v36  ;;  %v1339_v36 = vld [vmem:[%s9867_s1 + $0x2950] sm:$0xff]  ;;  %v1385_v21 = vld [vmem:[%s9867_s1 + $0x2ac0] sm:$0xff]  ;;  %v4162_v28 = vpack.c.bf16 %v1388_v15, %v1380_v14  ;;  %v1428_v4 = vld [vmem:[%s9867_s1 + $0x2c18] sm:$0xff] }
 0x13f   :  { %4137 = vmatpush1.bf16.msra.mxu1 %v4136_v41  ;;  %3755 = vmatprep.subr.bf16.mxu0 %v3754_v42  ;;  %v1346_v41 = vld [vmem:[%s9867_s1 + $0x2988] sm:$0xff]  ;;  %v1436_v5 = vld [vmem:[%s9867_s1 + $0x2c58] sm:$0xff]  ;;  %v1427_v14 = vld [vmem:[%s9867_s1 + $0x2c10] sm:$0xff] }
 0x140   :  { %4139 = vmatprep.subr.bf16.mxu1 %v4138_v49  ;;  %v1354_v42 = vld [vmem:[%s9867_s1 + $0x29c8] sm:$0xff]  ;;  %v4152_v49 = vpack.c.bf16 %v1339_v36, %v1331_v34  ;;  %v3780_v34 = vpack.c.bf16 %v1385_v21, %v1377_v20  ;;  %v4174_v15 = vpack.c.bf16 %v1436_v5, %v1428_v4  ;;  %v1444_v20 = vld [vmem:[%s9867_s1 + $0x2c98] sm:$0xff]  ;;  %v1475_v4 = vld [vmem:[%s9867_s1 + $0x2d90] sm:$0xff] }
 0x141   :  { %v3770_v50 = vpack.c.bf16 %v1354_v42, %v1346_v41  ;;  %v1393_v41 = vld [vmem:[%s9867_s1 + $0x2b00] sm:$0xff]  ;;  %v1452_v21 = vld [vmem:[%s9867_s1 + $0x2cd8] sm:$0xff] }
 0x142   :  { %3757 = vmatpush1.bf16.msra.mxu0 %v3756_v58  ;;  %v1355_v58 = vld [vmem:[%s9867_s1 + $0x29d0] sm:$0xff]  ;;  %v1401_v42 = vld [vmem:[%s9867_s1 + $0x2b40] sm:$0xff]  ;;  %v4178_v33 = vpack.c.bf16 %v1452_v21, %v1444_v20 }
 0x143   :  { %4141 = vmatpush1.bf16.msra.mxu1 %v4140_v60  ;;  %3759 = vmatprep.subr.bf16.mxu0 %v3758_v61  ;;  %v1362_v60 = vld [vmem:[%s9867_s1 + $0x2a08] sm:$0xff]  ;;  %v1491_v20 = vld [vmem:[%s9867_s1 + $0x2e10] sm:$0xff] }
 0x144   :  { %4143 = vmatprep.subr.bf16.mxu1 %v4142_v2  ;;  %v1370_v61 = vld [vmem:[%s9867_s1 + $0x2a48] sm:$0xff]  ;;  %v4156_v2 = vpack.c.bf16 %v1355_v58, %v1347_v53  ;;  %v3784_v53 = vpack.c.bf16 %v1401_v42, %v1393_v41  ;;  %v1460_v41 = vld [vmem:[%s9867_s1 + $0x2d18] sm:$0xff] }
 0x145   :  { %2006 = vmatmul.mubr.f32.vlgmr.msra.gmra.mrb[0].mxu0 %v7117_v7  ;;  %v3774_v3 = vpack.c.bf16 %v1370_v61, %v1362_v60  ;;  %v1409_v60 = vld [vmem:[%s9867_s1 + $0x2b80] sm:$0xff]  ;;  %v1468_v42 = vld [vmem:[%s9867_s1 + $0x2d58] sm:$0xff] }
 0x146   :  { %3761 = vmatpush1.bf16.msra.mxu0 %v3760_v12  ;;  %2432 = vmatmul.mubr.f32.vlgmr.msra.gmra.mrb[0].mxu1 %v7117_v7  ;;  %v1371_v12 = vld [vmem:[%s9867_s1 + $0x2a50] sm:$0xff]  ;;  %v1417_v61 = vld [vmem:[%s9867_s1 + $0x2bc0] sm:$0xff]  ;;  %v4182_v39 = vpack.c.bf16 %v1468_v42, %v1460_v41 }
 0x147   :  { %4145 = vmatpush1.bf16.msra.mxu1 %v4144_v13  ;;  %3763 = vmatprep.subr.bf16.mxu0 %v3762_v19  ;;  %v1378_v13 = vld [vmem:[%s9867_s1 + $0x2a88] sm:$0xff]  ;;  %v1507_v41 = vld [vmem:[%s9867_s1 + $0x2e90] sm:$0xff] }
 0x148   :  { %4147 = vmatprep.subr.bf16.mxu1 %v4146_v17  ;;  %2076 = vmatprep.mubr.f32.mxu0 %v7145_v25  ;;  %v1386_v19 = vld [vmem:[%s9867_s1 + $0x2ac8] sm:$0xff]  ;;  %v4160_v17 = vpack.c.bf16 %v1371_v12, %v1363_v9  ;;  %v3788_v9 = vpack.c.bf16 %v1417_v61, %v1409_v60  ;;  %v1476_v60 = vld [vmem:[%s9867_s1 + $0x2d98] sm:$0xff] }
 0x149   :  { %2502 = vmatprep.mubr.f32.mxu1 %v7145_v25  ;;  %v3778_v18 = vpack.c.bf16 %v1386_v19, %v1378_v13  ;;  %v1425_v13 = vld [vmem:[%s9867_s1 + $0x2c00] sm:$0xff]  ;;  %v1484_v61 = vld [vmem:[%s9867_s1 + $0x2dd8] sm:$0xff] }
 0x14a   :  { %3765 = vmatpush1.bf16.msra.mxu0 %v3764_v29  ;;  %v1387_v29 = vld [vmem:[%s9867_s1 + $0x2ad0] sm:$0xff]  ;;  %v1433_v19 = vld [vmem:[%s9867_s1 + $0x2c40] sm:$0xff]  ;;  %v4186_v5 = vpack.c.bf16 %v1484_v61, %v1476_v60 }
 0x14b   :  { %4149 = vmatpush1.bf16.msra.mxu1 %v4148_v30  ;;  %3767 = vmatprep.subr.bf16.mxu0 %v3766_v32  ;;  %v1394_v30 = vld [vmem:[%s9867_s1 + $0x2b08] sm:$0xff]  ;;  %v1523_v60 = vld [vmem:[%s9867_s1 + $0x2f10] sm:$0xff] }
 0x14c   :  { %4151 = vmatprep.subr.bf16.mxu1 %v4150_v35  ;;  %v1402_v32 = vld [vmem:[%s9867_s1 + $0x2b48] sm:$0xff]  ;;  %v4164_v35 = vpack.c.bf16 %v1387_v29, %v1379_v27  ;;  %v3792_v27 = vpack.c.bf16 %v1433_v19, %v1425_v13  ;;  %v1492_v13 = vld [vmem:[%s9867_s1 + $0x2e18] sm:$0xff] }
 0x14d   :  { %v3782_v36 = vpack.c.bf16 %v1402_v32, %v1394_v30  ;;  %v1441_v30 = vld [vmem:[%s9867_s1 + $0x2c80] sm:$0xff]  ;;  %v1500_v19 = vld [vmem:[%s9867_s1 + $0x2e58] sm:$0xff] }
 0x14e   :  { %3769 = vmatpush1.bf16.msra.mxu0 %v3768_v47  ;;  %v1403_v47 = vld [vmem:[%s9867_s1 + $0x2b50] sm:$0xff]  ;;  %v1449_v32 = vld [vmem:[%s9867_s1 + $0x2cc0] sm:$0xff]  ;;  %v4190_v21 = vpack.c.bf16 %v1500_v19, %v1492_v13 }
 0x14f   :  { %4153 = vmatpush1.bf16.msra.mxu1 %v4152_v49  ;;  %3771 = vmatprep.subr.bf16.mxu0 %v3770_v50  ;;  %v1410_v49 = vld [vmem:[%s9867_s1 + $0x2b88] sm:$0xff]  ;;  %v1539_v13 = vld [vmem:[%s9867_s1 + $0x2f90] sm:$0xff] }
 0x150   :  { %4155 = vmatprep.subr.bf16.mxu1 %v4154_v54  ;;  %v1418_v50 = vld [vmem:[%s9867_s1 + $0x2bc8] sm:$0xff]  ;;  %v4168_v54 = vpack.c.bf16 %v1403_v47, %v1395_v44  ;;  %v3796_v44 = vpack.c.bf16 %v1449_v32, %v1441_v30  ;;  %v1508_v30 = vld [vmem:[%s9867_s1 + $0x2e98] sm:$0xff] }
 0x151   :  { %v3786_v58 = vpack.c.bf16 %v1418_v50, %v1410_v49  ;;  %v1457_v49 = vld [vmem:[%s9867_s1 + $0x2d00] sm:$0xff]  ;;  %v1516_v32 = vld [vmem:[%s9867_s1 + $0x2ed8] sm:$0xff] }
 0x152   :  { %3773 = vmatpush1.bf16.msra.mxu0 %v3772_v0  ;;  %v1419_v0 = vld [vmem:[%s9867_s1 + $0x2bd0] sm:$0xff]  ;;  %v1465_v50 = vld [vmem:[%s9867_s1 + $0x2d40] sm:$0xff]  ;;  %v4194_v42 = vpack.c.bf16 %v1516_v32, %v1508_v30 }
 0x153   :  { %4157 = vmatpush1.bf16.msra.mxu1 %v4156_v2  ;;  %3775 = vmatprep.subr.bf16.mxu0 %v3774_v3  ;;  %v1426_v2 = vld [vmem:[%s9867_s1 + $0x2c08] sm:$0xff]  ;;  %v23_v30 = vld [vmem:[%s9867_s1 + $0x30] sm:$0xff] }
 0x154   :  { %4159 = vmatprep.subr.bf16.mxu1 %v4158_v11  ;;  %v1434_v3 = vld [vmem:[%s9867_s1 + $0x2c48] sm:$0xff]  ;;  %v4172_v11 = vpack.c.bf16 %v1419_v0, %v1411_v62  ;;  %v3800_v62 = vpack.c.bf16 %v1465_v50, %v1457_v49  ;;  %v1524_v49 = vld [vmem:[%s9867_s1 + $0x2f18] sm:$0xff] }
 0x155   :  { %v3790_v12 = vpack.c.bf16 %v1434_v3, %v1426_v2  ;;  %v1473_v2 = vld [vmem:[%s9867_s1 + $0x2d80] sm:$0xff]  ;;  %v1532_v50 = vld [vmem:[%s9867_s1 + $0x2f58] sm:$0xff] }
 0x156   :  { %3777 = vmatpush1.bf16.msra.mxu0 %v3776_v16  ;;  %v1435_v16 = vld [vmem:[%s9867_s1 + $0x2c50] sm:$0xff]  ;;  %v1481_v3 = vld [vmem:[%s9867_s1 + $0x2dc0] sm:$0xff]  ;;  %v4198_v61 = vpack.c.bf16 %v1532_v50, %v1524_v49 }
 0x157   :  { %4161 = vmatpush1.bf16.msra.mxu1 %v4160_v17  ;;  %3779 = vmatprep.subr.bf16.mxu0 %v3778_v18  ;;  %v1442_v17 = vld [vmem:[%s9867_s1 + $0x2c88] sm:$0xff]  ;;  %v37_v49 = vld [vmem:[%s9867_s1 + $0xa0] sm:$0xff] }
 0x158   :  { %4163 = vmatprep.subr.bf16.mxu1 %v4162_v28  ;;  %v1450_v18 = vld [vmem:[%s9867_s1 + $0x2cc8] sm:$0xff]  ;;  %v4176_v28 = vpack.c.bf16 %v1435_v16, %v1427_v14  ;;  %v3804_v14 = vpack.c.bf16 %v1481_v3, %v1473_v2  ;;  %v1540_v2 = vld [vmem:[%s9867_s1 + $0x2f98] sm:$0xff]  ;;  %v45_v50 = vld [vmem:[%s9867_s1 + $0xe0] sm:$0xff] }
 0x159   :  { %v3794_v29 = vpack.c.bf16 %v1450_v18, %v1442_v17  ;;  %v1489_v17 = vld [vmem:[%s9867_s1 + $0x2e00] sm:$0xff]  ;;  %v1548_v3 = vld [vmem:[%s9867_s1 + $0x2fd8] sm:$0xff] }
 0x15a   :  { %3781 = vmatpush1.bf16.msra.mxu0 %v3780_v34  ;;  %v1451_v34 = vld [vmem:[%s9867_s1 + $0x2cd0] sm:$0xff]  ;;  %v1497_v18 = vld [vmem:[%s9867_s1 + $0x2e40] sm:$0xff]  ;;  %v4202_v19 = vpack.c.bf16 %v1548_v3, %v1540_v2 }
 0x15b   :  { %4165 = vmatpush1.bf16.msra.mxu1 %v4164_v35  ;;  %3783 = vmatprep.subr.bf16.mxu0 %v3782_v36  ;;  %v1458_v35 = vld [vmem:[%s9867_s1 + $0x2d08] sm:$0xff]  ;;  %v53_v2 = vld [vmem:[%s9867_s1 + $0x120] sm:$0xff] }
 0x15c   :  { %4167 = vmatprep.subr.bf16.mxu1 %v4166_v45  ;;  %v1466_v36 = vld [vmem:[%s9867_s1 + $0x2d48] sm:$0xff]  ;;  %v4180_v45 = vpack.c.bf16 %v1451_v34, %v1443_v51  ;;  %v3808_v51 = vpack.c.bf16 %v1497_v18, %v1489_v17  ;;  %v24_v17 = vld [vmem:[%s9867_s1 + $0x38] sm:$0xff]  ;;  %v61_v3 = vld [vmem:[%s9867_s1 + $0x160] sm:$0xff] }
 0x15d   :  { %v3798_v47 = vpack.c.bf16 %v1466_v36, %v1458_v35  ;;  %v1505_v35 = vld [vmem:[%s9867_s1 + $0x2e80] sm:$0xff]  ;;  %v32_v18 = vld [vmem:[%s9867_s1 + $0x78] sm:$0xff] }
 0x15e   :  { %3785 = vmatpush1.bf16.msra.mxu0 %v3784_v53  ;;  %v1467_v53 = vld [vmem:[%s9867_s1 + $0x2d50] sm:$0xff]  ;;  %v1513_v36 = vld [vmem:[%s9867_s1 + $0x2ec0] sm:$0xff]  ;;  %v4590_v32 = vpack.c.bf16 %v32_v18, %v24_v17 }
 0x15f   :  { %4169 = vmatpush1.bf16.msra.mxu1 %v4168_v54  ;;  %3787 = vmatprep.subr.bf16.mxu0 %v3786_v58  ;;  %v1474_v54 = vld [vmem:[%s9867_s1 + $0x2d88] sm:$0xff]  ;;  %v69_v17 = vld [vmem:[%s9867_s1 + $0x1a0] sm:$0xff] }
 0x160   :  { %4171 = vmatprep.subr.bf16.mxu1 %v4170_v63  ;;  %v1482_v58 = vld [vmem:[%s9867_s1 + $0x2dc8] sm:$0xff]  ;;  %v4184_v63 = vpack.c.bf16 %v1467_v53, %v1459_v52  ;;  %v3812_v52 = vpack.c.bf16 %v1513_v36, %v1505_v35  ;;  %v77_v18 = vld [vmem:[%s9867_s1 + $0x1e0] sm:$0xff] }
 0x161   :  { %v3802_v0 = vpack.c.bf16 %v1482_v58, %v1474_v54  ;;  %v1521_v54 = vld [vmem:[%s9867_s1 + $0x2f00] sm:$0xff]  ;;  %v5025_v35 = vld [vmem:[%s9866_s0 + $0x8] sm:$0xf] }
 0x162   :  { %3789 = vmatpush1.bf16.msra.mxu0 %v3788_v9  ;;  %v1483_v9 = vld [vmem:[%s9867_s1 + $0x2dd0] sm:$0xff]  ;;  %v1529_v58 = vld [vmem:[%s9867_s1 + $0x2f40] sm:$0xff]  ;;  %v7515_v36 = vrot.slane %v5025_v35, %v5889_v43 }
 0x163   :  { %4173 = vmatpush1.bf16.msra.mxu1 %v4172_v11  ;;  %3791 = vmatprep.subr.bf16.mxu0 %v3790_v12  ;;  %v1490_v11 = vld [vmem:[%s9867_s1 + $0x2e08] sm:$0xff]  ;;  %v93_v35 = vld [vmem:[%s9867_s1 + $0x260] sm:$0xff] }
 0x164   :  { %4175 = vmatprep.subr.bf16.mxu1 %v4174_v15  ;;  %v1498_v12 = vld [vmem:[%s9867_s1 + $0x2e48] sm:$0xff]  ;;  %v4188_v15 = vpack.c.bf16 %v1483_v9, %v1475_v4  ;;  %v3816_v4 = vpack.c.bf16 %v1529_v58, %v1521_v54 }
 0x165   :  { %v3806_v16 = vpack.c.bf16 %v1498_v12, %v1490_v11  ;;  %v1537_v11 = vld [vmem:[%s9867_s1 + $0x2f80] sm:$0xff]  ;;  %v54_v54 = vld [vmem:[%s9867_s1 + $0x128] sm:$0xff] }
 0x166   :  { %3793 = vmatpush1.bf16.msra.mxu0 %v3792_v27  ;;  %v1499_v27 = vld [vmem:[%s9867_s1 + $0x2e50] sm:$0xff]  ;;  %v1545_v12 = vld [vmem:[%s9867_s1 + $0x2fc0] sm:$0xff]  ;;  %v62_v58 = vld [vmem:[%s9867_s1 + $0x168] sm:$0xff] }
 0x167   :  { %4177 = vmatpush1.bf16.msra.mxu1 %v4176_v28  ;;  %3795 = vmatprep.subr.bf16.mxu0 %v3794_v29  ;;  %v1506_v28 = vld [vmem:[%s9867_s1 + $0x2e88] sm:$0xff] }
 0x168   :  { %4179 = vmatprep.subr.bf16.mxu1 %v4178_v33  ;;  %v1514_v29 = vld [vmem:[%s9867_s1 + $0x2ec8] sm:$0xff]  ;;  %v4192_v33 = vpack.c.bf16 %v1499_v27, %v1491_v20  ;;  %v3820_v20 = vpack.c.bf16 %v1545_v12, %v1537_v11 }
 0x169   :  { %v3810_v34 = vpack.c.bf16 %v1514_v29, %v1506_v28  ;;  %v21_v28 = vld [vmem:[%s9867_s1 + $0x20] sm:$0xff]  ;;  %v70_v11 = vld [vmem:[%s9867_s1 + $0x1a8] sm:$0xff] }
 0x16a   :  { %3797 = vmatpush1.bf16.msra.mxu0 %v3796_v44  ;;  %v1515_v44 = vld [vmem:[%s9867_s1 + $0x2ed0] sm:$0xff]  ;;  %v29_v29 = vld [vmem:[%s9867_s1 + $0x60] sm:$0xff]  ;;  %v78_v12 = vld [vmem:[%s9867_s1 + $0x1e8] sm:$0xff] }
 0x16b   :  { %4181 = vmatpush1.bf16.msra.mxu1 %v4180_v45  ;;  %3799 = vmatprep.subr.bf16.mxu0 %v3798_v47  ;;  %v1522_v45 = vld [vmem:[%s9867_s1 + $0x2f08] sm:$0xff] }
 0x16c   :  { %4183 = vmatprep.subr.bf16.mxu1 %v4182_v39  ;;  %v1530_v47 = vld [vmem:[%s9867_s1 + $0x2f48] sm:$0xff]  ;;  %v4196_v39 = vpack.c.bf16 %v1515_v44, %v1507_v41  ;;  %v40_v41 = vld [vmem:[%s9867_s1 + $0xb8] sm:$0xff]  ;;  %v4208_v44 = vpack.c.bf16 %v29_v29, %v21_v28 }
 0x16d   :  { %v3814_v53 = vpack.c.bf16 %v1530_v47, %v1522_v45  ;;  %v94_v28 = vld [vmem:[%s9867_s1 + $0x268] sm:$0xff]  ;;  %v88_v29 = vld [vmem:[%s9867_s1 + $0x238] sm:$0xff] }
 0x16e   :  { %3801 = vmatpush1.bf16.msra.mxu0 %v3800_v62  ;;  %v1531_v62 = vld [vmem:[%s9867_s1 + $0x2f50] sm:$0xff] }
 0x16f   :  { %4185 = vmatpush1.bf16.msra.mxu1 %v4184_v63  ;;  %3803 = vmatprep.subr.bf16.mxu0 %v3802_v0  ;;  %v1538_v63 = vld [vmem:[%s9867_s1 + $0x2f88] sm:$0xff] }
 0x170   :  { %4187 = vmatprep.subr.bf16.mxu1 %v4186_v5  ;;  %v1546_v0 = vld [vmem:[%s9867_s1 + $0x2fc8] sm:$0xff]  ;;  %v4200_v5 = vpack.c.bf16 %v1531_v62, %v1523_v60  ;;  %v56_v60 = vld [vmem:[%s9867_s1 + $0x138] sm:$0xff]  ;;  %v4212_v62 = vpack.c.bf16 %v45_v50, %v37_v49 }
 0x171   :  { %v3818_v9 = vpack.c.bf16 %v1546_v0, %v1538_v63  ;;  %v4214_v0 = vpack.c.bf16 %v62_v58, %v54_v54  ;;  %v104_v49 = vld [vmem:[%s9867_s1 + $0x2b8] sm:$0xff]  ;;  %v101_v54 = vld [vmem:[%s9867_s1 + $0x2a0] sm:$0xff] }
 0x172   :  { %3805 = vmatpush1.bf16.msra.mxu0 %v3804_v14  ;;  %v1547_v14 = vld [vmem:[%s9867_s1 + $0x2fd0] sm:$0xff]  ;;  %v112_v50 = vld [vmem:[%s9867_s1 + $0x2f8] sm:$0xff]  ;;  %v109_v58 = vld [vmem:[%s9867_s1 + $0x2e0] sm:$0xff] }
 0x173   :  { %4189 = vmatpush1.bf16.msra.mxu1 %v4188_v15  ;;  %3807 = vmatprep.subr.bf16.mxu0 %v3806_v16  ;;  %v22_v15 = vld [vmem:[%s9867_s1 + $0x28] sm:$0xff] }
 0x174   :  { %4191 = vmatprep.subr.bf16.mxu1 %v4190_v21  ;;  %v30_v16 = vld [vmem:[%s9867_s1 + $0x68] sm:$0xff]  ;;  %v4204_v21 = vpack.c.bf16 %v1547_v14, %v1539_v13  ;;  %v72_v13 = vld [vmem:[%s9867_s1 + $0x1b8] sm:$0xff]  ;;  %v4216_v14 = vpack.c.bf16 %v61_v3, %v53_v2 }
 0x175   :  { %v4206_v27 = vpack.c.bf16 %v30_v16, %v22_v15  ;;  %v4218_v16 = vpack.c.bf16 %v78_v12, %v70_v11  ;;  %v120_v2 = vld [vmem:[%s9867_s1 + $0x338] sm:$0xff]  ;;  %v117_v11 = vld [vmem:[%s9867_s1 + $0x320] sm:$0xff] }
 0x176   :  { %3809 = vmatpush1.bf16.msra.mxu0 %v3808_v51  ;;  %v31_v51 = vld [vmem:[%s9867_s1 + $0x70] sm:$0xff]  ;;  %v128_v3 = vld [vmem:[%s9867_s1 + $0x378] sm:$0xff]  ;;  %v125_v12 = vld [vmem:[%s9867_s1 + $0x360] sm:$0xff] }
 0x177   :  { %4193 = vmatpush1.bf16.msra.mxu1 %v4192_v33  ;;  %3811 = vmatprep.subr.bf16.mxu0 %v3810_v34  ;;  %v38_v33 = vld [vmem:[%s9867_s1 + $0xa8] sm:$0xff]  ;;  %v4592_v45 = vpack.c.bf16 %v31_v51, %v23_v30  ;;  %v96_v30 = vld [vmem:[%s9867_s1 + $0x278] sm:$0xff] }
 0x178   :  { %4195 = vmatprep.subr.bf16.mxu1 %v4194_v42  ;;  %v46_v34 = vld [vmem:[%s9867_s1 + $0xe8] sm:$0xff]  ;;  %v48_v42 = vld [vmem:[%s9867_s1 + $0xf8] sm:$0xff] }
 0x179   :  { %v4210_v47 = vpack.c.bf16 %v46_v34, %v38_v33  ;;  %v85_v34 = vld [vmem:[%s9867_s1 + $0x220] sm:$0xff] }
 0x17a   :  { %3813 = vmatpush1.bf16.msra.mxu0 %v3812_v52  ;;  %v39_v52 = vld [vmem:[%s9867_s1 + $0xb0] sm:$0xff] }
 0x17b   :  { %4197 = vmatpush1.bf16.msra.mxu1 %v4196_v39  ;;  %3815 = vmatprep.subr.bf16.mxu0 %v3814_v53  ;;  %v4594_v39 = vpack.c.bf16 %v48_v42, %v40_v41  ;;  %v47_v53 = vld [vmem:[%s9867_s1 + $0xf0] sm:$0xff]  ;;  %v4606_v42 = vpack.c.bf16 %v96_v30, %v88_v29 }
 0x17c   :  { %4199 = vmatprep.subr.bf16.mxu1 %v4198_v61  ;;  %v64_v61 = vld [vmem:[%s9867_s1 + $0x178] sm:$0xff]  ;;  %v4596_v63 = vpack.c.bf16 %v47_v53, %v39_v52  ;;  %v87_v41 = vld [vmem:[%s9867_s1 + $0x230] sm:$0xff]  ;;  %v4224_v52 = vpack.c.bf16 %v93_v35, %v85_v34 }
 0x17d   :  { %v135_v29 = vld [vmem:[%s9867_s1 + $0x3b0] sm:$0xff]  ;;  %v152_v34 = vld [vmem:[%s9867_s1 + $0x438] sm:$0xff] }
 0x17e   :  { %3817 = vmatpush1.bf16.msra.mxu0 %v3816_v4  ;;  %v55_v4 = vld [vmem:[%s9867_s1 + $0x130] sm:$0xff]  ;;  %v160_v35 = vld [vmem:[%s9867_s1 + $0x478] sm:$0xff] }
 0x17f   :  { %4201 = vmatpush1.bf16.msra.mxu1 %v4200_v5  ;;  %3819 = vmatprep.subr.bf16.mxu0 %v3818_v9  ;;  %v4598_v5 = vpack.c.bf16 %v64_v61, %v56_v60  ;;  %v63_v9 = vld [vmem:[%s9867_s1 + $0x170] sm:$0xff]  ;;  %v4610_v61 = vpack.c.bf16 %v112_v50, %v104_v49  ;;  %v4622_v50 = vpack.c.bf16 %v160_v35, %v152_v34 }
 0x180   :  { %4203 = vmatprep.subr.bf16.mxu1 %v4202_v19  ;;  %v80_v19 = vld [vmem:[%s9867_s1 + $0x1f8] sm:$0xff]  ;;  %v4600_v15 = vpack.c.bf16 %v63_v9, %v55_v4  ;;  %v103_v60 = vld [vmem:[%s9867_s1 + $0x2b0] sm:$0xff]  ;;  %v4228_v4 = vpack.c.bf16 %v109_v58, %v101_v54 }
 0x181   :  { %v151_v49 = vld [vmem:[%s9867_s1 + $0x430] sm:$0xff]  ;;  %v168_v54 = vld [vmem:[%s9867_s1 + $0x4b8] sm:$0xff] }
 0x182   :  { %3821 = vmatpush1.bf16.msra.mxu0 %v3820_v20  ;;  %v71_v20 = vld [vmem:[%s9867_s1 + $0x1b0] sm:$0xff]  ;;  %v176_v58 = vld [vmem:[%s9867_s1 + $0x4f8] sm:$0xff] }
 0x183   :  { %4205 = vmatpush1.bf16.msra.mxu1 %v4204_v21  ;;  %4207 = vmatprep.subr.bf16.mxu0 %v4206_v27  ;;  %v79_v21 = vld [vmem:[%s9867_s1 + $0x1f0] sm:$0xff]  ;;  %v86_v27 = vld [vmem:[%s9867_s1 + $0x228] sm:$0xff] }
 0x184   :  { %4591 = vmatprep.subr.bf16.mxu1 %v4590_v32  ;;  %v4220_v32 = vpack.c.bf16 %v77_v18, %v69_v17  ;;  %v4604_v51 = vpack.c.bf16 %v79_v21, %v71_v20  ;;  %v4222_v33 = vpack.c.bf16 %v94_v28, %v86_v27  ;;  %v136_v17 = vld [vmem:[%s9867_s1 + $0x3b8] sm:$0xff]  ;;  %v4232_v20 = vpack.c.bf16 %v125_v12, %v117_v11  ;;  %v133_v27 = vld [vmem:[%s9867_s1 + $0x3a0] sm:$0xff]  ;;  %v199_v34 = vld [vmem:[%s9867_s1 + $0x5b0] sm:$0xff] }
 0x185   :  { %2077 = vmatmul.mubr.f32.vlgmr.msra.gmra.mrb[0].mxu0 %v7515_v36  ;;  %v144_v18 = vld [vmem:[%s9867_s1 + $0x3f8] sm:$0xff]  ;;  %v141_v28 = vld [vmem:[%s9867_s1 + $0x3e0] sm:$0xff] }
 0x186   :  { %2503 = vmatmul.mubr.f32.vlgmr.msra.gmra.mrb[0].mxu1 %v7515_v36  ;;  %4209 = vmatpush1.bf16.msra.mxu0 %v4208_v44  ;;  %v95_v44 = vld [vmem:[%s9867_s1 + $0x270] sm:$0xff]  ;;  %v4618_v30 = vpack.c.bf16 %v144_v18, %v136_v17  ;;  %v184_v11 = vld [vmem:[%s9867_s1 + $0x538] sm:$0xff] }
 0x187   :  { %4593 = vmatpush1.bf16.msra.mxu1 %v4592_v45  ;;  %4211 = vmatprep.subr.bf16.mxu0 %v4210_v47  ;;  %v102_v45 = vld [vmem:[%s9867_s1 + $0x2a8] sm:$0xff]  ;;  %v192_v12 = vld [vmem:[%s9867_s1 + $0x578] sm:$0xff]  ;;  %v183_v17 = vld [vmem:[%s9867_s1 + $0x530] sm:$0xff] }
 0x188   :  { %4595 = vmatprep.subr.bf16.mxu1 %v4594_v39  ;;  %2573 = vmatprep.mubr.f32.mxu0 %v5386_v22  ;;  %v110_v47 = vld [vmem:[%s9867_s1 + $0x2e8] sm:$0xff]  ;;  %v4608_v39 = vpack.c.bf16 %v95_v44, %v87_v41  ;;  %v4236_v41 = vpack.c.bf16 %v141_v28, %v133_v27  ;;  %v4630_v18 = vpack.c.bf16 %v192_v12, %v184_v11  ;;  %v200_v27 = vld [vmem:[%s9867_s1 + $0x5b8] sm:$0xff]  ;;  %v231_v11 = vld [vmem:[%s9867_s1 + $0x6b0] sm:$0xff] }
 0x189   :  { %2999 = vmatprep.mubr.f32.mxu1 %v5386_v22  ;;  %v4602_v22 = vpack.c.bf16 %v80_v19, %v72_v13  ;;  %v4226_v53 = vpack.c.bf16 %v110_v47, %v102_v45  ;;  %v119_v13 = vld [vmem:[%s9867_s1 + $0x330] sm:$0xff]  ;;  %v4614_v19 = vpack.c.bf16 %v128_v3, %v120_v2  ;;  %v149_v45 = vld [vmem:[%s9867_s1 + $0x420] sm:$0xff]  ;;  %v4626_v3 = vpack.c.bf16 %v176_v58, %v168_v54  ;;  %v208_v28 = vld [vmem:[%s9867_s1 + $0x5f8] sm:$0xff] }
 0x18a   :  { %4213 = vmatpush1.bf16.msra.mxu0 %v4212_v62  ;;  %v111_v62 = vld [vmem:[%s9867_s1 + $0x2f0] sm:$0xff]  ;;  %v157_v47 = vld [vmem:[%s9867_s1 + $0x460] sm:$0xff]  ;;  %v4634_v35 = vpack.c.bf16 %v208_v28, %v200_v27 }
 0x18b   :  { %4597 = vmatpush1.bf16.msra.mxu1 %v4596_v63  ;;  %4215 = vmatprep.subr.bf16.mxu0 %v4214_v0  ;;  %v118_v63 = vld [vmem:[%s9867_s1 + $0x328] sm:$0xff]  ;;  %v167_v2 = vld [vmem:[%s9867_s1 + $0x4b0] sm:$0xff] }
 0x18c   :  { %4599 = vmatprep.subr.bf16.mxu1 %v4598_v5  ;;  %v126_v0 = vld [vmem:[%s9867_s1 + $0x368] sm:$0xff]  ;;  %v4612_v5 = vpack.c.bf16 %v111_v62, %v103_v60  ;;  %v4240_v60 = vpack.c.bf16 %v157_v47, %v149_v45  ;;  %v216_v45 = vld [vmem:[%s9867_s1 + $0x638] sm:$0xff]  ;;  %v215_v54 = vld [vmem:[%s9867_s1 + $0x630] sm:$0xff] }
 0x18d   :  { %v4230_v9 = vpack.c.bf16 %v126_v0, %v118_v63  ;;  %v165_v63 = vld [vmem:[%s9867_s1 + $0x4a0] sm:$0xff]  ;;  %v224_v47 = vld [vmem:[%s9867_s1 + $0x678] sm:$0xff]  ;;  %v247_v27 = vld [vmem:[%s9867_s1 + $0x730] sm:$0xff] }
 0x18e   :  { %4217 = vmatpush1.bf16.msra.mxu0 %v4216_v14  ;;  %v127_v14 = vld [vmem:[%s9867_s1 + $0x370] sm:$0xff]  ;;  %v173_v0 = vld [vmem:[%s9867_s1 + $0x4e0] sm:$0xff]  ;;  %v4638_v58 = vpack.c.bf16 %v224_v47, %v216_v45 }
 0x18f   :  { %4601 = vmatpush1.bf16.msra.mxu1 %v4600_v15  ;;  %4219 = vmatprep.subr.bf16.mxu0 %v4218_v16  ;;  %v134_v15 = vld [vmem:[%s9867_s1 + $0x3a8] sm:$0xff]  ;;  %v263_v45 = vld [vmem:[%s9867_s1 + $0x7b0] sm:$0xff] }
 0x190   :  { %4603 = vmatprep.subr.bf16.mxu1 %v4602_v22  ;;  %v142_v16 = vld [vmem:[%s9867_s1 + $0x3e8] sm:$0xff]  ;;  %v4616_v22 = vpack.c.bf16 %v127_v14, %v119_v13  ;;  %v4244_v13 = vpack.c.bf16 %v173_v0, %v165_v63  ;;  %v232_v63 = vld [vmem:[%s9867_s1 + $0x6b8] sm:$0xff] }
 0x191   :  { %v4234_v21 = vpack.c.bf16 %v142_v16, %v134_v15  ;;  %v181_v15 = vld [vmem:[%s9867_s1 + $0x520] sm:$0xff]  ;;  %v240_v0 = vld [vmem:[%s9867_s1 + $0x6f8] sm:$0xff] }
 0x192   :  { %4221 = vmatpush1.bf16.msra.mxu0 %v4220_v32  ;;  %v143_v32 = vld [vmem:[%s9867_s1 + $0x3f0] sm:$0xff]  ;;  %v189_v16 = vld [vmem:[%s9867_s1 + $0x560] sm:$0xff]  ;;  %v4642_v12 = vpack.c.bf16 %v240_v0, %v232_v63 }
 0x193   :  { %4605 = vmatpush1.bf16.msra.mxu1 %v4604_v51  ;;  %4223 = vmatprep.subr.bf16.mxu0 %v4222_v33  ;;  %v150_v51 = vld [vmem:[%s9867_s1 + $0x428] sm:$0xff]  ;;  %v279_v63 = vld [vmem:[%s9867_s1 + $0x830] sm:$0xff] }
 0x194   :  { %4607 = vmatprep.subr.bf16.mxu1 %v4606_v42  ;;  %v158_v33 = vld [vmem:[%s9867_s1 + $0x468] sm:$0xff]  ;;  %v4620_v42 = vpack.c.bf16 %v143_v32, %v135_v29  ;;  %v4248_v29 = vpack.c.bf16 %v189_v16, %v181_v15  ;;  %v248_v15 = vld [vmem:[%s9867_s1 + $0x738] sm:$0xff] }
 0x195   :  { %v4238_v44 = vpack.c.bf16 %v158_v33, %v150_v51  ;;  %v197_v51 = vld [vmem:[%s9867_s1 + $0x5a0] sm:$0xff]  ;;  %v256_v16 = vld [vmem:[%s9867_s1 + $0x778] sm:$0xff] }
 0x196   :  { %4225 = vmatpush1.bf16.msra.mxu0 %v4224_v52  ;;  %v159_v52 = vld [vmem:[%s9867_s1 + $0x470] sm:$0xff]  ;;  %v205_v33 = vld [vmem:[%s9867_s1 + $0x5e0] sm:$0xff]  ;;  %v4646_v28 = vpack.c.bf16 %v256_v16, %v248_v15 }
 0x197   :  { %4609 = vmatpush1.bf16.msra.mxu1 %v4608_v39  ;;  %4227 = vmatprep.subr.bf16.mxu0 %v4226_v53  ;;  %v166_v39 = vld [vmem:[%s9867_s1 + $0x4a8] sm:$0xff]  ;;  %v295_v15 = vld [vmem:[%s9867_s1 + $0x8b0] sm:$0xff] }
 0x198   :  { %4611 = vmatprep.subr.bf16.mxu1 %v4610_v61  ;;  %v174_v53 = vld [vmem:[%s9867_s1 + $0x4e8] sm:$0xff]  ;;  %v4624_v61 = vpack.c.bf16 %v159_v52, %v151_v49  ;;  %v4252_v49 = vpack.c.bf16 %v205_v33, %v197_v51  ;;  %v264_v51 = vld [vmem:[%s9867_s1 + $0x7b8] sm:$0xff] }
 0x199   :  { %v4242_v62 = vpack.c.bf16 %v174_v53, %v166_v39  ;;  %v213_v39 = vld [vmem:[%s9867_s1 + $0x620] sm:$0xff]  ;;  %v272_v33 = vld [vmem:[%s9867_s1 + $0x7f8] sm:$0xff] }
 0x19a   :  { %4229 = vmatpush1.bf16.msra.mxu0 %v4228_v4  ;;  %v175_v4 = vld [vmem:[%s9867_s1 + $0x4f0] sm:$0xff]  ;;  %v221_v53 = vld [vmem:[%s9867_s1 + $0x660] sm:$0xff]  ;;  %v4650_v47 = vpack.c.bf16 %v272_v33, %v264_v51 }
 0x19b   :  { %4613 = vmatpush1.bf16.msra.mxu1 %v4612_v5  ;;  %4231 = vmatprep.subr.bf16.mxu0 %v4230_v9  ;;  %v182_v5 = vld [vmem:[%s9867_s1 + $0x528] sm:$0xff]  ;;  %v311_v51 = vld [vmem:[%s9867_s1 + $0x930] sm:$0xff] }
 0x19c   :  { %4615 = vmatprep.subr.bf16.mxu1 %v4614_v19  ;;  %v190_v9 = vld [vmem:[%s9867_s1 + $0x568] sm:$0xff]  ;;  %v4628_v19 = vpack.c.bf16 %v175_v4, %v167_v2  ;;  %v4256_v2 = vpack.c.bf16 %v221_v53, %v213_v39  ;;  %v280_v39 = vld [vmem:[%s9867_s1 + $0x838] sm:$0xff] }
 0x19d   :  { %v4246_v14 = vpack.c.bf16 %v190_v9, %v182_v5  ;;  %v229_v5 = vld [vmem:[%s9867_s1 + $0x6a0] sm:$0xff]  ;;  %v288_v53 = vld [vmem:[%s9867_s1 + $0x878] sm:$0xff] }
 0x19e   :  { %4233 = vmatpush1.bf16.msra.mxu0 %v4232_v20  ;;  %v191_v20 = vld [vmem:[%s9867_s1 + $0x570] sm:$0xff]  ;;  %v237_v9 = vld [vmem:[%s9867_s1 + $0x6e0] sm:$0xff]  ;;  %v4654_v0 = vpack.c.bf16 %v288_v53, %v280_v39  ;;  %v342_v53 = vld [vmem:[%s9867_s1 + $0xa28] sm:$0xff] }
 0x19f   :  { %4617 = vmatpush1.bf16.msra.mxu1 %v4616_v22  ;;  %4235 = vmatprep.subr.bf16.mxu0 %v4234_v21  ;;  %v198_v22 = vld [vmem:[%s9867_s1 + $0x5a8] sm:$0xff]  ;;  %v335_v39 = vld [vmem:[%s9867_s1 + $0x9f0] sm:$0xff] }
 0x1a0   :  { %4619 = vmatprep.subr.bf16.mxu1 %v4618_v30  ;;  %v206_v21 = vld [vmem:[%s9867_s1 + $0x5e8] sm:$0xff]  ;;  %v4632_v30 = vpack.c.bf16 %v191_v20, %v183_v17  ;;  %v4260_v17 = vpack.c.bf16 %v237_v9, %v229_v5  ;;  %v296_v5 = vld [vmem:[%s9867_s1 + $0x8b8] sm:$0xff] }
 0x1a1   :  { %v4250_v32 = vpack.c.bf16 %v206_v21, %v198_v22  ;;  %v245_v22 = vld [vmem:[%s9867_s1 + $0x720] sm:$0xff]  ;;  %v304_v9 = vld [vmem:[%s9867_s1 + $0x8f8] sm:$0xff] }
 0x1a2   :  { %4237 = vmatpush1.bf16.msra.mxu0 %v4236_v41  ;;  %v207_v41 = vld [vmem:[%s9867_s1 + $0x5f0] sm:$0xff]  ;;  %v253_v21 = vld [vmem:[%s9867_s1 + $0x760] sm:$0xff]  ;;  %v4658_v16 = vpack.c.bf16 %v304_v9, %v296_v5  ;;  %v358_v9 = vld [vmem:[%s9867_s1 + $0xaa8] sm:$0xff] }
 0x1a3   :  { %4621 = vmatpush1.bf16.msra.mxu1 %v4620_v42  ;;  %4239 = vmatprep.subr.bf16.mxu0 %v4238_v44  ;;  %v214_v42 = vld [vmem:[%s9867_s1 + $0x628] sm:$0xff]  ;;  %v351_v5 = vld [vmem:[%s9867_s1 + $0xa70] sm:$0xff] }
 0x1a4   :  { %4623 = vmatprep.subr.bf16.mxu1 %v4622_v50  ;;  %v222_v44 = vld [vmem:[%s9867_s1 + $0x668] sm:$0xff]  ;;  %v4636_v50 = vpack.c.bf16 %v207_v41, %v199_v34  ;;  %v4264_v34 = vpack.c.bf16 %v253_v21, %v245_v22  ;;  %v312_v22 = vld [vmem:[%s9867_s1 + $0x938] sm:$0xff] }
 0x1a5   :  { %v4254_v52 = vpack.c.bf16 %v222_v44, %v214_v42  ;;  %v261_v42 = vld [vmem:[%s9867_s1 + $0x7a0] sm:$0xff]  ;;  %v320_v21 = vld [vmem:[%s9867_s1 + $0x978] sm:$0xff] }
 0x1a6   :  { %4241 = vmatpush1.bf16.msra.mxu0 %v4240_v60  ;;  %v223_v60 = vld [vmem:[%s9867_s1 + $0x670] sm:$0xff]  ;;  %v269_v44 = vld [vmem:[%s9867_s1 + $0x7e0] sm:$0xff]  ;;  %v4662_v33 = vpack.c.bf16 %v320_v21, %v312_v22  ;;  %v374_v21 = vld [vmem:[%s9867_s1 + $0xb28] sm:$0xff] }
 0x1a7   :  { %4625 = vmatpush1.bf16.msra.mxu1 %v4624_v61  ;;  %4243 = vmatprep.subr.bf16.mxu0 %v4242_v62  ;;  %v230_v61 = vld [vmem:[%s9867_s1 + $0x6a8] sm:$0xff]  ;;  %v367_v22 = vld [vmem:[%s9867_s1 + $0xaf0] sm:$0xff] }
 0x1a8   :  { %4627 = vmatprep.subr.bf16.mxu1 %v4626_v3  ;;  %v238_v62 = vld [vmem:[%s9867_s1 + $0x6e8] sm:$0xff]  ;;  %v4640_v3 = vpack.c.bf16 %v223_v60, %v215_v54  ;;  %v4268_v54 = vpack.c.bf16 %v269_v44, %v261_v42  ;;  %v336_v42 = vld [vmem:[%s9867_s1 + $0x9f8] sm:$0xff] }
 0x1a9   :  { %v4258_v4 = vpack.c.bf16 %v238_v62, %v230_v61  ;;  %v277_v61 = vld [vmem:[%s9867_s1 + $0x820] sm:$0xff] }
 0x1aa   :  { %4245 = vmatpush1.bf16.msra.mxu0 %v4244_v13  ;;  %v239_v13 = vld [vmem:[%s9867_s1 + $0x6f0] sm:$0xff]  ;;  %v285_v62 = vld [vmem:[%s9867_s1 + $0x860] sm:$0xff] }
 0x1ab   :  { %4629 = vmatpush1.bf16.msra.mxu1 %v4628_v19  ;;  %4247 = vmatprep.subr.bf16.mxu0 %v4246_v14  ;;  %v246_v19 = vld [vmem:[%s9867_s1 + $0x728] sm:$0xff] }
 0x1ac   :  { %4631 = vmatprep.subr.bf16.mxu1 %v4630_v18  ;;  %v254_v14 = vld [vmem:[%s9867_s1 + $0x768] sm:$0xff]  ;;  %v4644_v18 = vpack.c.bf16 %v239_v13, %v231_v11  ;;  %v4272_v11 = vpack.c.bf16 %v285_v62, %v277_v61 }
 0x1ad   :  { %v4262_v20 = vpack.c.bf16 %v254_v14, %v246_v19  ;;  %v293_v19 = vld [vmem:[%s9867_s1 + $0x8a0] sm:$0xff] }
 0x1ae   :  { %4249 = vmatpush1.bf16.msra.mxu0 %v4248_v29  ;;  %v255_v29 = vld [vmem:[%s9867_s1 + $0x770] sm:$0xff]  ;;  %v301_v14 = vld [vmem:[%s9867_s1 + $0x8e0] sm:$0xff] }
 0x1af   :  { %4633 = vmatpush1.bf16.msra.mxu1 %v4632_v30  ;;  %4251 = vmatprep.subr.bf16.mxu0 %v4250_v32  ;;  %v262_v30 = vld [vmem:[%s9867_s1 + $0x7a8] sm:$0xff] }
 0x1b0   :  { %4635 = vmatprep.subr.bf16.mxu1 %v4634_v35  ;;  %v270_v32 = vld [vmem:[%s9867_s1 + $0x7e8] sm:$0xff]  ;;  %v4648_v35 = vpack.c.bf16 %v255_v29, %v247_v27  ;;  %v4276_v27 = vpack.c.bf16 %v301_v14, %v293_v19 }
 0x1b1   :  { %v4266_v41 = vpack.c.bf16 %v270_v32, %v262_v30  ;;  %v309_v30 = vld [vmem:[%s9867_s1 + $0x920] sm:$0xff] }
 0x1b2   :  { %4253 = vmatpush1.bf16.msra.mxu0 %v4252_v49  ;;  %v271_v49 = vld [vmem:[%s9867_s1 + $0x7f0] sm:$0xff]  ;;  %v317_v32 = vld [vmem:[%s9867_s1 + $0x960] sm:$0xff] }
 0x1b3   :  { %4637 = vmatpush1.bf16.msra.mxu1 %v4636_v50  ;;  %4255 = vmatprep.subr.bf16.mxu0 %v4254_v52  ;;  %v278_v50 = vld [vmem:[%s9867_s1 + $0x828] sm:$0xff]  ;;  %v4280_v44 = vpack.c.bf16 %v317_v32, %v309_v30 }
 0x1b4   :  { %4639 = vmatprep.subr.bf16.mxu1 %v4638_v58  ;;  %v286_v52 = vld [vmem:[%s9867_s1 + $0x868] sm:$0xff]  ;;  %v4652_v58 = vpack.c.bf16 %v271_v49, %v263_v45  ;;  %v325_v49 = vld [vmem:[%s9867_s1 + $0x9a0] sm:$0xff] }
 0x1b5   :  { %v4270_v60 = vpack.c.bf16 %v286_v52, %v278_v50  ;;  %v333_v50 = vld [vmem:[%s9867_s1 + $0x9e0] sm:$0xff]  ;;  %v327_v52 = vld [vmem:[%s9867_s1 + $0x9b0] sm:$0xff] }
 0x1b6   :  { %4257 = vmatpush1.bf16.msra.mxu0 %v4256_v2  ;;  %v287_v2 = vld [vmem:[%s9867_s1 + $0x870] sm:$0xff]  ;;  %v4284_v61 = vpack.c.bf16 %v333_v50, %v325_v49  ;;  %v4668_v62 = vpack.c.bf16 %v335_v39, %v327_v52  ;;  %v397_v39 = vld [vmem:[%s9867_s1 + $0xbe0] sm:$0xff] }
 0x1b7   :  { %4641 = vmatpush1.bf16.msra.mxu1 %v4640_v3  ;;  %4259 = vmatprep.subr.bf16.mxu0 %v4258_v4  ;;  %v294_v3 = vld [vmem:[%s9867_s1 + $0x8a8] sm:$0xff] }
 0x1b8   :  { %4643 = vmatprep.subr.bf16.mxu1 %v4642_v12  ;;  %v302_v4 = vld [vmem:[%s9867_s1 + $0x8e8] sm:$0xff]  ;;  %v4656_v12 = vpack.c.bf16 %v287_v2, %v279_v63  ;;  %v349_v2 = vld [vmem:[%s9867_s1 + $0xa60] sm:$0xff] }
 0x1b9   :  { %v4274_v13 = vpack.c.bf16 %v302_v4, %v294_v3  ;;  %v343_v3 = vld [vmem:[%s9867_s1 + $0xa30] sm:$0xff] }
 0x1ba   :  { %4261 = vmatpush1.bf16.msra.mxu0 %v4260_v17  ;;  %v303_v17 = vld [vmem:[%s9867_s1 + $0x8f0] sm:$0xff]  ;;  %v4672_v14 = vpack.c.bf16 %v351_v5, %v343_v3  ;;  %v413_v5 = vld [vmem:[%s9867_s1 + $0xc60] sm:$0xff] }
 0x1bb   :  { %4645 = vmatpush1.bf16.msra.mxu1 %v4644_v18  ;;  %4263 = vmatprep.subr.bf16.mxu0 %v4262_v20  ;;  %v310_v18 = vld [vmem:[%s9867_s1 + $0x928] sm:$0xff] }
 0x1bc   :  { %4647 = vmatprep.subr.bf16.mxu1 %v4646_v28  ;;  %v318_v20 = vld [vmem:[%s9867_s1 + $0x968] sm:$0xff]  ;;  %v4660_v28 = vpack.c.bf16 %v303_v17, %v295_v15  ;;  %v365_v17 = vld [vmem:[%s9867_s1 + $0xae0] sm:$0xff] }
 0x1bd   :  { %v4278_v29 = vpack.c.bf16 %v318_v20, %v310_v18  ;;  %v359_v18 = vld [vmem:[%s9867_s1 + $0xab0] sm:$0xff] }
 0x1be   :  { %4265 = vmatpush1.bf16.msra.mxu0 %v4264_v34  ;;  %v326_v34 = vld [vmem:[%s9867_s1 + $0x9a8] sm:$0xff]  ;;  %v4676_v32 = vpack.c.bf16 %v367_v22, %v359_v18  ;;  %v429_v22 = vld [vmem:[%s9867_s1 + $0xce0] sm:$0xff] }
 0x1bf   :  { %4649 = vmatpush1.bf16.msra.mxu1 %v4648_v35  ;;  %4267 = vmatprep.subr.bf16.mxu0 %v4266_v41  ;;  %v334_v35 = vld [vmem:[%s9867_s1 + $0x9e8] sm:$0xff]  ;;  %v328_v41 = vld [vmem:[%s9867_s1 + $0x9b8] sm:$0xff] }
 0x1c0   :  { %4651 = vmatprep.subr.bf16.mxu1 %v4650_v47  ;;  %v4282_v47 = vpack.c.bf16 %v334_v35, %v326_v34  ;;  %v375_v34 = vld [vmem:[%s9867_s1 + $0xb30] sm:$0xff] }
 0x1c2   :  { %4269 = vmatpush1.bf16.msra.mxu0 %v4268_v54  ;;  %v350_v54 = vld [vmem:[%s9867_s1 + $0xa68] sm:$0xff] }
 0x1c3   :  { %4653 = vmatpush1.bf16.msra.mxu1 %v4652_v58  ;;  %4271 = vmatprep.subr.bf16.mxu0 %v4270_v60  ;;  %v344_v58 = vld [vmem:[%s9867_s1 + $0xa38] sm:$0xff]  ;;  %v4286_v63 = vpack.c.bf16 %v350_v54, %v342_v53  ;;  %v391_v53 = vld [vmem:[%s9867_s1 + $0xbb0] sm:$0xff] }
 0x1c4   :  { %4655 = vmatprep.subr.bf16.mxu1 %v4654_v0  ;;  %v352_v60 = vld [vmem:[%s9867_s1 + $0xa78] sm:$0xff]  ;;  %v341_v0 = vld [vmem:[%s9867_s1 + $0xa20] sm:$0xff] }
 0x1c5   :  { %2574 = vmatmul.mubr.f32.vlgmr.msra.gmra.mrb[2].mxu0 %v5512_v24  ;;  %v4670_v4 = vpack.c.bf16 %v352_v60, %v344_v58  ;;  %v4288_v19 = vpack.c.bf16 %v349_v2, %v341_v0  ;;  %v399_v58 = vld [vmem:[%s9867_s1 + $0xbf0] sm:$0xff]  ;;  %v406_v60 = vld [vmem:[%s9867_s1 + $0xc28] sm:$0xff] }
 0x1c6   :  { %4273 = vmatpush1.bf16.msra.mxu0 %v4272_v11  ;;  %3000 = vmatmul.mubr.f32.vlgmr.msra.gmra.mrb[2].mxu1 %v5512_v24  ;;  %v319_v24 = vld [vmem:[%s9867_s1 + $0x970] sm:$0xff]  ;;  %v366_v11 = vld [vmem:[%s9867_s1 + $0xae8] sm:$0xff]  ;;  %v4684_v2 = vpack.c.bf16 %v399_v58, %v391_v53  ;;  %v461_v58 = vld [vmem:[%s9867_s1 + $0xde0] sm:$0xff] }
 0x1c7   :  { %4657 = vmatpush1.bf16.msra.mxu1 %v4656_v12  ;;  %4275 = vmatprep.subr.bf16.mxu0 %v4274_v13  ;;  %v4664_v45 = vpack.c.bf16 %v319_v24, %v311_v51  ;;  %v360_v12 = vld [vmem:[%s9867_s1 + $0xab8] sm:$0xff]  ;;  %v4290_v15 = vpack.c.bf16 %v366_v11, %v358_v9  ;;  %v381_v24 = vld [vmem:[%s9867_s1 + $0xb60] sm:$0xff]  ;;  %v407_v9 = vld [vmem:[%s9867_s1 + $0xc30] sm:$0xff] }
 0x1c8   :  { %4659 = vmatprep.subr.bf16.mxu1 %v4658_v16  ;;  %2644 = vmatprep.mubr.f32.mxu0 %v5540_v37  ;;  %v368_v13 = vld [vmem:[%s9867_s1 + $0xaf8] sm:$0xff]  ;;  %v357_v16 = vld [vmem:[%s9867_s1 + $0xaa0] sm:$0xff] }
 0x1c9   :  { %3070 = vmatprep.mubr.f32.mxu1 %v5540_v37  ;;  %v4666_v37 = vpack.c.bf16 %v336_v42, %v328_v41  ;;  %v4674_v20 = vpack.c.bf16 %v368_v13, %v360_v12  ;;  %v4292_v30 = vpack.c.bf16 %v365_v17, %v357_v16  ;;  %v383_v41 = vld [vmem:[%s9867_s1 + $0xb70] sm:$0xff]  ;;  %v390_v42 = vld [vmem:[%s9867_s1 + $0xba8] sm:$0xff] }
 0x1ca   :  { %4277 = vmatpush1.bf16.msra.mxu0 %v4276_v27  ;;  %v382_v27 = vld [vmem:[%s9867_s1 + $0xb68] sm:$0xff]  ;;  %v4680_v50 = vpack.c.bf16 %v383_v41, %v375_v34  ;;  %v415_v12 = vld [vmem:[%s9867_s1 + $0xc70] sm:$0xff]  ;;  %v445_v41 = vld [vmem:[%s9867_s1 + $0xd60] sm:$0xff] }
 0x1cb   :  { %4661 = vmatpush1.bf16.msra.mxu1 %v4660_v28  ;;  %4279 = vmatprep.subr.bf16.mxu0 %v4278_v29  ;;  %v376_v28 = vld [vmem:[%s9867_s1 + $0xb38] sm:$0xff]  ;;  %v4294_v51 = vpack.c.bf16 %v382_v27, %v374_v21  ;;  %v422_v13 = vld [vmem:[%s9867_s1 + $0xca8] sm:$0xff]  ;;  %v4688_v17 = vpack.c.bf16 %v415_v12, %v407_v9  ;;  %v423_v21 = vld [vmem:[%s9867_s1 + $0xcb0] sm:$0xff] }
 0x1cc   :  { %4663 = vmatprep.subr.bf16.mxu1 %v4662_v33  ;;  %v384_v29 = vld [vmem:[%s9867_s1 + $0xb78] sm:$0xff]  ;;  %v373_v33 = vld [vmem:[%s9867_s1 + $0xb20] sm:$0xff] }
 0x1cd   :  { %v4678_v35 = vpack.c.bf16 %v384_v29, %v376_v28  ;;  %v4296_v49 = vpack.c.bf16 %v381_v24, %v373_v33  ;;  %v431_v28 = vld [vmem:[%s9867_s1 + $0xcf0] sm:$0xff]  ;;  %v438_v29 = vld [vmem:[%s9867_s1 + $0xd28] sm:$0xff]  ;;  %v477_v12 = vld [vmem:[%s9867_s1 + $0xe60] sm:$0xff] }
 0x1ce   :  { %4281 = vmatpush1.bf16.msra.mxu0 %v4280_v44  ;;  %v398_v44 = vld [vmem:[%s9867_s1 + $0xbe8] sm:$0xff]  ;;  %v4692_v24 = vpack.c.bf16 %v431_v28, %v423_v21  ;;  %v493_v28 = vld [vmem:[%s9867_s1 + $0xee0] sm:$0xff] }
 0x1cf   :  { %4665 = vmatpush1.bf16.msra.mxu1 %v4664_v45  ;;  %4283 = vmatprep.subr.bf16.mxu0 %v4282_v47  ;;  %v392_v45 = vld [vmem:[%s9867_s1 + $0xbb8] sm:$0xff]  ;;  %v4298_v52 = vpack.c.bf16 %v398_v44, %v390_v42  ;;  %v439_v42 = vld [vmem:[%s9867_s1 + $0xd30] sm:$0xff] }
 0x1d0   :  { %4667 = vmatprep.subr.bf16.mxu1 %v4666_v37  ;;  %v400_v47 = vld [vmem:[%s9867_s1 + $0xbf8] sm:$0xff]  ;;  %v389_v37 = vld [vmem:[%s9867_s1 + $0xba0] sm:$0xff] }
 0x1d1   :  { %v4682_v54 = vpack.c.bf16 %v400_v47, %v392_v45  ;;  %v4300_v0 = vpack.c.bf16 %v397_v39, %v389_v37  ;;  %v447_v45 = vld [vmem:[%s9867_s1 + $0xd70] sm:$0xff]  ;;  %v454_v47 = vld [vmem:[%s9867_s1 + $0xda8] sm:$0xff] }
 0x1d2   :  { %4285 = vmatpush1.bf16.msra.mxu0 %v4284_v61  ;;  %v414_v61 = vld [vmem:[%s9867_s1 + $0xc68] sm:$0xff]  ;;  %v4696_v39 = vpack.c.bf16 %v447_v45, %v439_v42  ;;  %v509_v45 = vld [vmem:[%s9867_s1 + $0xf60] sm:$0xff] }
 0x1d3   :  { %4669 = vmatpush1.bf16.msra.mxu1 %v4668_v62  ;;  %4287 = vmatprep.subr.bf16.mxu0 %v4286_v63  ;;  %v408_v62 = vld [vmem:[%s9867_s1 + $0xc38] sm:$0xff]  ;;  %v4302_v3 = vpack.c.bf16 %v414_v61, %v406_v60  ;;  %v455_v60 = vld [vmem:[%s9867_s1 + $0xdb0] sm:$0xff] }
 0x1d4   :  { %4671 = vmatprep.subr.bf16.mxu1 %v4670_v4  ;;  %v416_v63 = vld [vmem:[%s9867_s1 + $0xc78] sm:$0xff]  ;;  %v405_v4 = vld [vmem:[%s9867_s1 + $0xc20] sm:$0xff] }
 0x1d5   :  { %v4686_v11 = vpack.c.bf16 %v416_v63, %v408_v62  ;;  %v4304_v16 = vpack.c.bf16 %v413_v5, %v405_v4  ;;  %v463_v62 = vld [vmem:[%s9867_s1 + $0xdf0] sm:$0xff]  ;;  %v470_v63 = vld [vmem:[%s9867_s1 + $0xe28] sm:$0xff] }
 0x1d6   :  { %4289 = vmatpush1.bf16.msra.mxu0 %v4288_v19  ;;  %v430_v19 = vld [vmem:[%s9867_s1 + $0xce8] sm:$0xff]  ;;  %v4700_v5 = vpack.c.bf16 %v463_v62, %v455_v60  ;;  %v525_v62 = vld [vmem:[%s9867_s1 + $0xfe0] sm:$0xff] }
 0x1d7   :  { %4673 = vmatpush1.bf16.msra.mxu1 %v4672_v14  ;;  %4291 = vmatprep.subr.bf16.mxu0 %v4290_v15  ;;  %v424_v14 = vld [vmem:[%s9867_s1 + $0xcb8] sm:$0xff]  ;;  %v4306_v18 = vpack.c.bf16 %v430_v19, %v422_v13  ;;  %v471_v13 = vld [vmem:[%s9867_s1 + $0xe30] sm:$0xff] }
 0x1d8   :  { %4675 = vmatprep.subr.bf16.mxu1 %v4674_v20  ;;  %v432_v15 = vld [vmem:[%s9867_s1 + $0xcf8] sm:$0xff]  ;;  %v421_v20 = vld [vmem:[%s9867_s1 + $0xca0] sm:$0xff] }
 0x1d9   :  { %v4690_v27 = vpack.c.bf16 %v432_v15, %v424_v14  ;;  %v4308_v33 = vpack.c.bf16 %v429_v22, %v421_v20  ;;  %v479_v14 = vld [vmem:[%s9867_s1 + $0xe70] sm:$0xff]  ;;  %v486_v15 = vld [vmem:[%s9867_s1 + $0xea8] sm:$0xff] }
 0x1da   :  { %4293 = vmatpush1.bf16.msra.mxu0 %v4292_v30  ;;  %v446_v30 = vld [vmem:[%s9867_s1 + $0xd68] sm:$0xff]  ;;  %v4704_v22 = vpack.c.bf16 %v479_v14, %v471_v13  ;;  %v541_v14 = vld [vmem:[%s9867_s1 + $0x1060] sm:$0xff] }
 0x1db   :  { %4677 = vmatpush1.bf16.msra.mxu1 %v4676_v32  ;;  %4295 = vmatprep.subr.bf16.mxu0 %v4294_v51  ;;  %v440_v32 = vld [vmem:[%s9867_s1 + $0xd38] sm:$0xff]  ;;  %v4310_v34 = vpack.c.bf16 %v446_v30, %v438_v29  ;;  %v487_v29 = vld [vmem:[%s9867_s1 + $0xeb0] sm:$0xff] }
 0x1dc   :  { %4679 = vmatprep.subr.bf16.mxu1 %v4678_v35  ;;  %v448_v51 = vld [vmem:[%s9867_s1 + $0xd78] sm:$0xff]  ;;  %v437_v35 = vld [vmem:[%s9867_s1 + $0xd20] sm:$0xff] }
 0x1dd   :  { %v4694_v44 = vpack.c.bf16 %v448_v51, %v440_v32  ;;  %v4312_v37 = vpack.c.bf16 %v445_v41, %v437_v35  ;;  %v495_v32 = vld [vmem:[%s9867_s1 + $0xef0] sm:$0xff]  ;;  %v502_v51 = vld [vmem:[%s9867_s1 + $0xf28] sm:$0xff] }
 0x1de   :  { %4297 = vmatpush1.bf16.msra.mxu0 %v4296_v49  ;;  %v462_v49 = vld [vmem:[%s9867_s1 + $0xde8] sm:$0xff]  ;;  %v4708_v41 = vpack.c.bf16 %v495_v32, %v487_v29  ;;  %v557_v32 = vld [vmem:[%s9867_s1 + $0x10e0] sm:$0xff] }
 0x1df   :  { %4681 = vmatpush1.bf16.msra.mxu1 %v4680_v50  ;;  %4299 = vmatprep.subr.bf16.mxu0 %v4298_v52  ;;  %v456_v50 = vld [vmem:[%s9867_s1 + $0xdb8] sm:$0xff]  ;;  %v4314_v53 = vpack.c.bf16 %v462_v49, %v454_v47  ;;  %v503_v47 = vld [vmem:[%s9867_s1 + $0xf30] sm:$0xff] }
 0x1e0   :  { %4683 = vmatprep.subr.bf16.mxu1 %v4682_v54  ;;  %v464_v52 = vld [vmem:[%s9867_s1 + $0xdf8] sm:$0xff]  ;;  %v453_v54 = vld [vmem:[%s9867_s1 + $0xda0] sm:$0xff] }
 0x1e1   :  { %v4698_v61 = vpack.c.bf16 %v464_v52, %v456_v50  ;;  %v4316_v4 = vpack.c.bf16 %v461_v58, %v453_v54  ;;  %v511_v50 = vld [vmem:[%s9867_s1 + $0xf70] sm:$0xff]  ;;  %v518_v52 = vld [vmem:[%s9867_s1 + $0xfa8] sm:$0xff] }
 0x1e2   :  { %4301 = vmatpush1.bf16.msra.mxu0 %v4300_v0  ;;  %v478_v0 = vld [vmem:[%s9867_s1 + $0xe68] sm:$0xff]  ;;  %v4712_v58 = vpack.c.bf16 %v511_v50, %v503_v47  ;;  %v573_v50 = vld [vmem:[%s9867_s1 + $0x1160] sm:$0xff] }
 0x1e3   :  { %4685 = vmatpush1.bf16.msra.mxu1 %v4684_v2  ;;  %4303 = vmatprep.subr.bf16.mxu0 %v4302_v3  ;;  %v472_v2 = vld [vmem:[%s9867_s1 + $0xe38] sm:$0xff]  ;;  %v4318_v9 = vpack.c.bf16 %v478_v0, %v470_v63  ;;  %v519_v63 = vld [vmem:[%s9867_s1 + $0xfb0] sm:$0xff] }
 0x1e4   :  { %4687 = vmatprep.subr.bf16.mxu1 %v4686_v11  ;;  %v480_v3 = vld [vmem:[%s9867_s1 + $0xe78] sm:$0xff]  ;;  %v469_v11 = vld [vmem:[%s9867_s1 + $0xe20] sm:$0xff] }
 0x1e5   :  { %v4702_v19 = vpack.c.bf16 %v480_v3, %v472_v2  ;;  %v4320_v20 = vpack.c.bf16 %v477_v12, %v469_v11  ;;  %v527_v2 = vld [vmem:[%s9867_s1 + $0xff0] sm:$0xff]  ;;  %v534_v3 = vld [vmem:[%s9867_s1 + $0x1028] sm:$0xff] }
 0x1e6   :  { %4305 = vmatpush1.bf16.msra.mxu0 %v4304_v16  ;;  %v494_v16 = vld [vmem:[%s9867_s1 + $0xee8] sm:$0xff]  ;;  %v4716_v12 = vpack.c.bf16 %v527_v2, %v519_v63  ;;  %v581_v63 = vld [vmem:[%s9867_s1 + $0x11a0] sm:$0xff]  ;;  %v583_v2 = vld [vmem:[%s9867_s1 + $0x11b0] sm:$0xff] }
 0x1e7   :  { %4689 = vmatpush1.bf16.msra.mxu1 %v4688_v17  ;;  %4307 = vmatprep.subr.bf16.mxu0 %v4306_v18  ;;  %v488_v17 = vld [vmem:[%s9867_s1 + $0xeb8] sm:$0xff]  ;;  %v4322_v21 = vpack.c.bf16 %v494_v16, %v486_v15  ;;  %v535_v15 = vld [vmem:[%s9867_s1 + $0x1030] sm:$0xff] }
 0x1e8   :  { %4691 = vmatprep.subr.bf16.mxu1 %v4690_v27  ;;  %v496_v18 = vld [vmem:[%s9867_s1 + $0xef8] sm:$0xff]  ;;  %v485_v27 = vld [vmem:[%s9867_s1 + $0xea0] sm:$0xff] }
 0x1e9   :  { %v4706_v30 = vpack.c.bf16 %v496_v18, %v488_v17  ;;  %v4324_v35 = vpack.c.bf16 %v493_v28, %v485_v27  ;;  %v543_v17 = vld [vmem:[%s9867_s1 + $0x1070] sm:$0xff]  ;;  %v550_v18 = vld [vmem:[%s9867_s1 + $0x10a8] sm:$0xff] }
 0x1ea   :  { %4309 = vmatpush1.bf16.msra.mxu0 %v4308_v33  ;;  %v510_v33 = vld [vmem:[%s9867_s1 + $0xf68] sm:$0xff]  ;;  %v4720_v28 = vpack.c.bf16 %v543_v17, %v535_v15  ;;  %v605_v15 = vld [vmem:[%s9867_s1 + $0x1260] sm:$0xff] }
 0x1eb   :  { %4693 = vmatpush1.bf16.msra.mxu1 %v4692_v24  ;;  %4311 = vmatprep.subr.bf16.mxu0 %v4310_v34  ;;  %v504_v24 = vld [vmem:[%s9867_s1 + $0xf38] sm:$0xff]  ;;  %v4326_v42 = vpack.c.bf16 %v510_v33, %v502_v51  ;;  %v551_v51 = vld [vmem:[%s9867_s1 + $0x10b0] sm:$0xff] }
 0x1ec   :  { %4695 = vmatprep.subr.bf16.mxu1 %v4694_v44  ;;  %v512_v34 = vld [vmem:[%s9867_s1 + $0xf78] sm:$0xff]  ;;  %v501_v44 = vld [vmem:[%s9867_s1 + $0xf20] sm:$0xff] }
 0x1ed   :  { %v4710_v49 = vpack.c.bf16 %v512_v34, %v504_v24  ;;  %v4328_v54 = vpack.c.bf16 %v509_v45, %v501_v44  ;;  %v559_v24 = vld [vmem:[%s9867_s1 + $0x10f0] sm:$0xff]  ;;  %v566_v34 = vld [vmem:[%s9867_s1 + $0x1128] sm:$0xff] }
 0x1ee   :  { %4313 = vmatpush1.bf16.msra.mxu0 %v4312_v37  ;;  %v526_v37 = vld [vmem:[%s9867_s1 + $0xfe8] sm:$0xff]  ;;  %v4724_v45 = vpack.c.bf16 %v559_v24, %v551_v51  ;;  %v621_v51 = vld [vmem:[%s9867_s1 + $0x12e0] sm:$0xff] }
 0x1ef   :  { %4697 = vmatpush1.bf16.msra.mxu1 %v4696_v39  ;;  %4315 = vmatprep.subr.bf16.mxu0 %v4314_v53  ;;  %v520_v39 = vld [vmem:[%s9867_s1 + $0xfb8] sm:$0xff]  ;;  %v4330_v60 = vpack.c.bf16 %v526_v37, %v518_v52  ;;  %v567_v52 = vld [vmem:[%s9867_s1 + $0x1130] sm:$0xff] }
 0x1f0   :  { %4699 = vmatprep.subr.bf16.mxu1 %v4698_v61  ;;  %v528_v53 = vld [vmem:[%s9867_s1 + $0xff8] sm:$0xff]  ;;  %v517_v61 = vld [vmem:[%s9867_s1 + $0xfa0] sm:$0xff] }
 0x1f1   :  { %v4714_v0 = vpack.c.bf16 %v528_v53, %v520_v39  ;;  %v4332_v11 = vpack.c.bf16 %v525_v62, %v517_v61  ;;  %v582_v39 = vld [vmem:[%s9867_s1 + $0x11a8] sm:$0xff] }
 0x1f2   :  { %4317 = vmatpush1.bf16.msra.mxu0 %v4316_v4  ;;  %v542_v4 = vld [vmem:[%s9867_s1 + $0x1068] sm:$0xff] }
 0x1f3   :  { %4701 = vmatpush1.bf16.msra.mxu1 %v4700_v5  ;;  %4319 = vmatprep.subr.bf16.mxu0 %v4318_v9  ;;  %v536_v5 = vld [vmem:[%s9867_s1 + $0x1038] sm:$0xff]  ;;  %v4334_v13 = vpack.c.bf16 %v542_v4, %v534_v3  ;;  %v590_v53 = vld [vmem:[%s9867_s1 + $0x11e8] sm:$0xff]  ;;  %v591_v3 = vld [vmem:[%s9867_s1 + $0x11f0] sm:$0xff] }
 0x1f4   :  { %4703 = vmatprep.subr.bf16.mxu1 %v4702_v19  ;;  %v544_v9 = vld [vmem:[%s9867_s1 + $0x1078] sm:$0xff]  ;;  %v533_v19 = vld [vmem:[%s9867_s1 + $0x1020] sm:$0xff]  ;;  %v4346_v62 = vpack.c.bf16 %v590_v53, %v582_v39  ;;  %v598_v4 = vld [vmem:[%s9867_s1 + $0x1228] sm:$0xff] }
 0x1f5   :  { %v4718_v16 = vpack.c.bf16 %v544_v9, %v536_v5  ;;  %v4336_v27 = vpack.c.bf16 %v541_v14, %v533_v19  ;;  %v606_v5 = vld [vmem:[%s9867_s1 + $0x1268] sm:$0xff]  ;;  %v600_v9 = vld [vmem:[%s9867_s1 + $0x1238] sm:$0xff]  ;;  %v597_v14 = vld [vmem:[%s9867_s1 + $0x1220] sm:$0xff] }
 0x1f6   :  { %4321 = vmatpush1.bf16.msra.mxu0 %v4320_v20  ;;  %v558_v20 = vld [vmem:[%s9867_s1 + $0x10e8] sm:$0xff]  ;;  %v4350_v19 = vpack.c.bf16 %v606_v5, %v598_v4  ;;  %v639_v39 = vld [vmem:[%s9867_s1 + $0x1370] sm:$0xff] }
 0x1f7   :  { %4705 = vmatpush1.bf16.msra.mxu1 %v4704_v22  ;;  %4323 = vmatprep.subr.bf16.mxu0 %v4322_v21  ;;  %v552_v22 = vld [vmem:[%s9867_s1 + $0x10b8] sm:$0xff]  ;;  %v4338_v29 = vpack.c.bf16 %v558_v20, %v550_v18  ;;  %v607_v18 = vld [vmem:[%s9867_s1 + $0x1270] sm:$0xff]  ;;  %v614_v20 = vld [vmem:[%s9867_s1 + $0x12a8] sm:$0xff] }
 0x1f8   :  { %4707 = vmatprep.subr.bf16.mxu1 %v4706_v30  ;;  %v560_v21 = vld [vmem:[%s9867_s1 + $0x10f8] sm:$0xff]  ;;  %v549_v30 = vld [vmem:[%s9867_s1 + $0x10a0] sm:$0xff]  ;;  %v646_v53 = vld [vmem:[%s9867_s1 + $0x13a8] sm:$0xff] }
 0x1f9   :  { %v4722_v33 = vpack.c.bf16 %v560_v21, %v552_v22  ;;  %v4340_v44 = vpack.c.bf16 %v557_v32, %v549_v30  ;;  %v622_v22 = vld [vmem:[%s9867_s1 + $0x12e8] sm:$0xff]  ;;  %v616_v21 = vld [vmem:[%s9867_s1 + $0x12b8] sm:$0xff]  ;;  %v613_v32 = vld [vmem:[%s9867_s1 + $0x12a0] sm:$0xff] }
 0x1fa   :  { %4325 = vmatpush1.bf16.msra.mxu0 %v4324_v35  ;;  %v574_v35 = vld [vmem:[%s9867_s1 + $0x1168] sm:$0xff]  ;;  %v4354_v30 = vpack.c.bf16 %v622_v22, %v614_v20  ;;  %v655_v4 = vld [vmem:[%s9867_s1 + $0x13f0] sm:$0xff] }
 0x1fb   :  { %4709 = vmatpush1.bf16.msra.mxu1 %v4708_v41  ;;  %4327 = vmatprep.subr.bf16.mxu0 %v4326_v42  ;;  %v568_v41 = vld [vmem:[%s9867_s1 + $0x1138] sm:$0xff]  ;;  %v4342_v47 = vpack.c.bf16 %v574_v35, %v566_v34  ;;  %v623_v34 = vld [vmem:[%s9867_s1 + $0x12f0] sm:$0xff]  ;;  %v630_v35 = vld [vmem:[%s9867_s1 + $0x1328] sm:$0xff] }
 0x1fc   :  { %4711 = vmatprep.subr.bf16.mxu1 %v4710_v49  ;;  %v576_v42 = vld [vmem:[%s9867_s1 + $0x1178] sm:$0xff]  ;;  %v565_v49 = vld [vmem:[%s9867_s1 + $0x1120] sm:$0xff]  ;;  %v662_v5 = vld [vmem:[%s9867_s1 + $0x1428] sm:$0xff] }
 0x1fd   :  { %v4726_v37 = vpack.c.bf16 %v576_v42, %v568_v41  ;;  %v638_v41 = vld [vmem:[%s9867_s1 + $0x1368] sm:$0xff]  ;;  %v632_v42 = vld [vmem:[%s9867_s1 + $0x1338] sm:$0xff]  ;;  %v671_v20 = vld [vmem:[%s9867_s1 + $0x1470] sm:$0xff] }
 0x1fe   :  { %4329 = vmatpush1.bf16.msra.mxu0 %v4328_v54  ;;  %v584_v54 = vld [vmem:[%s9867_s1 + $0x11b8] sm:$0xff]  ;;  %v678_v22 = vld [vmem:[%s9867_s1 + $0x14a8] sm:$0xff] }
 0x1ff   :  { %4713 = vmatpush1.bf16.msra.mxu1 %v4712_v58  ;;  %4331 = vmatprep.subr.bf16.mxu0 %v4330_v60  ;;  %v592_v58 = vld [vmem:[%s9867_s1 + $0x11f8] sm:$0xff]  ;;  %v4344_v60 = vpack.c.bf16 %v573_v50, %v565_v49  ;;  %v4358_v49 = vpack.c.bf16 %v638_v41, %v630_v35  ;;  %v629_v50 = vld [vmem:[%s9867_s1 + $0x1320] sm:$0xff]  ;;  %v687_v35 = vld [vmem:[%s9867_s1 + $0x14f0] sm:$0xff] }
 0x200   :  { %4715 = vmatprep.subr.bf16.mxu1 %v4714_v0  ;;  %v589_v0 = vld [vmem:[%s9867_s1 + $0x11e0] sm:$0xff]  ;;  %v694_v41 = vld [vmem:[%s9867_s1 + $0x1528] sm:$0xff] }
 0x202   :  { %4333 = vmatpush1.bf16.msra.mxu0 %v4332_v11  ;;  %v608_v11 = vld [vmem:[%s9867_s1 + $0x1278] sm:$0xff] }
 0x203   :  { %4717 = vmatpush1.bf16.msra.mxu1 %v4716_v12  ;;  %4335 = vmatprep.subr.bf16.mxu0 %v4334_v13  ;;  %v4348_v12 = vpack.c.bf16 %v589_v0, %v581_v63  ;;  %v4732_v13 = vpack.c.bf16 %v591_v3, %v583_v2  ;;  %v4734_v17 = vpack.c.bf16 %v608_v11, %v600_v9  ;;  %v645_v0 = vld [vmem:[%s9867_s1 + $0x13a0] sm:$0xff]  ;;  %v670_v9 = vld [vmem:[%s9867_s1 + $0x1468] sm:$0xff]  ;;  %v664_v11 = vld [vmem:[%s9867_s1 + $0x1438] sm:$0xff] }
 0x204   :  { %4719 = vmatprep.subr.bf16.mxu1 %v4718_v16  ;;  %v599_v16 = vld [vmem:[%s9867_s1 + $0x1230] sm:$0xff]  ;;  %v653_v2 = vld [vmem:[%s9867_s1 + $0x13e0] sm:$0xff] }
 0x205   :  { %2645 = vmatmul.mubr.f32.vlgmr.msra.gmra.mrb[2].mxu0 %v5912_v56 }
 0x206   :  { %4337 = vmatpush1.bf16.msra.mxu0 %v4336_v27  ;;  %3071 = vmatmul.mubr.f32.vlgmr.msra.gmra.mrb[2].mxu1 %v5912_v56  ;;  %v575_v56 = vld [vmem:[%s9867_s1 + $0x1170] sm:$0xff]  ;;  %v624_v27 = vld [vmem:[%s9867_s1 + $0x12f8] sm:$0xff] }
 0x207   :  { %4721 = vmatpush1.bf16.msra.mxu1 %v4720_v28  ;;  %4339 = vmatprep.subr.bf16.mxu0 %v4338_v29  ;;  %v4728_v61 = vpack.c.bf16 %v575_v56, %v567_v52  ;;  %v4352_v28 = vpack.c.bf16 %v605_v15, %v597_v14  ;;  %v4736_v29 = vpack.c.bf16 %v607_v18, %v599_v16  ;;  %v637_v52 = vld [vmem:[%s9867_s1 + $0x1360] sm:$0xff] }
 0x208   :  { %4723 = vmatprep.subr.bf16.mxu1 %v4722_v33  ;;  %2715 = vmatprep.mubr.f32.mxu0 %v5941_v6  ;;  %v615_v33 = vld [vmem:[%s9867_s1 + $0x12b0] sm:$0xff]  ;;  %v4738_v24 = vpack.c.bf16 %v624_v27, %v616_v21  ;;  %v4366_v14 = vpack.c.bf16 %v670_v9, %v662_v5  ;;  %v661_v15 = vld [vmem:[%s9867_s1 + $0x1420] sm:$0xff]  ;;  %v686_v21 = vld [vmem:[%s9867_s1 + $0x14e8] sm:$0xff] }
 0x209   :  { %3141 = vmatprep.mubr.f32.mxu1 %v5941_v6  ;;  %v4730_v6 = vpack.c.bf16 %v592_v58, %v584_v54  ;;  %v654_v54 = vld [vmem:[%s9867_s1 + $0x13e8] sm:$0xff]  ;;  %v648_v58 = vld [vmem:[%s9867_s1 + $0x13b8] sm:$0xff]  ;;  %v669_v16 = vld [vmem:[%s9867_s1 + $0x1460] sm:$0xff] }
 0x20a   :  { %4341 = vmatpush1.bf16.msra.mxu0 %v4340_v44  ;;  %v640_v44 = vld [vmem:[%s9867_s1 + $0x1378] sm:$0xff]  ;;  %v4362_v63 = vpack.c.bf16 %v654_v54, %v646_v53  ;;  %v703_v53 = vld [vmem:[%s9867_s1 + $0x1570] sm:$0xff]  ;;  %v710_v54 = vld [vmem:[%s9867_s1 + $0x15a8] sm:$0xff] }
 0x20b   :  { %4725 = vmatpush1.bf16.msra.mxu1 %v4724_v45  ;;  %4343 = vmatprep.subr.bf16.mxu0 %v4342_v47  ;;  %v4356_v45 = vpack.c.bf16 %v621_v51, %v613_v32  ;;  %v4740_v47 = vpack.c.bf16 %v623_v34, %v615_v33  ;;  %v4742_v56 = vpack.c.bf16 %v640_v44, %v632_v42  ;;  %v680_v27 = vld [vmem:[%s9867_s1 + $0x14b8] sm:$0xff]  ;;  %v677_v51 = vld [vmem:[%s9867_s1 + $0x14a0] sm:$0xff]  ;;  %v702_v42 = vld [vmem:[%s9867_s1 + $0x1568] sm:$0xff] }
 0x20c   :  { %4727 = vmatprep.subr.bf16.mxu1 %v4726_v37  ;;  %v631_v37 = vld [vmem:[%s9867_s1 + $0x1330] sm:$0xff]  ;;  %v4370_v32 = vpack.c.bf16 %v686_v21, %v678_v22  ;;  %v685_v33 = vld [vmem:[%s9867_s1 + $0x14e0] sm:$0xff]  ;;  %v696_v44 = vld [vmem:[%s9867_s1 + $0x1538] sm:$0xff] }
 0x20d   :  { %v719_v5 = vld [vmem:[%s9867_s1 + $0x15f0] sm:$0xff]  ;;  %v726_v9 = vld [vmem:[%s9867_s1 + $0x1628] sm:$0xff] }
 0x20e   :  { %4345 = vmatpush1.bf16.msra.mxu0 %v4344_v60  ;;  %v656_v60 = vld [vmem:[%s9867_s1 + $0x13f8] sm:$0xff]  ;;  %v735_v22 = vld [vmem:[%s9867_s1 + $0x1670] sm:$0xff]  ;;  %v742_v21 = vld [vmem:[%s9867_s1 + $0x16a8] sm:$0xff] }
 0x20f   :  { %4729 = vmatpush1.bf16.msra.mxu1 %v4728_v61  ;;  %4347 = vmatprep.subr.bf16.mxu0 %v4346_v62  ;;  %v4360_v61 = vpack.c.bf16 %v637_v52, %v629_v50  ;;  %v4744_v62 = vpack.c.bf16 %v639_v39, %v631_v37  ;;  %v4746_v3 = vpack.c.bf16 %v656_v60, %v648_v58  ;;  %v693_v52 = vld [vmem:[%s9867_s1 + $0x1520] sm:$0xff]  ;;  %v718_v58 = vld [vmem:[%s9867_s1 + $0x15e8] sm:$0xff]  ;;  %v712_v60 = vld [vmem:[%s9867_s1 + $0x15b8] sm:$0xff] }
 0x210   :  { %4731 = vmatprep.subr.bf16.mxu1 %v4730_v6  ;;  %v647_v6 = vld [vmem:[%s9867_s1 + $0x13b0] sm:$0xff]  ;;  %v4374_v50 = vpack.c.bf16 %v702_v42, %v694_v41  ;;  %v701_v37 = vld [vmem:[%s9867_s1 + $0x1560] sm:$0xff]  ;;  %v758_v42 = vld [vmem:[%s9867_s1 + $0x1728] sm:$0xff] }
 0x211   :  { %v751_v41 = vld [vmem:[%s9867_s1 + $0x16f0] sm:$0xff] }
 0x212   :  { %4349 = vmatpush1.bf16.msra.mxu0 %v4348_v12  ;;  %v672_v12 = vld [vmem:[%s9867_s1 + $0x1478] sm:$0xff] }
 0x213   :  { %4733 = vmatpush1.bf16.msra.mxu1 %v4732_v13  ;;  %4351 = vmatprep.subr.bf16.mxu0 %v4350_v19  ;;  %v4364_v13 = vpack.c.bf16 %v653_v2, %v645_v0  ;;  %v4748_v19 = vpack.c.bf16 %v655_v4, %v647_v6  ;;  %v4750_v18 = vpack.c.bf16 %v672_v12, %v664_v11  ;;  %v709_v2 = vld [vmem:[%s9867_s1 + $0x15a0] sm:$0xff]  ;;  %v734_v11 = vld [vmem:[%s9867_s1 + $0x1668] sm:$0xff]  ;;  %v728_v12 = vld [vmem:[%s9867_s1 + $0x1638] sm:$0xff] }
 0x214   :  { %4735 = vmatprep.subr.bf16.mxu1 %v4734_v17  ;;  %v663_v17 = vld [vmem:[%s9867_s1 + $0x1430] sm:$0xff]  ;;  %v4378_v0 = vpack.c.bf16 %v718_v58, %v710_v54  ;;  %v717_v6 = vld [vmem:[%s9867_s1 + $0x15e0] sm:$0xff]  ;;  %v774_v58 = vld [vmem:[%s9867_s1 + $0x17a8] sm:$0xff] }
 0x215   :  { %v767_v54 = vld [vmem:[%s9867_s1 + $0x1770] sm:$0xff] }
 0x216   :  { %4353 = vmatpush1.bf16.msra.mxu0 %v4352_v28  ;;  %v688_v28 = vld [vmem:[%s9867_s1 + $0x14f8] sm:$0xff] }
 0x217   :  { %4737 = vmatpush1.bf16.msra.mxu1 %v4736_v29  ;;  %4355 = vmatprep.subr.bf16.mxu0 %v4354_v30  ;;  %v4368_v29 = vpack.c.bf16 %v669_v16, %v661_v15  ;;  %v4752_v30 = vpack.c.bf16 %v671_v20, %v663_v17  ;;  %v4754_v34 = vpack.c.bf16 %v688_v28, %v680_v27  ;;  %v725_v16 = vld [vmem:[%s9867_s1 + $0x1620] sm:$0xff]  ;;  %v750_v27 = vld [vmem:[%s9867_s1 + $0x16e8] sm:$0xff]  ;;  %v744_v28 = vld [vmem:[%s9867_s1 + $0x16b8] sm:$0xff] }
 0x218   :  { %4739 = vmatprep.subr.bf16.mxu1 %v4738_v24  ;;  %v679_v24 = vld [vmem:[%s9867_s1 + $0x14b0] sm:$0xff]  ;;  %v4382_v15 = vpack.c.bf16 %v734_v11, %v726_v9  ;;  %v733_v17 = vld [vmem:[%s9867_s1 + $0x1660] sm:$0xff]  ;;  %v790_v11 = vld [vmem:[%s9867_s1 + $0x1828] sm:$0xff] }
 0x219   :  { %v783_v9 = vld [vmem:[%s9867_s1 + $0x17f0] sm:$0xff] }
 0x21a   :  { %4357 = vmatpush1.bf16.msra.mxu0 %v4356_v45  ;;  %v704_v45 = vld [vmem:[%s9867_s1 + $0x1578] sm:$0xff] }
 0x21b   :  { %4741 = vmatpush1.bf16.msra.mxu1 %v4740_v47  ;;  %4359 = vmatprep.subr.bf16.mxu0 %v4358_v49  ;;  %v4372_v47 = vpack.c.bf16 %v685_v33, %v677_v51  ;;  %v4756_v49 = vpack.c.bf16 %v687_v35, %v679_v24  ;;  %v4758_v39 = vpack.c.bf16 %v704_v45, %v696_v44  ;;  %v741_v33 = vld [vmem:[%s9867_s1 + $0x16a0] sm:$0xff]  ;;  %v766_v44 = vld [vmem:[%s9867_s1 + $0x1768] sm:$0xff]  ;;  %v760_v45 = vld [vmem:[%s9867_s1 + $0x1738] sm:$0xff] }
 0x21c   :  { %4743 = vmatprep.subr.bf16.mxu1 %v4742_v56  ;;  %v695_v56 = vld [vmem:[%s9867_s1 + $0x1530] sm:$0xff]  ;;  %v4386_v51 = vpack.c.bf16 %v750_v27, %v742_v21  ;;  %v749_v24 = vld [vmem:[%s9867_s1 + $0x16e0] sm:$0xff]  ;;  %v806_v27 = vld [vmem:[%s9867_s1 + $0x18a8] sm:$0xff] }
 0x21d   :  { %v799_v21 = vld [vmem:[%s9867_s1 + $0x1870] sm:$0xff] }
 0x21e   :  { %4361 = vmatpush1.bf16.msra.mxu0 %v4360_v61  ;;  %v720_v61 = vld [vmem:[%s9867_s1 + $0x15f8] sm:$0xff] }
 0x21f   :  { %4745 = vmatpush1.bf16.msra.mxu1 %v4744_v62  ;;  %4363 = vmatprep.subr.bf16.mxu0 %v4362_v63  ;;  %v4376_v62 = vpack.c.bf16 %v701_v37, %v693_v52  ;;  %v4760_v63 = vpack.c.bf16 %v703_v53, %v695_v56  ;;  %v4762_v4 = vpack.c.bf16 %v720_v61, %v712_v60  ;;  %v757_v37 = vld [vmem:[%s9867_s1 + $0x1720] sm:$0xff]  ;;  %v782_v60 = vld [vmem:[%s9867_s1 + $0x17e8] sm:$0xff]  ;;  %v776_v61 = vld [vmem:[%s9867_s1 + $0x17b8] sm:$0xff] }
 0x220   :  { %4747 = vmatprep.subr.bf16.mxu1 %v4746_v3  ;;  %v711_v3 = vld [vmem:[%s9867_s1 + $0x15b0] sm:$0xff]  ;;  %v4390_v52 = vpack.c.bf16 %v766_v44, %v758_v42  ;;  %v765_v56 = vld [vmem:[%s9867_s1 + $0x1760] sm:$0xff]  ;;  %v822_v44 = vld [vmem:[%s9867_s1 + $0x1928] sm:$0xff] }
 0x221   :  { %v815_v42 = vld [vmem:[%s9867_s1 + $0x18f0] sm:$0xff] }
 0x222   :  { %4365 = vmatpush1.bf16.msra.mxu0 %v4364_v13  ;;  %v736_v13 = vld [vmem:[%s9867_s1 + $0x1678] sm:$0xff] }
 0x223   :  { %4749 = vmatpush1.bf16.msra.mxu1 %v4748_v19  ;;  %4367 = vmatprep.subr.bf16.mxu0 %v4366_v14  ;;  %v4380_v19 = vpack.c.bf16 %v717_v6, %v709_v2  ;;  %v4764_v14 = vpack.c.bf16 %v719_v5, %v711_v3  ;;  %v4766_v20 = vpack.c.bf16 %v736_v13, %v728_v12  ;;  %v773_v6 = vld [vmem:[%s9867_s1 + $0x17a0] sm:$0xff]  ;;  %v798_v12 = vld [vmem:[%s9867_s1 + $0x1868] sm:$0xff]  ;;  %v792_v13 = vld [vmem:[%s9867_s1 + $0x1838] sm:$0xff] }
 0x224   :  { %4751 = vmatprep.subr.bf16.mxu1 %v4750_v18  ;;  %v727_v18 = vld [vmem:[%s9867_s1 + $0x1630] sm:$0xff]  ;;  %v4394_v2 = vpack.c.bf16 %v782_v60, %v774_v58  ;;  %v781_v3 = vld [vmem:[%s9867_s1 + $0x17e0] sm:$0xff]  ;;  %v838_v58 = vld [vmem:[%s9867_s1 + $0x19a8] sm:$0xff] }
 0x225   :  { %v846_v60 = vld [vmem:[%s9867_s1 + $0x19e8] sm:$0xff] }
 0x226   :  { %4369 = vmatpush1.bf16.msra.mxu0 %v4368_v29  ;;  %v752_v29 = vld [vmem:[%s9867_s1 + $0x16f8] sm:$0xff] }
 0x227   :  { %4753 = vmatpush1.bf16.msra.mxu1 %v4752_v30  ;;  %4371 = vmatprep.subr.bf16.mxu0 %v4370_v32  ;;  %v4384_v30 = vpack.c.bf16 %v733_v17, %v725_v16  ;;  %v4768_v32 = vpack.c.bf16 %v735_v22, %v727_v18  ;;  %v4770_v35 = vpack.c.bf16 %v752_v29, %v744_v28  ;;  %v789_v17 = vld [vmem:[%s9867_s1 + $0x1820] sm:$0xff]  ;;  %v814_v28 = vld [vmem:[%s9867_s1 + $0x18e8] sm:$0xff]  ;;  %v808_v29 = vld [vmem:[%s9867_s1 + $0x18b8] sm:$0xff] }
 0x228   :  { %4755 = vmatprep.subr.bf16.mxu1 %v4754_v34  ;;  %v743_v34 = vld [vmem:[%s9867_s1 + $0x16b0] sm:$0xff]  ;;  %v4398_v16 = vpack.c.bf16 %v798_v12, %v790_v11  ;;  %v797_v18 = vld [vmem:[%s9867_s1 + $0x1860] sm:$0xff]  ;;  %v862_v11 = vld [vmem:[%s9867_s1 + $0x1a68] sm:$0xff] }
 0x229   :  { %v856_v12 = vld [vmem:[%s9867_s1 + $0x1a38] sm:$0xff] }
 0x22a   :  { %4373 = vmatpush1.bf16.msra.mxu0 %v4372_v47  ;;  %v768_v47 = vld [vmem:[%s9867_s1 + $0x1778] sm:$0xff] }
 0x22b   :  { %4757 = vmatpush1.bf16.msra.mxu1 %v4756_v49  ;;  %4375 = vmatprep.subr.bf16.mxu0 %v4374_v50  ;;  %v4388_v49 = vpack.c.bf16 %v749_v24, %v741_v33  ;;  %v4772_v50 = vpack.c.bf16 %v751_v41, %v743_v34  ;;  %v4774_v53 = vpack.c.bf16 %v768_v47, %v760_v45  ;;  %v805_v24 = vld [vmem:[%s9867_s1 + $0x18a0] sm:$0xff]  ;;  %v830_v45 = vld [vmem:[%s9867_s1 + $0x1968] sm:$0xff]  ;;  %v824_v47 = vld [vmem:[%s9867_s1 + $0x1938] sm:$0xff] }
 0x22c   :  { %4759 = vmatprep.subr.bf16.mxu1 %v4758_v39  ;;  %v759_v39 = vld [vmem:[%s9867_s1 + $0x1730] sm:$0xff]  ;;  %v4402_v33 = vpack.c.bf16 %v814_v28, %v806_v27  ;;  %v813_v34 = vld [vmem:[%s9867_s1 + $0x18e0] sm:$0xff]  ;;  %v878_v27 = vld [vmem:[%s9867_s1 + $0x1ae8] sm:$0xff] }
 0x22d   :  { %v872_v28 = vld [vmem:[%s9867_s1 + $0x1ab8] sm:$0xff] }
 0x22e   :  { %4377 = vmatpush1.bf16.msra.mxu0 %v4376_v62  ;;  %v784_v62 = vld [vmem:[%s9867_s1 + $0x17f8] sm:$0xff] }
 0x22f   :  { %4761 = vmatpush1.bf16.msra.mxu1 %v4760_v63  ;;  %4379 = vmatprep.subr.bf16.mxu0 %v4378_v0  ;;  %v4392_v63 = vpack.c.bf16 %v765_v56, %v757_v37  ;;  %v4776_v0 = vpack.c.bf16 %v767_v54, %v759_v39  ;;  %v4778_v5 = vpack.c.bf16 %v784_v62, %v776_v61  ;;  %v821_v56 = vld [vmem:[%s9867_s1 + $0x1920] sm:$0xff]  ;;  %v840_v61 = vld [vmem:[%s9867_s1 + $0x19b8] sm:$0xff] }
 0x230   :  { %4763 = vmatprep.subr.bf16.mxu1 %v4762_v4  ;;  %v775_v4 = vld [vmem:[%s9867_s1 + $0x17b0] sm:$0xff]  ;;  %v4406_v37 = vpack.c.bf16 %v830_v45, %v822_v44  ;;  %v829_v39 = vld [vmem:[%s9867_s1 + $0x1960] sm:$0xff]  ;;  %v848_v62 = vld [vmem:[%s9867_s1 + $0x19f8] sm:$0xff] }
 0x231   :  { %v879_v45 = vld [vmem:[%s9867_s1 + $0x1af0] sm:$0xff] }
 0x232   :  { %4381 = vmatpush1.bf16.msra.mxu0 %v4380_v19  ;;  %v800_v19 = vld [vmem:[%s9867_s1 + $0x1878] sm:$0xff] }
 0x233   :  { %4765 = vmatpush1.bf16.msra.mxu1 %v4764_v14  ;;  %4383 = vmatprep.subr.bf16.mxu0 %v4382_v15  ;;  %v4396_v14 = vpack.c.bf16 %v781_v3, %v773_v6  ;;  %v4780_v15 = vpack.c.bf16 %v783_v9, %v775_v4  ;;  %v4782_v22 = vpack.c.bf16 %v800_v19, %v792_v13  ;;  %v837_v6 = vld [vmem:[%s9867_s1 + $0x19a0] sm:$0xff]  ;;  %v839_v4 = vld [vmem:[%s9867_s1 + $0x19b0] sm:$0xff]  ;;  %v854_v9 = vld [vmem:[%s9867_s1 + $0x1a28] sm:$0xff] }
 0x234   :  { %4767 = vmatprep.subr.bf16.mxu1 %v4766_v20  ;;  %v791_v20 = vld [vmem:[%s9867_s1 + $0x1830] sm:$0xff]  ;;  %v845_v3 = vld [vmem:[%s9867_s1 + $0x19e0] sm:$0xff]  ;;  %v864_v13 = vld [vmem:[%s9867_s1 + $0x1a78] sm:$0xff] }
 0x235   :  { %v4412_v19 = vpack.c.bf16 %v845_v3, %v837_v6 }
 0x236   :  { %4385 = vmatpush1.bf16.msra.mxu0 %v4384_v30  ;;  %v816_v30 = vld [vmem:[%s9867_s1 + $0x18f8] sm:$0xff] }
 0x237   :  { %4769 = vmatpush1.bf16.msra.mxu1 %v4768_v32  ;;  %4387 = vmatprep.subr.bf16.mxu0 %v4386_v51  ;;  %v4400_v32 = vpack.c.bf16 %v797_v18, %v789_v17  ;;  %v4784_v51 = vpack.c.bf16 %v799_v21, %v791_v20  ;;  %v4786_v41 = vpack.c.bf16 %v816_v30, %v808_v29  ;;  %v861_v17 = vld [vmem:[%s9867_s1 + $0x1a60] sm:$0xff]  ;;  %v855_v18 = vld [vmem:[%s9867_s1 + $0x1a30] sm:$0xff]  ;;  %v870_v21 = vld [vmem:[%s9867_s1 + $0x1aa8] sm:$0xff] }
 0x238   :  { %4771 = vmatprep.subr.bf16.mxu1 %v4770_v35  ;;  %v807_v35 = vld [vmem:[%s9867_s1 + $0x18b0] sm:$0xff]  ;;  %v4798_v20 = vpack.c.bf16 %v864_v13, %v856_v12  ;;  %v880_v29 = vld [vmem:[%s9867_s1 + $0x1af8] sm:$0xff] }
 0x239   :  { %v4802_v44 = vpack.c.bf16 %v880_v29, %v872_v28  ;;  %v926_v28 = vld [vmem:[%s9867_s1 + $0x1c68] sm:$0xff] }
 0x23a   :  { %4389 = vmatpush1.bf16.msra.mxu0 %v4388_v49  ;;  %v832_v49 = vld [vmem:[%s9867_s1 + $0x1978] sm:$0xff] }
 0x23b   :  { %4773 = vmatpush1.bf16.msra.mxu1 %v4772_v50  ;;  %4391 = vmatprep.subr.bf16.mxu0 %v4390_v52  ;;  %v4404_v50 = vpack.c.bf16 %v813_v34, %v805_v24  ;;  %v4788_v52 = vpack.c.bf16 %v815_v42, %v807_v35  ;;  %v4790_v54 = vpack.c.bf16 %v832_v49, %v824_v47  ;;  %v869_v35 = vld [vmem:[%s9867_s1 + $0x1aa0] sm:$0xff]  ;;  %v871_v42 = vld [vmem:[%s9867_s1 + $0x1ab0] sm:$0xff]  ;;  %v886_v47 = vld [vmem:[%s9867_s1 + $0x1b28] sm:$0xff] }
 0x23c   :  { %4775 = vmatprep.subr.bf16.mxu1 %v4774_v53  ;;  %v823_v53 = vld [vmem:[%s9867_s1 + $0x1930] sm:$0xff]  ;;  %v4418_v34 = vpack.c.bf16 %v878_v27, %v870_v21  ;;  %v894_v49 = vld [vmem:[%s9867_s1 + $0x1b68] sm:$0xff] }
 0x23d   :  { %v911_v21 = vld [vmem:[%s9867_s1 + $0x1bf0] sm:$0xff]  ;;  %v918_v27 = vld [vmem:[%s9867_s1 + $0x1c28] sm:$0xff] }
 0x23e   :  { %4393 = vmatpush1.bf16.msra.mxu0 %v4392_v63  ;;  %v4408_v63 = vpack.c.bf16 %v829_v39, %v821_v56 }
 0x23f   :  { %4777 = vmatpush1.bf16.msra.mxu1 %v4776_v0  ;;  %4395 = vmatprep.subr.bf16.mxu0 %v4394_v2  ;;  %v4410_v2 = vpack.c.bf16 %v846_v60, %v838_v58  ;;  %v4422_v58 = vpack.c.bf16 %v894_v49, %v886_v47  ;;  %v885_v60 = vld [vmem:[%s9867_s1 + $0x1b20] sm:$0xff]  ;;  %v927_v47 = vld [vmem:[%s9867_s1 + $0x1c70] sm:$0xff]  ;;  %v934_v49 = vld [vmem:[%s9867_s1 + $0x1ca8] sm:$0xff] }
 0x240   :  { %4779 = vmatprep.subr.bf16.mxu1 %v4778_v5  ;;  %v847_v5 = vld [vmem:[%s9867_s1 + $0x19f0] sm:$0xff] }
 0x242   :  { %4397 = vmatpush1.bf16.msra.mxu0 %v4396_v14  ;;  %v4796_v14 = vpack.c.bf16 %v847_v5, %v839_v4  ;;  %v904_v4 = vld [vmem:[%s9867_s1 + $0x1bb8] sm:$0xff] }
 0x243   :  { %4781 = vmatpush1.bf16.msra.mxu1 %v4780_v15  ;;  %4399 = vmatprep.subr.bf16.mxu0 %v4398_v16  ;;  %v4414_v15 = vpack.c.bf16 %v862_v11, %v854_v9  ;;  %v853_v16 = vld [vmem:[%s9867_s1 + $0x1a20] sm:$0xff] }
 0x244   :  { %4783 = vmatprep.subr.bf16.mxu1 %v4782_v22  ;;  %v863_v22 = vld [vmem:[%s9867_s1 + $0x1a70] sm:$0xff]  ;;  %v4416_v30 = vpack.c.bf16 %v861_v17, %v853_v16  ;;  %v901_v16 = vld [vmem:[%s9867_s1 + $0x1ba0] sm:$0xff] }
 0x245   :  { %2716 = vmatmul.mubr.f32.vlgmr.msra.gmra.mrb[2].mxu0 %v6317_v40  ;;  %v4800_v24 = vpack.c.bf16 %v863_v22, %v855_v18  ;;  %v909_v17 = vld [vmem:[%s9867_s1 + $0x1be0] sm:$0xff]  ;;  %v903_v18 = vld [vmem:[%s9867_s1 + $0x1bb0] sm:$0xff] }
 0x246   :  { %4401 = vmatpush1.bf16.msra.mxu0 %v4400_v32  ;;  %3142 = vmatmul.mubr.f32.vlgmr.msra.gmra.mrb[2].mxu1 %v6317_v40  ;;  %v831_v40 = vld [vmem:[%s9867_s1 + $0x1970] sm:$0xff]  ;;  %v1553_v32 = vld [vmem:[%s9868_s2] sm:$0xff] }
 0x247   :  { %4785 = vmatpush1.bf16.msra.mxu1 %v4784_v51  ;;  %4403 = vmatprep.subr.bf16.mxu0 %v4402_v33  ;;  %v4792_v0 = vpack.c.bf16 %v831_v40, %v823_v53  ;;  %v5051_v51 = vmov 1966171168   ;;  %v1628_v56 = vrot.slane %v1553_v32, %v5889_v43  ;;  %v1624_v39 = vrot.slane %v1553_v32, %v5353_v8  ;;  %v887_v8 = vld [vmem:[%s9867_s1 + $0x1b30] sm:$0xff] }
 0x248   :  { %4787 = vmatprep.subr.bf16.mxu1 %v4786_v41  ;;  %2786 = vmatprep.mubr.f32.mxu0 %v6346_v57  ;;  %v3374_v33 = vunpack.c.l.s4 %v5051_v51  ;;  %v877_v41 = vld [vmem:[%s9867_s1 + $0x1ae0] sm:$0xff]  ;;  %v1632_v40 = vrot.slane %v1553_v32, %v5508_v23  ;;  %v895_v23 = vld [vmem:[%s9867_s1 + $0x1b70] sm:$0xff] }
 0x249   :  { %3212 = vmatprep.mubr.f32.mxu1 %v6346_v57  ;;  %v4794_v57 = vpack.c.bf16 %v848_v62, %v840_v61  ;;  %v893_v61 = vld [vmem:[%s9867_s1 + $0x1b60] sm:$0xff] }
 0x24a   :  { %4405 = vmatpush1.bf16.msra.mxu0 %v4404_v50  ;;  %v1620_v50 = vrot.slane %v1553_v32, %v5487_v10  ;;  %v3375_v53 = vunpack.c.0.s8 %v3374_v33  ;;  %v4804_v10 = vpack.c.bf16 %v879_v45, %v871_v42  ;;  %v4424_v13 = vpack.c.bf16 %v893_v61, %v885_v60  ;;  %v928_v32 = vld [vmem:[%s9867_s1 + $0x1c78] sm:$0xff]  ;;  %v925_v42 = vld [vmem:[%s9867_s1 + $0x1c60] sm:$0xff]  ;;  %v943_v61 = vld [vmem:[%s9867_s1 + $0x1cf0] sm:$0xff] }
 0x24b   :  { %4789 = vmatpush1.bf16.msra.mxu1 %v4788_v52  ;;  %4407 = vmatprep.subr.bf16.mxu0 %v4406_v37  ;;  %v888_v52 = vld [vmem:[%s9867_s1 + $0x1b38] sm:$0xff]  ;;  %v4428_v33 = vpack.c.bf16 %v909_v17, %v901_v16  ;;  %v965_v17 = vld [vmem:[%s9867_s1 + $0x1da0] sm:$0xff] }
 0x24c   :  { %4791 = vmatprep.subr.bf16.mxu1 %v4790_v54  ;;  %v896_v37 = vld [vmem:[%s9867_s1 + $0x1b78] sm:$0xff]  ;;  %v4420_v54 = vpack.c.bf16 %v877_v41, %v869_v35  ;;  %v8843_v11 = vsub.s32 %v3375_v53, %v5326_v59  ;;  %v4430_v35 = vpack.c.bf16 %v926_v28, %v918_v27  ;;  %v917_v41 = vld [vmem:[%s9867_s1 + $0x1c20] sm:$0xff]  ;;  %v982_v27 = vld [vmem:[%s9867_s1 + $0x1e28] sm:$0xff] }
 0x24d   :  { %v4806_v62 = vpack.c.bf16 %v896_v37, %v888_v52  ;;  %v936_v37 = vld [vmem:[%s9867_s1 + $0x1cb8] sm:$0xff]  ;;  %v990_v28 = vld [vmem:[%s9867_s1 + $0x1e68] sm:$0xff] }
 0x24e   :  { %4409 = vmatpush1.bf16.msra.mxu0 %v4408_v63  ;;  %v902_v63 = vld [vmem:[%s9867_s1 + $0x1ba8] sm:$0xff] }
 0x24f   :  { %4793 = vmatpush1.bf16.msra.mxu1 %v4792_v0  ;;  %4411 = vmatprep.subr.bf16.mxu0 %v4410_v2  ;;  %v910_v0 = vld [vmem:[%s9867_s1 + $0x1be8] sm:$0xff] }
 0x250   :  { %4795 = vmatprep.subr.bf16.mxu1 %v4794_v57  ;;  %v912_v57 = vld [vmem:[%s9867_s1 + $0x1bf8] sm:$0xff] }
 0x251   :  { %v4810_v22 = vpack.c.bf16 %v912_v57, %v904_v4  ;;  %v951_v4 = vld [vmem:[%s9867_s1 + $0x1d30] sm:$0xff] }
 0x252   :  { %4413 = vmatpush1.bf16.msra.mxu0 %v4412_v19 }
 0x253   :  { %4797 = vmatpush1.bf16.msra.mxu1 %v4796_v14  ;;  %4415 = vmatprep.subr.bf16.mxu0 %v4414_v15  ;;  %v4808_v14 = vpack.c.bf16 %v895_v23, %v887_v8  ;;  %v4426_v15 = vpack.c.bf16 %v910_v0, %v902_v63  ;;  %v950_v8 = vld [vmem:[%s9867_s1 + $0x1d28] sm:$0xff]  ;;  %v960_v23 = vld [vmem:[%s9867_s1 + $0x1d78] sm:$0xff] }
 0x254   :  { %4799 = vmatprep.subr.bf16.mxu1 %v4798_v20 }
 0x256   :  { %4417 = vmatpush1.bf16.msra.mxu0 %v4416_v30  ;;  %v920_v30 = vld [vmem:[%s9867_s1 + $0x1c38] sm:$0xff] }
 0x257   :  { %4801 = vmatpush1.bf16.msra.mxu1 %v4800_v24  ;;  %4419 = vmatprep.subr.bf16.mxu0 %v4418_v34  ;;  %v4812_v34 = vpack.c.bf16 %v911_v21, %v903_v18  ;;  %v4814_v45 = vpack.c.bf16 %v928_v32, %v920_v30  ;;  %v973_v18 = vld [vmem:[%s9867_s1 + $0x1de0] sm:$0xff]  ;;  %v975_v21 = vld [vmem:[%s9867_s1 + $0x1df0] sm:$0xff]  ;;  %v992_v30 = vld [vmem:[%s9867_s1 + $0x1e78] sm:$0xff] }
 0x258   :  { %v2078_v43 = vpop.f32.mrb[0].mxu0  ;;  %4803 = vmatprep.subr.bf16.mxu1 %v4802_v44  ;;  %v919_v44 = vld [vmem:[%s9867_s1 + $0x1c30] sm:$0xff]  ;;  %v4444_v32 = vpack.c.bf16 %v973_v18, %v965_v17  ;;  %v1037_v17 = vld [vmem:[%s9867_s1 + $0x1fe0] sm:$0xff] }
 0x259   :  { %v4974_v2 = vadd.f32 %v2078_v43, %v1620_v50  ;;  %v2504_v6 = vpop.f32.mrb[0].mxu1  ;;  %v2080_v3 = vpop.f32.mrb[1].mxu0  ;;  %v942_v50 = vld [vmem:[%s9867_s1 + $0x1ce8] sm:$0xff]  ;;  %v4816_v53 = vpack.c.bf16 %v927_v47, %v919_v44  ;;  %v1031_v18 = vld [vmem:[%s9867_s1 + $0x1fb0] sm:$0xff] }
 0x25a   :  { %v4976_v5 = vadd.f32 %v2504_v6, %v1628_v56  ;;  %v4975_v9 = vadd.f32 %v2080_v3, %v1624_v39  ;;  %v2506_v12 = vpop.f32.mrb[1].mxu1  ;;  %4421 = vmatpush1.bf16.msra.mxu0 %v4420_v54  ;;  %v944_v56 = vld [vmem:[%s9867_s1 + $0x1cf8] sm:$0xff]  ;;  %v4432_v39 = vpack.c.bf16 %v925_v42, %v917_v41  ;;  %v4434_v54 = vpack.c.bf16 %v942_v50, %v934_v49  ;;  %v958_v43 = vld [vmem:[%s9867_s1 + $0x1d68] sm:$0xff]  ;;  %v949_v6 = vld [vmem:[%s9867_s1 + $0x1d20] sm:$0xff] }
 0x25b   :  { %v4977_v19 = vadd.f32 %v2506_v12, %v1632_v40  ;;  %4805 = vmatpush1.bf16.msra.mxu1 %v4804_v10  ;;  %4423 = vmatprep.subr.bf16.mxu0 %v4422_v58  ;;  %v933_v40 = vld [vmem:[%s9867_s1 + $0x1ca0] sm:$0xff]  ;;  %v935_v58 = vld [vmem:[%s9867_s1 + $0x1cb0] sm:$0xff]  ;;  %v4818_v60 = vpack.c.bf16 %v944_v56, %v936_v37  ;;  %v974_v12 = vld [vmem:[%s9867_s1 + $0x1de8] sm:$0xff] }
 0x25c   :  { %v3369_v20 = vcombine.low %v4974_v2, %v4975_v9  ;;  %4807 = vmatprep.subr.bf16.mxu1 %v4806_v62  ;;  %v941_v10 = vld [vmem:[%s9867_s1 + $0x1ce0] sm:$0xff]  ;;  %v952_v62 = vld [vmem:[%s9867_s1 + $0x1d38] sm:$0xff]  ;;  %v4820_v0 = vpack.c.bf16 %v943_v61, %v935_v58  ;;  %v4438_v2 = vpack.c.bf16 %v958_v43, %v950_v8  ;;  %v966_v9 = vld [vmem:[%s9867_s1 + $0x1da8] sm:$0xff] }
 0x25d   :  { %v3370_v29 = vcombine.low %v4976_v5, %v4977_v19  ;;  %v4436_v63 = vpack.c.bf16 %v941_v10, %v933_v40  ;;  %v957_v3 = vld [vmem:[%s9867_s1 + $0x1d60] sm:$0xff]  ;;  %v4822_v57 = vpack.c.bf16 %v960_v23, %v952_v62  ;;  %v959_v5 = vld [vmem:[%s9867_s1 + $0x1d70] sm:$0xff]  ;;  %v976_v19 = vld [vmem:[%s9867_s1 + $0x1df8] sm:$0xff]  ;;  %v4442_v16 = vpack.c.bf16 %v974_v12, %v966_v9 }
 0x25e   :  { %v8870_v51 = vrot.slane %v3369_v20, %v8843_v11  ;;  %4425 = vmatpush1.bf16.msra.mxu0 %v4424_v13  ;;  %v968_v13 = vld [vmem:[%s9867_s1 + $0x1db8] sm:$0xff]  ;;  %v967_v20 = vld [vmem:[%s9867_s1 + $0x1db0] sm:$0xff]  ;;  %v989_v41 = vld [vmem:[%s9867_s1 + $0x1e60] sm:$0xff] }
 0x25f   :  { %v8873_v24 = vrot.slane %v3370_v29, %v8843_v11  ;;  %4809 = vmatpush1.bf16.msra.mxu1 %v4808_v14  ;;  %4427 = vmatprep.subr.bf16.mxu0 %v4426_v15  ;;  %v4440_v14 = vpack.c.bf16 %v957_v3, %v949_v6  ;;  %v4824_v15 = vpack.c.bf16 %v959_v5, %v951_v4  ;;  %v984_v29 = vld [vmem:[%s9867_s1 + $0x1e38] sm:$0xff]  ;;  %v983_v42 = vld [vmem:[%s9867_s1 + $0x1e30] sm:$0xff]  ;;  %v998_v47 = vld [vmem:[%s9867_s1 + $0x1ea8] sm:$0xff] }
 0x260   :  { %4811 = vmatprep.subr.bf16.mxu1 %v4810_v22  ;;  %v4826_v22 = vpack.c.bf16 %v976_v19, %v968_v13  ;;  %v4830_v44 = vpack.c.bf16 %v992_v30, %v984_v29  ;;  %v1006_v49 = vld [vmem:[%s9867_s1 + $0x1ee8] sm:$0xff]  ;;  %v1000_v50 = vld [vmem:[%s9867_s1 + $0x1eb8] sm:$0xff]  ;;  %v1005_v40 = vld [vmem:[%s9867_s1 + $0x1ee0] sm:$0xff] }
 0x261   :  { %v3401_v52 = vcombine.low %v8870_v51, %v8873_v24  ;;  %v1008_v37 = vld [vmem:[%s9867_s1 + $0x1ef8] sm:$0xff]  ;;  %v999_v10 = vld [vmem:[%s9867_s1 + $0x1eb0] sm:$0xff]  ;;  %v1014_v61 = vld [vmem:[%s9867_s1 + $0x1f28] sm:$0xff] }
 0x262   :  { %4429 = vmatpush1.bf16.msra.mxu0 %v4428_v33  ;;  %v4828_v33 = vpack.c.bf16 %v975_v21, %v967_v20  ;;  %v4834_v58 = vpack.c.bf16 %v1008_v37, %v1000_v50  ;;  %v1022_v8 = vld [vmem:[%s9867_s1 + $0x1f68] sm:$0xff]  ;;  %v1016_v43 = vld [vmem:[%s9867_s1 + $0x1f38] sm:$0xff]  ;;  %v1021_v6 = vld [vmem:[%s9867_s1 + $0x1f60] sm:$0xff] }
 0x263   :  { %4813 = vmatpush1.bf16.msra.mxu1 %v4812_v34  ;;  %4431 = vmatprep.subr.bf16.mxu0 %v4430_v35  ;;  %v4446_v34 = vpack.c.bf16 %v990_v28, %v982_v27  ;;  %v981_v35 = vld [vmem:[%s9867_s1 + $0x1e20] sm:$0xff]  ;;  %v1024_v62 = vld [vmem:[%s9867_s1 + $0x1f78] sm:$0xff]  ;;  %v1015_v3 = vld [vmem:[%s9867_s1 + $0x1f30] sm:$0xff]  ;;  %v3409_v59 = vrot.slane %v3401_v52, %v8843_v11 }
 0x264   :  { %4815 = vmatprep.subr.bf16.mxu1 %v4814_v45  ;;  %v991_v45 = vld [vmem:[%s9867_s1 + $0x1e70] sm:$0xff]  ;;  %v4448_v56 = vpack.c.bf16 %v989_v41, %v981_v35  ;;  %v4838_v4 = vpack.c.bf16 %v1024_v62, %v1016_v43  ;;  %v1030_v5 = vld [vmem:[%s9867_s1 + $0x1fa8] sm:$0xff]  ;;  %v1032_v12 = vld [vmem:[%s9867_s1 + $0x1fb8] sm:$0xff] }
 0x265   :  { %v1038_v9 = vld [vmem:[%s9867_s1 + $0x1fe8] sm:$0xff]  ;;  %v1040_v13 = vld [vmem:[%s9867_s1 + $0x1ff8] sm:$0xff]  ;;  %v1053_v35 = vld [vmem:[%s9867_s1 + $0x2060] sm:$0xff] }
 0x266   :  { %4433 = vmatpush1.bf16.msra.mxu0 %v4432_v39  ;;  %v4832_v39 = vpack.c.bf16 %v991_v45, %v983_v42  ;;  %v4842_v20 = vpack.c.bf16 %v1040_v13, %v1032_v12  ;;  %v1046_v21 = vld [vmem:[%s9867_s1 + $0x2028] sm:$0xff]  ;;  %v1048_v28 = vld [vmem:[%s9867_s1 + $0x2038] sm:$0xff]  ;;  %v1047_v41 = vld [vmem:[%s9867_s1 + $0x2030] sm:$0xff] }
 0x267   :  { %4817 = vmatpush1.bf16.msra.mxu1 %v4816_v53  ;;  %4435 = vmatprep.subr.bf16.mxu0 %v4434_v54  ;;  %v4450_v53 = vpack.c.bf16 %v1006_v49, %v998_v47  ;;  %v997_v54 = vld [vmem:[%s9867_s1 + $0x1ea0] sm:$0xff]  ;;  %v1054_v27 = vld [vmem:[%s9867_s1 + $0x2068] sm:$0xff]  ;;  %v1056_v29 = vld [vmem:[%s9867_s1 + $0x2078] sm:$0xff] }
 0x268   :  { %4819 = vmatprep.subr.bf16.mxu1 %v4818_v60  ;;  %v1007_v60 = vld [vmem:[%s9867_s1 + $0x1ef0] sm:$0xff]  ;;  %v4452_v23 = vpack.c.bf16 %v1005_v40, %v997_v54  ;;  %v4846_v42 = vpack.c.bf16 %v1056_v29, %v1048_v28  ;;  %v1062_v45 = vld [vmem:[%s9867_s1 + $0x20a8] sm:$0xff]  ;;  %v1064_v49 = vld [vmem:[%s9867_s1 + $0x20b8] sm:$0xff] }
 0x269   :  { %v1070_v47 = vld [vmem:[%s9867_s1 + $0x20e8] sm:$0xff]  ;;  %v1072_v50 = vld [vmem:[%s9867_s1 + $0x20f8] sm:$0xff]  ;;  %v1069_v54 = vld [vmem:[%s9867_s1 + $0x20e0] sm:$0xff] }
 0x26a   :  { %4437 = vmatpush1.bf16.msra.mxu0 %v4436_v63  ;;  %v4836_v63 = vpack.c.bf16 %v1007_v60, %v999_v10  ;;  %v1063_v40 = vld [vmem:[%s9867_s1 + $0x20b0] sm:$0xff]  ;;  %v4850_v10 = vpack.c.bf16 %v1072_v50, %v1064_v49  ;;  %v1078_v60 = vld [vmem:[%s9867_s1 + $0x2128] sm:$0xff]  ;;  %v1088_v43 = vld [vmem:[%s9867_s1 + $0x2178] sm:$0xff] }
 0x26b   :  { %4821 = vmatpush1.bf16.msra.mxu1 %v4820_v0  ;;  %4439 = vmatprep.subr.bf16.mxu0 %v4438_v2  ;;  %v4454_v0 = vpack.c.bf16 %v1022_v8, %v1014_v61  ;;  %v1013_v2 = vld [vmem:[%s9867_s1 + $0x1f20] sm:$0xff]  ;;  %v1086_v61 = vld [vmem:[%s9867_s1 + $0x2168] sm:$0xff]  ;;  %v1080_v8 = vld [vmem:[%s9867_s1 + $0x2138] sm:$0xff] }
 0x26c   :  { %4823 = vmatprep.subr.bf16.mxu1 %v4822_v57  ;;  %v1023_v57 = vld [vmem:[%s9867_s1 + $0x1f70] sm:$0xff]  ;;  %v4456_v19 = vpack.c.bf16 %v1021_v6, %v1013_v2  ;;  %v1085_v2 = vld [vmem:[%s9867_s1 + $0x2160] sm:$0xff] }
 0x26d   :  { %v1079_v6 = vld [vmem:[%s9867_s1 + $0x2130] sm:$0xff] }
 0x26e   :  { %4441 = vmatpush1.bf16.msra.mxu0 %v4440_v14  ;;  %v4840_v14 = vpack.c.bf16 %v1023_v57, %v1015_v3  ;;  %v4854_v3 = vpack.c.bf16 %v1088_v43, %v1080_v8  ;;  %v1102_v57 = vld [vmem:[%s9867_s1 + $0x21e8] sm:$0xff] }
 0x26f   :  { %4825 = vmatpush1.bf16.msra.mxu1 %v4824_v15  ;;  %4443 = vmatprep.subr.bf16.mxu0 %v4442_v16  ;;  %v4458_v15 = vpack.c.bf16 %v1038_v9, %v1030_v5  ;;  %v1029_v16 = vld [vmem:[%s9867_s1 + $0x1fa0] sm:$0xff]  ;;  %v1096_v5 = vld [vmem:[%s9867_s1 + $0x21b8] sm:$0xff] }
 0x270   :  { %4827 = vmatprep.subr.bf16.mxu1 %v4826_v22  ;;  %v1039_v22 = vld [vmem:[%s9867_s1 + $0x1ff0] sm:$0xff]  ;;  %v4460_v30 = vpack.c.bf16 %v1037_v17, %v1029_v16  ;;  %v1104_v9 = vld [vmem:[%s9867_s1 + $0x21f8] sm:$0xff] }
 0x271   :  { %v1095_v16 = vld [vmem:[%s9867_s1 + $0x21b0] sm:$0xff] }
 0x272   :  { %4445 = vmatpush1.bf16.msra.mxu0 %v4444_v32  ;;  %v4844_v32 = vpack.c.bf16 %v1039_v22, %v1031_v18  ;;  %v1103_v17 = vld [vmem:[%s9867_s1 + $0x21f0] sm:$0xff]  ;;  %v1110_v18 = vld [vmem:[%s9867_s1 + $0x2228] sm:$0xff]  ;;  %v1112_v22 = vld [vmem:[%s9867_s1 + $0x2238] sm:$0xff] }
 0x273   :  { %4829 = vmatpush1.bf16.msra.mxu1 %v4828_v33  ;;  %4447 = vmatprep.subr.bf16.mxu0 %v4446_v34  ;;  %v4462_v33 = vpack.c.bf16 %v1054_v27, %v1046_v21  ;;  %v1045_v34 = vld [vmem:[%s9867_s1 + $0x2020] sm:$0xff]  ;;  %v1120_v21 = vld [vmem:[%s9867_s1 + $0x2278] sm:$0xff]  ;;  %v4860_v28 = vpack.c.bf16 %v1103_v17, %v1095_v16  ;;  %v1174_v16 = vld [vmem:[%s9867_s1 + $0x2428] sm:$0xff] }
 0x274   :  { %4831 = vmatprep.subr.bf16.mxu1 %v4830_v44  ;;  %v1055_v44 = vld [vmem:[%s9867_s1 + $0x2070] sm:$0xff]  ;;  %v4464_v37 = vpack.c.bf16 %v1053_v35, %v1045_v34  ;;  %v4862_v34 = vpack.c.bf16 %v1120_v21, %v1112_v22  ;;  %v1176_v17 = vld [vmem:[%s9867_s1 + $0x2438] sm:$0xff] }
 0x275   :  { %v1119_v35 = vld [vmem:[%s9867_s1 + $0x2270] sm:$0xff] }
 0x276   :  { %4449 = vmatpush1.bf16.msra.mxu0 %v4448_v56  ;;  %v4848_v56 = vpack.c.bf16 %v1055_v44, %v1047_v41  ;;  %v1126_v41 = vld [vmem:[%s9867_s1 + $0x22a8] sm:$0xff]  ;;  %v1128_v44 = vld [vmem:[%s9867_s1 + $0x22b8] sm:$0xff] }
 0x277   :  { %4833 = vmatpush1.bf16.msra.mxu1 %v4832_v39  ;;  %4451 = vmatprep.subr.bf16.mxu0 %v4450_v53  ;;  %v4466_v39 = vpack.c.bf16 %v1070_v47, %v1062_v45  ;;  %v1061_v53 = vld [vmem:[%s9867_s1 + $0x20a0] sm:$0xff]  ;;  %v1136_v45 = vld [vmem:[%s9867_s1 + $0x22f8] sm:$0xff] }
 0x278   :  { %4835 = vmatprep.subr.bf16.mxu1 %v4834_v58  ;;  %v1071_v58 = vld [vmem:[%s9867_s1 + $0x20f0] sm:$0xff]  ;;  %v4468_v62 = vpack.c.bf16 %v1069_v54, %v1061_v53  ;;  %v4866_v53 = vpack.c.bf16 %v1136_v45, %v1128_v44 }
 0x279   :  { %v1135_v54 = vld [vmem:[%s9867_s1 + $0x22f0] sm:$0xff] }
 0x27a   :  { %4453 = vmatpush1.bf16.msra.mxu0 %v4452_v23  ;;  %v4852_v23 = vpack.c.bf16 %v1071_v58, %v1063_v40  ;;  %v1142_v40 = vld [vmem:[%s9867_s1 + $0x2328] sm:$0xff]  ;;  %v1144_v58 = vld [vmem:[%s9867_s1 + $0x2338] sm:$0xff] }
 0x27b   :  { %4837 = vmatpush1.bf16.msra.mxu1 %v4836_v63  ;;  %4455 = vmatprep.subr.bf16.mxu0 %v4454_v0  ;;  %v4470_v63 = vpack.c.bf16 %v1086_v61, %v1078_v60  ;;  %v1077_v0 = vld [vmem:[%s9867_s1 + $0x2120] sm:$0xff]  ;;  %v1152_v60 = vld [vmem:[%s9867_s1 + $0x2378] sm:$0xff] }
 0x27c   :  { %4839 = vmatprep.subr.bf16.mxu1 %v4838_v4  ;;  %v1094_v4 = vld [vmem:[%s9867_s1 + $0x21a8] sm:$0xff]  ;;  %v4472_v12 = vpack.c.bf16 %v1085_v2, %v1077_v0  ;;  %v4870_v0 = vpack.c.bf16 %v1152_v60, %v1144_v58  ;;  %v1151_v2 = vld [vmem:[%s9867_s1 + $0x2370] sm:$0xff] }
 0x27e   :  { %4457 = vmatpush1.bf16.msra.mxu0 %v4456_v19  ;;  %v4474_v19 = vpack.c.bf16 %v1102_v57, %v1094_v4  ;;  %v1168_v4 = vld [vmem:[%s9867_s1 + $0x23f8] sm:$0xff] }
 0x27f   :  { %4841 = vmatpush1.bf16.msra.mxu1 %v4840_v14  ;;  %4459 = vmatprep.subr.bf16.mxu0 %v4458_v15  ;;  %v1093_v14 = vld [vmem:[%s9867_s1 + $0x21a0] sm:$0xff] }
 0x280   :  { %4843 = vmatprep.subr.bf16.mxu1 %v4842_v20  ;;  %v1101_v15 = vld [vmem:[%s9867_s1 + $0x21e0] sm:$0xff]  ;;  %v1118_v20 = vld [vmem:[%s9867_s1 + $0x2268] sm:$0xff] }
 0x281   :  { %v4476_v27 = vpack.c.bf16 %v1101_v15, %v1093_v14  ;;  %v4478_v29 = vpack.c.bf16 %v1118_v20, %v1110_v18  ;;  %v1167_v15 = vld [vmem:[%s9867_s1 + $0x23f0] sm:$0xff]  ;;  %v1184_v18 = vld [vmem:[%s9867_s1 + $0x2478] sm:$0xff] }
 0x282   :  { %4461 = vmatpush1.bf16.msra.mxu0 %v4460_v30  ;;  %v1109_v30 = vld [vmem:[%s9867_s1 + $0x2220] sm:$0xff] }
 0x283   :  { %4845 = vmatpush1.bf16.msra.mxu1 %v4844_v32  ;;  %4463 = vmatprep.subr.bf16.mxu0 %v4462_v33  ;;  %v1117_v32 = vld [vmem:[%s9867_s1 + $0x2260] sm:$0xff]  ;;  %v1111_v33 = vld [vmem:[%s9867_s1 + $0x2230] sm:$0xff] }
 0x284   :  { %4847 = vmatprep.subr.bf16.mxu1 %v4846_v42  ;;  %v1134_v42 = vld [vmem:[%s9867_s1 + $0x22e8] sm:$0xff]  ;;  %v4480_v47 = vpack.c.bf16 %v1117_v32, %v1109_v30  ;;  %v4864_v49 = vpack.c.bf16 %v1119_v35, %v1111_v33  ;;  %v4878_v30 = vpack.c.bf16 %v1184_v18, %v1176_v17  ;;  %v1183_v32 = vld [vmem:[%s9867_s1 + $0x2470] sm:$0xff]  ;;  %v1192_v35 = vld [vmem:[%s9867_s1 + $0x24b8] sm:$0xff] }
 0x285   :  { %2787 = vmatmul.mubr.f32.vlgmr.msra.gmra.mrb[2].mxu0 %v6716_v48  ;;  %v4482_v50 = vpack.c.bf16 %v1134_v42, %v1126_v41  ;;  %v1190_v33 = vld [vmem:[%s9867_s1 + $0x24a8] sm:$0xff]  ;;  %v1200_v41 = vld [vmem:[%s9867_s1 + $0x24f8] sm:$0xff] }
 0x286   :  { %4465 = vmatpush1.bf16.msra.mxu0 %v4464_v37  ;;  %3213 = vmatmul.mubr.f32.vlgmr.msra.gmra.mrb[2].mxu1 %v6716_v48  ;;  %v1087_v48 = vld [vmem:[%s9867_s1 + $0x2170] sm:$0xff]  ;;  %v1125_v37 = vld [vmem:[%s9867_s1 + $0x22a0] sm:$0xff] }
 0x287   :  { %4849 = vmatpush1.bf16.msra.mxu1 %v4848_v56  ;;  %4467 = vmatprep.subr.bf16.mxu0 %v4466_v39  ;;  %v4856_v13 = vpack.c.bf16 %v1087_v48, %v1079_v6  ;;  %v1133_v56 = vld [vmem:[%s9867_s1 + $0x22e0] sm:$0xff]  ;;  %v1127_v39 = vld [vmem:[%s9867_s1 + $0x22b0] sm:$0xff]  ;;  %v1158_v6 = vld [vmem:[%s9867_s1 + $0x23a8] sm:$0xff] }
 0x288   :  { %4851 = vmatprep.subr.bf16.mxu1 %v4850_v10  ;;  %2857 = vmatprep.mubr.f32.mxu0 %v6749_v1  ;;  %v1150_v10 = vld [vmem:[%s9867_s1 + $0x2368] sm:$0xff]  ;;  %v4484_v61 = vpack.c.bf16 %v1133_v56, %v1125_v37  ;;  %v4868_v8 = vpack.c.bf16 %v1135_v54, %v1127_v39  ;;  %v1160_v48 = vld [vmem:[%s9867_s1 + $0x23b8] sm:$0xff]  ;;  %v4882_v37 = vpack.c.bf16 %v1200_v41, %v1192_v35  ;;  %v1199_v56 = vld [vmem:[%s9867_s1 + $0x24f0] sm:$0xff] }
 0x289   :  { %3283 = vmatprep.mubr.f32.mxu1 %v6749_v1  ;;  %v4858_v1 = vpack.c.bf16 %v1104_v9, %v1096_v5  ;;  %v4486_v43 = vpack.c.bf16 %v1150_v10, %v1142_v40  ;;  %v4874_v14 = vpack.c.bf16 %v1168_v4, %v1160_v48  ;;  %v1206_v39 = vld [vmem:[%s9867_s1 + $0x2528] sm:$0xff]  ;;  %v1208_v54 = vld [vmem:[%s9867_s1 + $0x2538] sm:$0xff] }
 0x28a   :  { %4469 = vmatpush1.bf16.msra.mxu0 %v4468_v62  ;;  %v1141_v62 = vld [vmem:[%s9867_s1 + $0x2320] sm:$0xff]  ;;  %v1216_v40 = vld [vmem:[%s9867_s1 + $0x2578] sm:$0xff] }
 0x28b   :  { %4853 = vmatpush1.bf16.msra.mxu1 %v4852_v23  ;;  %4471 = vmatprep.subr.bf16.mxu0 %v4470_v63  ;;  %v1149_v23 = vld [vmem:[%s9867_s1 + $0x2360] sm:$0xff]  ;;  %v1143_v63 = vld [vmem:[%s9867_s1 + $0x2330] sm:$0xff] }
 0x28c   :  { %4855 = vmatprep.subr.bf16.mxu1 %v4854_v3  ;;  %v1166_v3 = vld [vmem:[%s9867_s1 + $0x23e8] sm:$0xff]  ;;  %v4488_v57 = vpack.c.bf16 %v1149_v23, %v1141_v62  ;;  %v4872_v5 = vpack.c.bf16 %v1151_v2, %v1143_v63  ;;  %v4886_v62 = vpack.c.bf16 %v1216_v40, %v1208_v54  ;;  %v1215_v23 = vld [vmem:[%s9867_s1 + $0x2570] sm:$0xff]  ;;  %v1224_v2 = vld [vmem:[%s9867_s1 + $0x25b8] sm:$0xff] }
 0x28d   :  { %v4490_v9 = vpack.c.bf16 %v1166_v3, %v1158_v6  ;;  %v1222_v63 = vld [vmem:[%s9867_s1 + $0x25a8] sm:$0xff]  ;;  %v1232_v6 = vld [vmem:[%s9867_s1 + $0x25f8] sm:$0xff] }
 0x28e   :  { %4473 = vmatpush1.bf16.msra.mxu0 %v4472_v12  ;;  %v1157_v12 = vld [vmem:[%s9867_s1 + $0x23a0] sm:$0xff] }
 0x28f   :  { %4857 = vmatpush1.bf16.msra.mxu1 %v4856_v13  ;;  %4475 = vmatprep.subr.bf16.mxu0 %v4474_v19  ;;  %v1165_v13 = vld [vmem:[%s9867_s1 + $0x23e0] sm:$0xff]  ;;  %v1159_v19 = vld [vmem:[%s9867_s1 + $0x23b0] sm:$0xff] }
 0x290   :  { %4859 = vmatprep.subr.bf16.mxu1 %v4858_v1  ;;  %v1182_v1 = vld [vmem:[%s9867_s1 + $0x2468] sm:$0xff]  ;;  %v4492_v20 = vpack.c.bf16 %v1165_v13, %v1157_v12  ;;  %v4876_v22 = vpack.c.bf16 %v1167_v15, %v1159_v19  ;;  %v4890_v12 = vpack.c.bf16 %v1232_v6, %v1224_v2  ;;  %v1231_v13 = vld [vmem:[%s9867_s1 + $0x25f0] sm:$0xff]  ;;  %v1240_v15 = vld [vmem:[%s9867_s1 + $0x2638] sm:$0xff] }
 0x291   :  { %v4494_v21 = vpack.c.bf16 %v1182_v1, %v1174_v16  ;;  %v1238_v19 = vld [vmem:[%s9867_s1 + $0x2628] sm:$0xff]  ;;  %v1248_v16 = vld [vmem:[%s9867_s1 + $0x2678] sm:$0xff] }
 0x292   :  { %4477 = vmatpush1.bf16.msra.mxu0 %v4476_v27  ;;  %v1173_v27 = vld [vmem:[%s9867_s1 + $0x2420] sm:$0xff] }
 0x293   :  { %4861 = vmatpush1.bf16.msra.mxu1 %v4860_v28  ;;  %4479 = vmatprep.subr.bf16.mxu0 %v4478_v29  ;;  %v1181_v28 = vld [vmem:[%s9867_s1 + $0x2460] sm:$0xff]  ;;  %v1175_v29 = vld [vmem:[%s9867_s1 + $0x2430] sm:$0xff] }
 0x294   :  { %4863 = vmatprep.subr.bf16.mxu1 %v4862_v34  ;;  %v1198_v34 = vld [vmem:[%s9867_s1 + $0x24e8] sm:$0xff]  ;;  %v4496_v42 = vpack.c.bf16 %v1181_v28, %v1173_v27  ;;  %v4880_v44 = vpack.c.bf16 %v1183_v32, %v1175_v29  ;;  %v4894_v27 = vpack.c.bf16 %v1248_v16, %v1240_v15  ;;  %v1247_v28 = vld [vmem:[%s9867_s1 + $0x2670] sm:$0xff]  ;;  %v1256_v32 = vld [vmem:[%s9867_s1 + $0x26b8] sm:$0xff] }
 0x295   :  { %v4498_v45 = vpack.c.bf16 %v1198_v34, %v1190_v33  ;;  %v1254_v29 = vld [vmem:[%s9867_s1 + $0x26a8] sm:$0xff]  ;;  %v1264_v33 = vld [vmem:[%s9867_s1 + $0x26f8] sm:$0xff] }
 0x296   :  { %4481 = vmatpush1.bf16.msra.mxu0 %v4480_v47  ;;  %v1189_v47 = vld [vmem:[%s9867_s1 + $0x24a0] sm:$0xff] }
 0x297   :  { %4865 = vmatpush1.bf16.msra.mxu1 %v4864_v49  ;;  %4483 = vmatprep.subr.bf16.mxu0 %v4482_v50  ;;  %v1197_v49 = vld [vmem:[%s9867_s1 + $0x24e0] sm:$0xff]  ;;  %v1191_v50 = vld [vmem:[%s9867_s1 + $0x24b0] sm:$0xff] }
 0x298   :  { %4867 = vmatprep.subr.bf16.mxu1 %v4866_v53  ;;  %v1214_v53 = vld [vmem:[%s9867_s1 + $0x2568] sm:$0xff]  ;;  %v4500_v10 = vpack.c.bf16 %v1197_v49, %v1189_v47  ;;  %v4884_v58 = vpack.c.bf16 %v1199_v56, %v1191_v50  ;;  %v4898_v47 = vpack.c.bf16 %v1264_v33, %v1256_v32  ;;  %v1263_v49 = vld [vmem:[%s9867_s1 + $0x26f0] sm:$0xff]  ;;  %v1272_v56 = vld [vmem:[%s9867_s1 + $0x2738] sm:$0xff] }
 0x299   :  { %v4502_v60 = vpack.c.bf16 %v1214_v53, %v1206_v39  ;;  %v1270_v50 = vld [vmem:[%s9867_s1 + $0x2728] sm:$0xff]  ;;  %v1280_v39 = vld [vmem:[%s9867_s1 + $0x2778] sm:$0xff] }
 0x29a   :  { %4485 = vmatpush1.bf16.msra.mxu0 %v4484_v61  ;;  %v1205_v61 = vld [vmem:[%s9867_s1 + $0x2520] sm:$0xff] }
 0x29b   :  { %4869 = vmatpush1.bf16.msra.mxu1 %v4868_v8  ;;  %4487 = vmatprep.subr.bf16.mxu0 %v4486_v43  ;;  %v1213_v8 = vld [vmem:[%s9867_s1 + $0x2560] sm:$0xff]  ;;  %v1207_v43 = vld [vmem:[%s9867_s1 + $0x2530] sm:$0xff] }
 0x29c   :  { %4871 = vmatprep.subr.bf16.mxu1 %v4870_v0  ;;  %v1230_v0 = vld [vmem:[%s9867_s1 + $0x25e8] sm:$0xff]  ;;  %v4504_v3 = vpack.c.bf16 %v1213_v8, %v1205_v61  ;;  %v4888_v48 = vpack.c.bf16 %v1215_v23, %v1207_v43  ;;  %v4902_v61 = vpack.c.bf16 %v1280_v39, %v1272_v56  ;;  %v1279_v8 = vld [vmem:[%s9867_s1 + $0x2770] sm:$0xff]  ;;  %v1288_v23 = vld [vmem:[%s9867_s1 + $0x27b8] sm:$0xff] }
 0x29d   :  { %v4506_v4 = vpack.c.bf16 %v1230_v0, %v1222_v63  ;;  %v1286_v43 = vld [vmem:[%s9867_s1 + $0x27a8] sm:$0xff]  ;;  %v1296_v63 = vld [vmem:[%s9867_s1 + $0x27f8] sm:$0xff] }
 0x29e   :  { %4489 = vmatpush1.bf16.msra.mxu0 %v4488_v57  ;;  %v1221_v57 = vld [vmem:[%s9867_s1 + $0x25a0] sm:$0xff] }
 0x29f   :  { %4873 = vmatpush1.bf16.msra.mxu1 %v4872_v5  ;;  %4491 = vmatprep.subr.bf16.mxu0 %v4490_v9  ;;  %v1229_v5 = vld [vmem:[%s9867_s1 + $0x25e0] sm:$0xff]  ;;  %v1223_v9 = vld [vmem:[%s9867_s1 + $0x25b0] sm:$0xff] }
 0x2a0   :  { %4875 = vmatprep.subr.bf16.mxu1 %v4874_v14  ;;  %v1246_v14 = vld [vmem:[%s9867_s1 + $0x2668] sm:$0xff]  ;;  %v4508_v1 = vpack.c.bf16 %v1229_v5, %v1221_v57  ;;  %v4892_v17 = vpack.c.bf16 %v1231_v13, %v1223_v9  ;;  %v4906_v57 = vpack.c.bf16 %v1296_v63, %v1288_v23  ;;  %v1295_v5 = vld [vmem:[%s9867_s1 + $0x27f0] sm:$0xff]  ;;  %v1304_v13 = vld [vmem:[%s9867_s1 + $0x2838] sm:$0xff] }
 0x2a1   :  { %v4510_v18 = vpack.c.bf16 %v1246_v14, %v1238_v19  ;;  %v1302_v9 = vld [vmem:[%s9867_s1 + $0x2828] sm:$0xff]  ;;  %v1312_v19 = vld [vmem:[%s9867_s1 + $0x2878] sm:$0xff]  ;;  %v1349_v63 = vld [vmem:[%s9867_s1 + $0x29a0] sm:$0xff] }
 0x2a2   :  { %4493 = vmatpush1.bf16.msra.mxu0 %v4492_v20  ;;  %v1237_v20 = vld [vmem:[%s9867_s1 + $0x2620] sm:$0xff] }
 0x2a3   :  { %4877 = vmatpush1.bf16.msra.mxu1 %v4876_v22  ;;  %4495 = vmatprep.subr.bf16.mxu0 %v4494_v21  ;;  %v1245_v22 = vld [vmem:[%s9867_s1 + $0x2660] sm:$0xff]  ;;  %v1239_v21 = vld [vmem:[%s9867_s1 + $0x2630] sm:$0xff] }
 0x2a4   :  { %4879 = vmatprep.subr.bf16.mxu1 %v4878_v30  ;;  %v1262_v30 = vld [vmem:[%s9867_s1 + $0x26e8] sm:$0xff]  ;;  %v4512_v34 = vpack.c.bf16 %v1245_v22, %v1237_v20  ;;  %v4896_v35 = vpack.c.bf16 %v1247_v28, %v1239_v21  ;;  %v4910_v20 = vpack.c.bf16 %v1312_v19, %v1304_v13  ;;  %v1311_v22 = vld [vmem:[%s9867_s1 + $0x2870] sm:$0xff]  ;;  %v1320_v28 = vld [vmem:[%s9867_s1 + $0x28b8] sm:$0xff] }
 0x2a5   :  { %v4514_v41 = vpack.c.bf16 %v1262_v30, %v1254_v29  ;;  %v1318_v21 = vld [vmem:[%s9867_s1 + $0x28a8] sm:$0xff]  ;;  %v1328_v29 = vld [vmem:[%s9867_s1 + $0x28f8] sm:$0xff]  ;;  %v1365_v13 = vld [vmem:[%s9867_s1 + $0x2a20] sm:$0xff] }
 0x2a6   :  { %4497 = vmatpush1.bf16.msra.mxu0 %v4496_v42  ;;  %v1253_v42 = vld [vmem:[%s9867_s1 + $0x26a0] sm:$0xff] }
 0x2a7   :  { %4881 = vmatpush1.bf16.msra.mxu1 %v4880_v44  ;;  %4499 = vmatprep.subr.bf16.mxu0 %v4498_v45  ;;  %v1261_v44 = vld [vmem:[%s9867_s1 + $0x26e0] sm:$0xff]  ;;  %v1255_v45 = vld [vmem:[%s9867_s1 + $0x26b0] sm:$0xff] }
 0x2a8   :  { %4883 = vmatprep.subr.bf16.mxu1 %v4882_v37  ;;  %v1278_v37 = vld [vmem:[%s9867_s1 + $0x2768] sm:$0xff]  ;;  %v4516_v53 = vpack.c.bf16 %v1261_v44, %v1253_v42  ;;  %v4900_v54 = vpack.c.bf16 %v1263_v49, %v1255_v45  ;;  %v4914_v42 = vpack.c.bf16 %v1328_v29, %v1320_v28  ;;  %v1327_v44 = vld [vmem:[%s9867_s1 + $0x28f0] sm:$0xff]  ;;  %v1336_v49 = vld [vmem:[%s9867_s1 + $0x2938] sm:$0xff] }
 0x2a9   :  { %v4518_v40 = vpack.c.bf16 %v1278_v37, %v1270_v50  ;;  %v1334_v45 = vld [vmem:[%s9867_s1 + $0x2928] sm:$0xff]  ;;  %v1344_v50 = vld [vmem:[%s9867_s1 + $0x2978] sm:$0xff]  ;;  %v1373_v19 = vld [vmem:[%s9867_s1 + $0x2a60] sm:$0xff] }
 0x2aa   :  { %4501 = vmatpush1.bf16.msra.mxu0 %v4500_v10  ;;  %v1269_v10 = vld [vmem:[%s9867_s1 + $0x2720] sm:$0xff] }
 0x2ab   :  { %4885 = vmatpush1.bf16.msra.mxu1 %v4884_v58  ;;  %4503 = vmatprep.subr.bf16.mxu0 %v4502_v60  ;;  %v1277_v58 = vld [vmem:[%s9867_s1 + $0x2760] sm:$0xff]  ;;  %v1271_v60 = vld [vmem:[%s9867_s1 + $0x2730] sm:$0xff] }
 0x2ac   :  { %4887 = vmatprep.subr.bf16.mxu1 %v4886_v62  ;;  %v1294_v62 = vld [vmem:[%s9867_s1 + $0x27e8] sm:$0xff]  ;;  %v4520_v0 = vpack.c.bf16 %v1277_v58, %v1269_v10  ;;  %v4904_v2 = vpack.c.bf16 %v1279_v8, %v1271_v60  ;;  %v4918_v10 = vpack.c.bf16 %v1344_v50, %v1336_v49  ;;  %v1360_v8 = vld [vmem:[%s9867_s1 + $0x29f8] sm:$0xff]  ;;  %v1381_v28 = vld [vmem:[%s9867_s1 + $0x2aa0] sm:$0xff] }
 0x2ad   :  { %v4522_v6 = vpack.c.bf16 %v1294_v62, %v1286_v43  ;;  %v1350_v58 = vld [vmem:[%s9867_s1 + $0x29a8] sm:$0xff]  ;;  %v1389_v29 = vld [vmem:[%s9867_s1 + $0x2ae0] sm:$0xff] }
 0x2ae   :  { %4505 = vmatpush1.bf16.msra.mxu0 %v4504_v3  ;;  %v1285_v3 = vld [vmem:[%s9867_s1 + $0x27a0] sm:$0xff]  ;;  %v1358_v60 = vld [vmem:[%s9867_s1 + $0x29e8] sm:$0xff] }
 0x2af   :  { %4889 = vmatpush1.bf16.msra.mxu1 %v4888_v48  ;;  %4507 = vmatprep.subr.bf16.mxu0 %v4506_v4  ;;  %v1293_v48 = vld [vmem:[%s9867_s1 + $0x27e0] sm:$0xff]  ;;  %v1287_v4 = vld [vmem:[%s9867_s1 + $0x27b0] sm:$0xff]  ;;  %v4538_v23 = vpack.c.bf16 %v1358_v60, %v1350_v58 }
 0x2b0   :  { %4891 = vmatprep.subr.bf16.mxu1 %v4890_v12  ;;  %v1310_v12 = vld [vmem:[%s9867_s1 + $0x2868] sm:$0xff]  ;;  %v4524_v14 = vpack.c.bf16 %v1293_v48, %v1285_v3  ;;  %v4908_v15 = vpack.c.bf16 %v1295_v5, %v1287_v4  ;;  %v1368_v4 = vld [vmem:[%s9867_s1 + $0x2a38] sm:$0xff]  ;;  %v1397_v49 = vld [vmem:[%s9867_s1 + $0x2b20] sm:$0xff] }
 0x2b1   :  { %v4526_v16 = vpack.c.bf16 %v1310_v12, %v1302_v9  ;;  %v1366_v3 = vld [vmem:[%s9867_s1 + $0x2a28] sm:$0xff]  ;;  %v1405_v50 = vld [vmem:[%s9867_s1 + $0x2b60] sm:$0xff] }
 0x2b2   :  { %4509 = vmatpush1.bf16.msra.mxu0 %v4508_v1  ;;  %v1301_v1 = vld [vmem:[%s9867_s1 + $0x2820] sm:$0xff]  ;;  %v1374_v48 = vld [vmem:[%s9867_s1 + $0x2a68] sm:$0xff] }
 0x2b3   :  { %4893 = vmatpush1.bf16.msra.mxu1 %v4892_v17  ;;  %4511 = vmatprep.subr.bf16.mxu0 %v4510_v18  ;;  %v1309_v17 = vld [vmem:[%s9867_s1 + $0x2860] sm:$0xff]  ;;  %v1303_v18 = vld [vmem:[%s9867_s1 + $0x2830] sm:$0xff]  ;;  %v4542_v12 = vpack.c.bf16 %v1374_v48, %v1366_v3 }
 0x2b4   :  { %4895 = vmatprep.subr.bf16.mxu1 %v4894_v27  ;;  %v1326_v27 = vld [vmem:[%s9867_s1 + $0x28e8] sm:$0xff]  ;;  %v4528_v30 = vpack.c.bf16 %v1309_v17, %v1301_v1  ;;  %v4912_v32 = vpack.c.bf16 %v1311_v22, %v1303_v18  ;;  %v1384_v18 = vld [vmem:[%s9867_s1 + $0x2ab8] sm:$0xff]  ;;  %v4544_v22 = vpack.c.bf16 %v1373_v19, %v1365_v13 }
 0x2b5   :  { %v4530_v33 = vpack.c.bf16 %v1326_v27, %v1318_v21  ;;  %v1382_v1 = vld [vmem:[%s9867_s1 + $0x2aa8] sm:$0xff] }
 0x2b6   :  { %4513 = vmatpush1.bf16.msra.mxu0 %v4512_v34  ;;  %v1317_v34 = vld [vmem:[%s9867_s1 + $0x28a0] sm:$0xff]  ;;  %v1390_v17 = vld [vmem:[%s9867_s1 + $0x2ae8] sm:$0xff] }
 0x2b7   :  { %4897 = vmatpush1.bf16.msra.mxu1 %v4896_v35  ;;  %4515 = vmatprep.subr.bf16.mxu0 %v4514_v41  ;;  %v1325_v35 = vld [vmem:[%s9867_s1 + $0x28e0] sm:$0xff]  ;;  %v1319_v41 = vld [vmem:[%s9867_s1 + $0x28b0] sm:$0xff]  ;;  %v4546_v27 = vpack.c.bf16 %v1390_v17, %v1382_v1  ;;  %v1446_v13 = vld [vmem:[%s9867_s1 + $0x2ca8] sm:$0xff] }
 0x2b8   :  { %4899 = vmatprep.subr.bf16.mxu1 %v4898_v47  ;;  %v1342_v47 = vld [vmem:[%s9867_s1 + $0x2968] sm:$0xff]  ;;  %v4532_v37 = vpack.c.bf16 %v1325_v35, %v1317_v34  ;;  %v4916_v56 = vpack.c.bf16 %v1327_v44, %v1319_v41  ;;  %v1400_v41 = vld [vmem:[%s9867_s1 + $0x2b38] sm:$0xff]  ;;  %v4548_v44 = vpack.c.bf16 %v1389_v29, %v1381_v28 }
 0x2b9   :  { %v4534_v39 = vpack.c.bf16 %v1342_v47, %v1334_v45  ;;  %v1398_v34 = vld [vmem:[%s9867_s1 + $0x2b28] sm:$0xff] }
 0x2ba   :  { %4517 = vmatpush1.bf16.msra.mxu0 %v4516_v53  ;;  %v1333_v53 = vld [vmem:[%s9867_s1 + $0x2920] sm:$0xff]  ;;  %v1406_v35 = vld [vmem:[%s9867_s1 + $0x2b68] sm:$0xff] }
 0x2bb   :  { %4901 = vmatpush1.bf16.msra.mxu1 %v4900_v54  ;;  %4519 = vmatprep.subr.bf16.mxu0 %v4518_v40  ;;  %v1341_v54 = vld [vmem:[%s9867_s1 + $0x2960] sm:$0xff]  ;;  %v1335_v40 = vld [vmem:[%s9867_s1 + $0x2930] sm:$0xff]  ;;  %v4550_v47 = vpack.c.bf16 %v1406_v35, %v1398_v34  ;;  %v1454_v19 = vld [vmem:[%s9867_s1 + $0x2ce8] sm:$0xff] }
 0x2bc   :  { %4903 = vmatprep.subr.bf16.mxu1 %v4902_v61  ;;  %v1352_v61 = vld [vmem:[%s9867_s1 + $0x29b8] sm:$0xff]  ;;  %v4536_v43 = vpack.c.bf16 %v1341_v54, %v1333_v53  ;;  %v1414_v53 = vld [vmem:[%s9867_s1 + $0x2ba8] sm:$0xff]  ;;  %v4562_v17 = vpack.c.bf16 %v1454_v19, %v1446_v13 }
 0x2bd   :  { %v1422_v54 = vld [vmem:[%s9867_s1 + $0x2be8] sm:$0xff] }
 0x2be   :  { %4521 = vmatpush1.bf16.msra.mxu0 %v4520_v0  ;;  %v1357_v0 = vld [vmem:[%s9867_s1 + $0x29e0] sm:$0xff]  ;;  %v4554_v60 = vpack.c.bf16 %v1422_v54, %v1414_v53  ;;  %v1462_v28 = vld [vmem:[%s9867_s1 + $0x2d28] sm:$0xff] }
 0x2bf   :  { %4905 = vmatpush1.bf16.msra.mxu1 %v4904_v2  ;;  %4523 = vmatprep.subr.bf16.mxu0 %v4522_v6  ;;  %v1351_v2 = vld [vmem:[%s9867_s1 + $0x29b0] sm:$0xff]  ;;  %v4540_v5 = vpack.c.bf16 %v1357_v0, %v1349_v63  ;;  %v1430_v63 = vld [vmem:[%s9867_s1 + $0x2c28] sm:$0xff] }
 0x2c0   :  { %4907 = vmatprep.subr.bf16.mxu1 %v4906_v57  ;;  %v1359_v6 = vld [vmem:[%s9867_s1 + $0x29f0] sm:$0xff]  ;;  %v1376_v57 = vld [vmem:[%s9867_s1 + $0x2a78] sm:$0xff]  ;;  %v1438_v0 = vld [vmem:[%s9867_s1 + $0x2c68] sm:$0xff] }
 0x2c1   :  { %v4924_v9 = vpack.c.bf16 %v1359_v6, %v1351_v2  ;;  %v1432_v2 = vld [vmem:[%s9867_s1 + $0x2c38] sm:$0xff]  ;;  %v4558_v48 = vpack.c.bf16 %v1438_v0, %v1430_v63  ;;  %v1470_v29 = vld [vmem:[%s9867_s1 + $0x2d68] sm:$0xff] }
 0x2c2   :  { %4525 = vmatpush1.bf16.msra.mxu0 %v4524_v14  ;;  %v1367_v14 = vld [vmem:[%s9867_s1 + $0x2a30] sm:$0xff]  ;;  %v4566_v35 = vpack.c.bf16 %v1470_v29, %v1462_v28 }
 0x2c3   :  { %4909 = vmatpush1.bf16.msra.mxu1 %v4908_v15  ;;  %4527 = vmatprep.subr.bf16.mxu0 %v4526_v16  ;;  %v4926_v15 = vpack.c.bf16 %v1376_v57, %v1368_v4  ;;  %v1375_v16 = vld [vmem:[%s9867_s1 + $0x2a70] sm:$0xff]  ;;  %v1429_v4 = vld [vmem:[%s9867_s1 + $0x2c20] sm:$0xff] }
 0x2c4   :  { %4911 = vmatprep.subr.bf16.mxu1 %v4910_v20  ;;  %v1392_v20 = vld [vmem:[%s9867_s1 + $0x2af8] sm:$0xff]  ;;  %v4928_v21 = vpack.c.bf16 %v1375_v16, %v1367_v14  ;;  %v1437_v57 = vld [vmem:[%s9867_s1 + $0x2c60] sm:$0xff] }
 0x2c5   :  { %2858 = vmatmul.mubr.f32.vlgmr.msra.gmra.mrb[2].mxu0 %v7117_v7  ;;  %v1448_v14 = vld [vmem:[%s9867_s1 + $0x2cb8] sm:$0xff]  ;;  %v4560_v16 = vpack.c.bf16 %v1437_v57, %v1429_v4  ;;  %v1510_v4 = vld [vmem:[%s9867_s1 + $0x2ea8] sm:$0xff] }
 0x2c6   :  { %4529 = vmatpush1.bf16.msra.mxu0 %v4528_v30  ;;  %3284 = vmatmul.mubr.f32.vlgmr.msra.gmra.mrb[2].mxu1 %v7117_v7  ;;  %v1343_v7 = vld [vmem:[%s9867_s1 + $0x2970] sm:$0xff]  ;;  %v1518_v57 = vld [vmem:[%s9867_s1 + $0x2ee8] sm:$0xff] }
 0x2c7   :  { %4913 = vmatpush1.bf16.msra.mxu1 %v4912_v32  ;;  %4531 = vmatprep.subr.bf16.mxu0 %v4530_v33  ;;  %v4920_v62 = vpack.c.bf16 %v1343_v7, %v1335_v40  ;;  %v1383_v30 = vld [vmem:[%s9867_s1 + $0x2ab0] sm:$0xff]  ;;  %v4930_v32 = vpack.c.bf16 %v1392_v20, %v1384_v18  ;;  %v1416_v40 = vld [vmem:[%s9867_s1 + $0x2bb8] sm:$0xff]  ;;  %v4552_v7 = vpack.c.bf16 %v1405_v50, %v1397_v49  ;;  %v1445_v18 = vld [vmem:[%s9867_s1 + $0x2ca0] sm:$0xff] }
 0x2c8   :  { %4915 = vmatprep.subr.bf16.mxu1 %v4914_v42  ;;  %2928 = vmatprep.mubr.f32.mxu0 %v7145_v25  ;;  %v1391_v33 = vld [vmem:[%s9867_s1 + $0x2af0] sm:$0xff]  ;;  %v1408_v42 = vld [vmem:[%s9867_s1 + $0x2b78] sm:$0xff]  ;;  %v1453_v20 = vld [vmem:[%s9867_s1 + $0x2ce0] sm:$0xff]  ;;  %v4578_v19 = vpack.c.bf16 %v1518_v57, %v1510_v4 }
 0x2c9   :  { %3354 = vmatprep.mubr.f32.mxu1 %v7145_v25  ;;  %v4922_v25 = vpack.c.bf16 %v1360_v8, %v1352_v61  ;;  %v4932_v45 = vpack.c.bf16 %v1391_v33, %v1383_v30  ;;  %v1413_v61 = vld [vmem:[%s9867_s1 + $0x2ba0] sm:$0xff]  ;;  %v1464_v30 = vld [vmem:[%s9867_s1 + $0x2d38] sm:$0xff]  ;;  %v4564_v33 = vpack.c.bf16 %v1453_v20, %v1445_v18  ;;  %v1478_v49 = vld [vmem:[%s9867_s1 + $0x2da8] sm:$0xff] }
 0x2ca   :  { %4533 = vmatpush1.bf16.msra.mxu0 %v4532_v37  ;;  %v1399_v37 = vld [vmem:[%s9867_s1 + $0x2b30] sm:$0xff]  ;;  %v1421_v8 = vld [vmem:[%s9867_s1 + $0x2be0] sm:$0xff]  ;;  %v1486_v50 = vld [vmem:[%s9867_s1 + $0x2de8] sm:$0xff] }
 0x2cb   :  { %4917 = vmatpush1.bf16.msra.mxu1 %v4916_v56  ;;  %4535 = vmatprep.subr.bf16.mxu0 %v4534_v39  ;;  %v4934_v56 = vpack.c.bf16 %v1408_v42, %v1400_v41  ;;  %v1407_v39 = vld [vmem:[%s9867_s1 + $0x2b70] sm:$0xff]  ;;  %v4556_v6 = vpack.c.bf16 %v1421_v8, %v1413_v61  ;;  %v1461_v41 = vld [vmem:[%s9867_s1 + $0x2d20] sm:$0xff]  ;;  %v4570_v54 = vpack.c.bf16 %v1486_v50, %v1478_v49  ;;  %v1494_v61 = vld [vmem:[%s9867_s1 + $0x2e28] sm:$0xff] }
 0x2cc   :  { %4919 = vmatprep.subr.bf16.mxu1 %v4918_v10  ;;  %v1424_v10 = vld [vmem:[%s9867_s1 + $0x2bf8] sm:$0xff]  ;;  %v4936_v58 = vpack.c.bf16 %v1407_v39, %v1399_v37  ;;  %v1469_v42 = vld [vmem:[%s9867_s1 + $0x2d60] sm:$0xff]  ;;  %v1502_v8 = vld [vmem:[%s9867_s1 + $0x2e68] sm:$0xff] }
 0x2cd   :  { %v1480_v37 = vld [vmem:[%s9867_s1 + $0x2db8] sm:$0xff]  ;;  %v4568_v39 = vpack.c.bf16 %v1469_v42, %v1461_v41  ;;  %v4574_v0 = vpack.c.bf16 %v1502_v8, %v1494_v61  ;;  %v1526_v18 = vld [vmem:[%s9867_s1 + $0x2f28] sm:$0xff] }
 0x2ce   :  { %4537 = vmatpush1.bf16.msra.mxu0 %v4536_v43  ;;  %v1415_v43 = vld [vmem:[%s9867_s1 + $0x2bb0] sm:$0xff]  ;;  %v1534_v20 = vld [vmem:[%s9867_s1 + $0x2f68] sm:$0xff] }
 0x2cf   :  { %4921 = vmatpush1.bf16.msra.mxu1 %v4920_v62  ;;  %4539 = vmatprep.subr.bf16.mxu0 %v4538_v23  ;;  %v4938_v62 = vpack.c.bf16 %v1424_v10, %v1416_v40  ;;  %v1423_v23 = vld [vmem:[%s9867_s1 + $0x2bf0] sm:$0xff]  ;;  %v1477_v40 = vld [vmem:[%s9867_s1 + $0x2da0] sm:$0xff]  ;;  %v4582_v29 = vpack.c.bf16 %v1534_v20, %v1526_v18  ;;  %v1542_v41 = vld [vmem:[%s9867_s1 + $0x2fa8] sm:$0xff] }
 0x2d0   :  { %4923 = vmatprep.subr.bf16.mxu1 %v4922_v25  ;;  %v1440_v25 = vld [vmem:[%s9867_s1 + $0x2c78] sm:$0xff]  ;;  %v4940_v3 = vpack.c.bf16 %v1423_v23, %v1415_v43  ;;  %v1485_v10 = vld [vmem:[%s9867_s1 + $0x2de0] sm:$0xff]  ;;  %v1550_v42 = vld [vmem:[%s9867_s1 + $0x2fe8] sm:$0xff] }
 0x2d1   :  { %v1496_v43 = vld [vmem:[%s9867_s1 + $0x2e38] sm:$0xff]  ;;  %v4572_v23 = vpack.c.bf16 %v1485_v10, %v1477_v40  ;;  %v4586_v50 = vpack.c.bf16 %v1550_v42, %v1542_v41 }
 0x2d2   :  { %4541 = vmatpush1.bf16.msra.mxu0 %v4540_v5  ;;  %v1431_v5 = vld [vmem:[%s9867_s1 + $0x2c30] sm:$0xff] }
 0x2d3   :  { %4925 = vmatpush1.bf16.msra.mxu1 %v4924_v9  ;;  %4543 = vmatprep.subr.bf16.mxu0 %v4542_v12  ;;  %v4942_v9 = vpack.c.bf16 %v1440_v25, %v1432_v2  ;;  %v1439_v12 = vld [vmem:[%s9867_s1 + $0x2c70] sm:$0xff]  ;;  %v1493_v2 = vld [vmem:[%s9867_s1 + $0x2e20] sm:$0xff] }
 0x2d4   :  { %4927 = vmatprep.subr.bf16.mxu1 %v4926_v15  ;;  %v1456_v15 = vld [vmem:[%s9867_s1 + $0x2cf8] sm:$0xff]  ;;  %v4944_v1 = vpack.c.bf16 %v1439_v12, %v1431_v5  ;;  %v1501_v25 = vld [vmem:[%s9867_s1 + $0x2e60] sm:$0xff] }
 0x2d5   :  { %v1512_v5 = vld [vmem:[%s9867_s1 + $0x2eb8] sm:$0xff]  ;;  %v4576_v12 = vpack.c.bf16 %v1501_v25, %v1493_v2 }
 0x2d6   :  { %4545 = vmatpush1.bf16.msra.mxu0 %v4544_v22  ;;  %v1447_v22 = vld [vmem:[%s9867_s1 + $0x2cb0] sm:$0xff] }
 0x2d7   :  { %4929 = vmatpush1.bf16.msra.mxu1 %v4928_v21  ;;  %4547 = vmatprep.subr.bf16.mxu0 %v4546_v27  ;;  %v4946_v21 = vpack.c.bf16 %v1456_v15, %v1448_v14  ;;  %v1455_v27 = vld [vmem:[%s9867_s1 + $0x2cf0] sm:$0xff]  ;;  %v1509_v14 = vld [vmem:[%s9867_s1 + $0x2ea0] sm:$0xff] }
 0x2d8   :  { %4931 = vmatprep.subr.bf16.mxu1 %v4930_v32  ;;  %v1472_v32 = vld [vmem:[%s9867_s1 + $0x2d78] sm:$0xff]  ;;  %v4948_v34 = vpack.c.bf16 %v1455_v27, %v1447_v22  ;;  %v1517_v15 = vld [vmem:[%s9867_s1 + $0x2ee0] sm:$0xff] }
 0x2d9   :  { %v1528_v22 = vld [vmem:[%s9867_s1 + $0x2f38] sm:$0xff]  ;;  %v4580_v27 = vpack.c.bf16 %v1517_v15, %v1509_v14 }
 0x2da   :  { %4549 = vmatpush1.bf16.msra.mxu0 %v4548_v44  ;;  %v1463_v44 = vld [vmem:[%s9867_s1 + $0x2d30] sm:$0xff] }
 0x2db   :  { %4933 = vmatpush1.bf16.msra.mxu1 %v4932_v45  ;;  %4551 = vmatprep.subr.bf16.mxu0 %v4550_v47  ;;  %v4950_v45 = vpack.c.bf16 %v1472_v32, %v1464_v30  ;;  %v1471_v47 = vld [vmem:[%s9867_s1 + $0x2d70] sm:$0xff]  ;;  %v1525_v30 = vld [vmem:[%s9867_s1 + $0x2f20] sm:$0xff] }
 0x2dc   :  { %4935 = vmatprep.subr.bf16.mxu1 %v4934_v56  ;;  %v1488_v56 = vld [vmem:[%s9867_s1 + $0x2df8] sm:$0xff]  ;;  %v4952_v53 = vpack.c.bf16 %v1471_v47, %v1463_v44  ;;  %v1533_v32 = vld [vmem:[%s9867_s1 + $0x2f60] sm:$0xff] }
 0x2dd   :  { %v1544_v44 = vld [vmem:[%s9867_s1 + $0x2fb8] sm:$0xff]  ;;  %v4584_v47 = vpack.c.bf16 %v1533_v32, %v1525_v30 }
 0x2de   :  { %4553 = vmatpush1.bf16.msra.mxu0 %v4552_v7  ;;  %v1479_v7 = vld [vmem:[%s9867_s1 + $0x2db0] sm:$0xff] }
 0x2df   :  { %4937 = vmatpush1.bf16.msra.mxu1 %v4936_v58  ;;  %4555 = vmatprep.subr.bf16.mxu0 %v4554_v60  ;;  %v4954_v58 = vpack.c.bf16 %v1488_v56, %v1480_v37  ;;  %v1487_v60 = vld [vmem:[%s9867_s1 + $0x2df0] sm:$0xff]  ;;  %v1541_v37 = vld [vmem:[%s9867_s1 + $0x2fa0] sm:$0xff] }
 0x2e0   :  { %4939 = vmatprep.subr.bf16.mxu1 %v4938_v62  ;;  %v1504_v62 = vld [vmem:[%s9867_s1 + $0x2e78] sm:$0xff]  ;;  %v4956_v63 = vpack.c.bf16 %v1487_v60, %v1479_v7  ;;  %v1549_v56 = vld [vmem:[%s9867_s1 + $0x2fe0] sm:$0xff] }
 0x2e1   :  { %v4588_v40 = vpack.c.bf16 %v1549_v56, %v1541_v37  ;;  %v5026_v7 = vld [vmem:[%s9868_s2] sm:$0xff] }
 0x2e2   :  { %4557 = vmatpush1.bf16.msra.mxu0 %v4556_v6  ;;  %v1495_v6 = vld [vmem:[%s9867_s1 + $0x2e30] sm:$0xff]  ;;  %v1644_v60 = vrot.slane %v5026_v7, %v1582_v31  ;;  %v1640_v61 = vrot.slane %v5026_v7, %v1578_v55  ;;  %v1648_v8 = vrot.slane %v5026_v7, %v1586_v38 }
 0x2e3   :  { %4941 = vmatpush1.bf16.msra.mxu1 %v4940_v3  ;;  %4559 = vmatprep.subr.bf16.mxu0 %v4558_v48  ;;  %v4958_v3 = vpack.c.bf16 %v1504_v62, %v1496_v43  ;;  %v1503_v48 = vld [vmem:[%s9867_s1 + $0x2e70] sm:$0xff] }
 0x2e4   :  { %4943 = vmatprep.subr.bf16.mxu1 %v4942_v9  ;;  %v1520_v9 = vld [vmem:[%s9867_s1 + $0x2ef8] sm:$0xff]  ;;  %v4960_v13 = vpack.c.bf16 %v1503_v48, %v1495_v6 }
 0x2e6   :  { %4561 = vmatpush1.bf16.msra.mxu0 %v4560_v16  ;;  %v1511_v16 = vld [vmem:[%s9867_s1 + $0x2eb0] sm:$0xff] }
 0x2e7   :  { %4945 = vmatpush1.bf16.msra.mxu1 %v4944_v1  ;;  %4563 = vmatprep.subr.bf16.mxu0 %v4562_v17  ;;  %v4962_v1 = vpack.c.bf16 %v1520_v9, %v1512_v5  ;;  %v1519_v17 = vld [vmem:[%s9867_s1 + $0x2ef0] sm:$0xff] }
 0x2e8   :  { %4947 = vmatprep.subr.bf16.mxu1 %v4946_v21  ;;  %v1536_v21 = vld [vmem:[%s9867_s1 + $0x2f78] sm:$0xff]  ;;  %v4964_v28 = vpack.c.bf16 %v1519_v17, %v1511_v16 }
 0x2ea   :  { %4565 = vmatpush1.bf16.msra.mxu0 %v4564_v33  ;;  %v1527_v33 = vld [vmem:[%s9867_s1 + $0x2f30] sm:$0xff] }
 0x2eb   :  { %4949 = vmatpush1.bf16.msra.mxu1 %v4948_v34  ;;  %4567 = vmatprep.subr.bf16.mxu0 %v4566_v35  ;;  %v4966_v34 = vpack.c.bf16 %v1536_v21, %v1528_v22  ;;  %v1535_v35 = vld [vmem:[%s9867_s1 + $0x2f70] sm:$0xff] }
 0x2ec   :  { %4951 = vmatprep.subr.bf16.mxu1 %v4950_v45  ;;  %v1552_v45 = vld [vmem:[%s9867_s1 + $0x2ff8] sm:$0xff]  ;;  %v4968_v49 = vpack.c.bf16 %v1535_v35, %v1527_v33 }
 0x2ee   :  { %4569 = vmatpush1.bf16.msra.mxu0 %v4568_v39  ;;  %v4970_v39 = vpack.c.bf16 %v1552_v45, %v1544_v44 }
 0x2ef   :  { %4953 = vmatpush1.bf16.msra.mxu1 %v4952_v53  ;;  %4571 = vmatprep.subr.bf16.mxu0 %v4570_v54  ;;  %v1543_v53 = vld [vmem:[%s9867_s1 + $0x2fb0] sm:$0xff] }
 0x2f0   :  { %4955 = vmatprep.subr.bf16.mxu1 %v4954_v58  ;;  %v1551_v54 = vld [vmem:[%s9867_s1 + $0x2ff0] sm:$0xff]  ;;  %v1636_v58 = vrot.slane %v5026_v7, %v1574_v26  ;;  %s5052_s1 = smov [#allocation2]  }
 0x2f1   :  { %v4972_v10 = vpack.c.bf16 %v1551_v54, %v1543_v53  ;;  %s3430_s2 = sshll.u32 %s5052_s1, 4  ;;  %s3431_s2 = int_to_ptr.vmem [resolvable:$true] %s3430_s2 }
 0x2f2   :  { %4573 = vmatpush1.bf16.msra.mxu0 %v4572_v23  ;;  %s5027_s17 = scalar_lea.vmem %s3431_s2, 128  ;;  %p5032_p1 = scmp.lt.s32.totalorder %s3431_s2, %s3431_s2 }
 0x2f3   :  { %4957 = vmatpush1.bf16.msra.mxu1 %v4956_v63  ;;  %4575 = vmatprep.subr.bf16.mxu0 %v4574_v0  ;;  %p5028_p0 = scmp.ne.s32.totalorder %s3431_s2, %s5027_s17  ;;  %p5033_p2 = scmp.lt.s32.totalorder %s5027_s17, %s5027_s17 }
 0x2f4   :  { %4959 = vmatprep.subr.bf16.mxu1 %v4958_v3 }
 0x2f5   :  { %p5034_p3 = por %p5033_p2, %p5032_p1 }
 0x2f6   :  { %4577 = vmatpush1.bf16.msra.mxu0 %v4576_v12 }
 0x2f7   :  { %4961 = vmatpush1.bf16.msra.mxu1 %v4960_v13  ;;  %4579 = vmatprep.subr.bf16.mxu0 %v4578_v19  ;;  %p5035_p4 = pnand %p5034_p3, %p5028_p0 }
 0x2f8   :  { %4963 = vmatprep.subr.bf16.mxu1 %v4962_v1 }
 0x2fa   :  { %4581 = vmatpush1.bf16.msra.mxu0 %v4580_v27 }
 0x2fb   :  { %4965 = vmatpush1.bf16.msra.mxu1 %v4964_v28  ;;  %4583 = vmatprep.subr.bf16.mxu0 %v4582_v29 }
 0x2fc   :  { %4967 = vmatprep.subr.bf16.mxu1 %v4966_v34 }
 0x2fe   :  { %4585 = vmatpush1.bf16.msra.mxu0 %v4584_v47 }
 0x2ff   :  { %4969 = vmatpush1.bf16.msra.mxu1 %v4968_v49  ;;  %4587 = vmatprep.subr.bf16.mxu0 %v4586_v50 }
 0x300   :  { %4971 = vmatprep.subr.bf16.mxu1 %v4970_v39 }
 0x302   :  { %4589 = vmatpush1.bf16.msra.mxu0 %v4588_v40 }
 0x303   :  { %4973 = vmatpush1.bf16.msra.mxu1 %v4972_v10 }
 0x305   :  { %2929 = vmatmul.mubr.f32.vlgmr.msra.gmra.mrb[2].mxu0 %v7515_v36 }
 0x306   :  { %3355 = vmatmul.mubr.f32.vlgmr.msra.gmra.mrb[2].mxu1 %v7515_v36 }
 0x3d8   :  { %v2930_v43 = vpop.f32.mrb[2].mxu0 }
 0x3d9   :  { %v4978_v62 = vadd.f32 %v2930_v43, %v1636_v58  ;;  %v3356_v23 = vpop.f32.mrb[2].mxu1  ;;  %v2932_v36 = vpop.f32.mrb[3].mxu0 }
 0x3da   :  { %v4980_v63 = vadd.f32 %v3356_v23, %v1644_v60  ;;  %v4979_v0 = vadd.f32 %v2932_v36, %v1640_v61  ;;  %v3358_v2 = vpop.f32.mrb[3].mxu1 }
 0x3db   :  { %v4981_v25 = vadd.f32 %v3358_v2, %v1648_v8 }
 0x3dc   :  { %v3371_v6 = vcombine.low %v4978_v62, %v4979_v0 }
 0x3dd   :  { %v3372_v3 = vcombine.low %v4980_v63, %v4981_v25 }
 0x3de   :  { %v3393_v26 = vrot.slane %v3371_v6, %v8843_v11 }
 0x3df   :  { %v3400_v31 = vrot.slane %v3372_v3, %v8843_v11 }
 0x3e1   :  { %v3402_v48 = vcombine.low %v3393_v26, %v3400_v31 }
 0x3e3   :  { %v3416_v55 = vrot.slane %v3402_v48, %v8843_v11 }
 0x3e5   :  { %v3417_v38 = vcombine.low %v3409_v59, %v3416_v55 }
 0x3e7   :  { %3423 = vst.msk [vmem:[#allocation2] sm:$0xff] %vm3421_vm0, %v3417_v38 }
 0x3e8   :  { %5038 = shalt.err (!%p5035_p4)
}
 0x3e9   :  { %s5039_s20 = scalar_lea.hbm %s9869_s3, 128 }
 0x3ea   :  { %p5040_p5 = scmp.ne.s32.totalorder %s9869_s3, %s5039_s20  ;;  %p5043_p6 = scmp.lt.u32.totalorder %s5039_s20, %s9869_s3 }
 0x3ec   :  { %p5045_p7 = pnand %p5043_p6, %p5040_p5 }
 0x3ee   :  { %5048 = shalt.err (!%p5045_p7)
}
 0x3ef   :  { %3433 = dma.vmem_to_hbm [thread:$0]  %s3431_s2, 128, %s9869_s3, [#allocation3]  }
 0x3f0   :  { %5049 = dma.done.wait [#allocation3], 128  }
 0x3f1   :  { %5050 = vsyncadd [#allocation3], 4294967168 }
 0x3f2   :  { %3437 = vsyncpa [#allocation3], 1 }

</bundles_post_ra>
